<compile_context>
chip_gen: v7x
topology: tpu7x:2x2x1
jax: 0.10.0
libtpu: 0.0.40
codegen_flags: <defaults>
</compile_context>

<pallas_src>
import functools

import jax
import jax.numpy as jnp
from jax.experimental import pallas as pl
from jax.experimental.pallas import tpu as pltpu

C_IN = 768       # BERT hidden size (fixed by the module)
C_OUT = 256      # conv output channels
KSZ = 5          # conv kernel size
N_CLASSES = 4
PAD_OUT = 128    # lane-dense padded logits width


def _head_kernel(x_ref, wconv_ref, bconv_ref, w1_ref, b1_ref, w2_ref, b2_ref,
                 o_ref):
    # x_ref block: (TB, L, C_IN) bf16 -> TB batch elements.
    tb, L, _ = x_ref.shape
    out_len = L - KSZ + 1                         # 'valid' conv, stride 1

    # One big MXU LHS for the whole block.
    x2d = x_ref[...].reshape(tb * L, C_IN)        # (TB*L, 768) bf16

    # Conv1d as K shifted matmuls: per tap, matmul over the full sequence
    # (M = TB*L rows on the MXU), then add the k-shifted window.
    acc = jnp.zeros((tb, out_len, C_OUT), jnp.float32)
    for k in range(KSZ):                          # static unrolled (K = 5)
        y = jnp.dot(x2d, wconv_ref[k],
                    preferred_element_type=jnp.float32)        # (TB*L, 256)
        y = y.reshape(tb, L, C_OUT)
        acc = acc + y[:, k:k + out_len, :]

    # Bias + ReLU (f32 on the VPU).
    acc = jnp.maximum(acc + bconv_ref[...], 0.0)  # (TB, out_len, 256)

    # adaptive_max_pool1d(x, 1) == max over the time axis.
    pooled = jnp.max(acc, axis=1)                 # (TB, 256) f32

    # clf1: Linear(256 -> 256), batched over the block.
    h = jnp.dot(pooled.astype(jnp.bfloat16), w1_ref[...],
                preferred_element_type=jnp.float32) + b1_ref[...]

    # clf2: Linear(256 -> 4), padded to 128 output lanes (extra cols are 0).
    out = jnp.dot(h.astype(jnp.bfloat16), w2_ref[...],
                  preferred_element_type=jnp.float32) + b2_ref[...]

    o_ref[...] = out                              # (TB, 128) lane-dense store


@functools.partial(jax.jit, static_argnames=("block_batch",))
def net_head(x, conv_w, conv_b, w1, b1, w2, b2, *, block_batch=8):
    """x: (B, L, 768) BERT last hidden states.  Returns (B, 4) logits."""
    B, L, C = x.shape
    assert C == C_IN and L >= KSZ
    TB = block_batch
    B_pad = ((B + TB - 1) // TB) * TB
    if B_pad != B:
        x = jnp.pad(x, ((0, B_pad - B), (0, 0), (0, 0)))

    # bf16 MXU operands (halves x / conv_w DMA bytes); f32 biases.
    x_bf = x.astype(jnp.bfloat16)
    conv_w_bf = conv_w.astype(jnp.bfloat16)
    w1_bf = w1.astype(jnp.bfloat16)
    w2_pad = jnp.pad(w2, ((0, 0), (0, PAD_OUT - N_CLASSES))).astype(jnp.bfloat16)
    b2_pad = jnp.pad(b2, ((0, 0), (0, PAD_OUT - N_CLASSES))).astype(jnp.float32)
    conv_b = conv_b.astype(jnp.float32)
    b1 = b1.astype(jnp.float32)

    full = lambda shape: pl.BlockSpec(shape, lambda b: (0,) * len(shape))

    out_pad = pl.pallas_call(
        _head_kernel,
        out_shape=jax.ShapeDtypeStruct((B_pad, PAD_OUT), jnp.float32),
        grid_spec=pltpu.PrefetchScalarGridSpec(
            num_scalar_prefetch=0,
            grid=(B_pad // TB,),
            in_specs=[
                pl.BlockSpec((TB, L, C_IN), lambda b: (b, 0, 0)),  # x
                full((KSZ, C_IN, C_OUT)),                          # conv_w
                full((1, C_OUT)),                                  # conv_b
                full((C_OUT, C_OUT)),                              # w1
                full((1, C_OUT)),                                  # b1
                full((C_OUT, PAD_OUT)),                            # w2 (padded)
                full((1, PAD_OUT)),                                # b2 (padded)
            ],
            out_specs=pl.BlockSpec((TB, PAD_OUT), lambda b: (b, 0)),
        ),
        compiler_params=pltpu.CompilerParams(
            dimension_semantics=("parallel",)),
    )(x_bf, conv_w_bf, conv_b, w1_bf, b1, w2_pad, b2_pad)

    return out_pad[:B, :N_CLASSES]


def _reference(x, conv_w, conv_b, w1, b1, w2, b2):
    """Pure-JAX f32 reference of the same head (module semantics)."""
    B, L, _ = x.shape
    out_len = L - KSZ + 1
    conv = jnp.zeros((B, out_len, C_OUT), jnp.float32)
    for k in range(KSZ):
        conv = conv + jnp.einsum('blc,co->blo', x[:, k:k + out_len, :],
                                 conv_w[k])
    conv = jnp.maximum(conv + conv_b[None, :, :], 0.0)
    pooled = jnp.max(conv, axis=1)                     # (B, 256)
    h = pooled @ w1 + b1
    return h @ w2 + b2


if __name__ == "__main__":
    key = jax.random.PRNGKey(0)
    kx, kcw, kcb, kw1, kb1, kw2, kb2 = jax.random.split(key, 7)

    B, L = 16, 16                      # small seq length; hidden=768 is fixed

    # Synthetic BERT last-hidden-state output.
    x = jax.random.normal(kx, (B, L, C_IN), jnp.float32)

    # PyTorch Conv1d weight is (C_OUT, C_IN, K); stored pre-transposed as
    # (K, C_IN, C_OUT) so each tap is a ready-to-matmul (768, 256) matrix.
    conv_w = jax.random.normal(kcw, (KSZ, C_IN, C_OUT), jnp.float32) * 0.02
    conv_b = jax.random.normal(kcb, (1, C_OUT), jnp.float32) * 0.02
    w1 = jax.random.normal(kw1, (C_OUT, C_OUT), jnp.float32) * 0.02
    b1 = jax.random.normal(kb1, (1, C_OUT), jnp.float32) * 0.02
    w2 = jax.random.normal(kw2, (C_OUT, N_CLASSES), jnp.float32) * 0.02
    b2 = jax.random.normal(kb2, (1, N_CLASSES), jnp.float32) * 0.02

    out = net_head(x, conv_w, conv_b, w1, b1, w2, b2)
    jax.block_until_ready(out)
    assert out.shape == (B, N_CLASSES), out.shape

    # bf16 MXU inputs -> loosened tolerance vs. the pure-f32 reference.
    ref = _reference(x, conv_w, conv_b, w1, b1, w2, b2)
    assert jnp.allclose(out, ref, atol=5e-2, rtol=5e-2), (
        jnp.max(jnp.abs(out - ref)))

    print("KERNEL_OK")
</pallas_src>

<mosaic_0001>
module attributes {stable_mosaic.version = 11 : i64} {
  func.func @_head_kernel(%arg0: i32, %arg1: memref<8x16x768xbf16, #tpu.memory_space<vmem>>, %arg2: memref<5x768x256xbf16, #tpu.memory_space<vmem>>, %arg3: memref<1x256xf32, #tpu.memory_space<vmem>>, %arg4: memref<256x256xbf16, #tpu.memory_space<vmem>>, %arg5: memref<1x256xf32, #tpu.memory_space<vmem>>, %arg6: memref<256x128xbf16, #tpu.memory_space<vmem>>, %arg7: memref<1x128xf32, #tpu.memory_space<vmem>>, %arg8: memref<8x128xf32, #tpu.memory_space<vmem>>) attributes {dimension_semantics = [#tpu.dimension_semantics<parallel>], iteration_bounds = array<i64: 2>, scalar_prefetch = 0 : i64, scratch_operands = 0 : i64, tpu.core_type = #tpu.core_type<tc>, window_params = [{transform_indices = @transform_0, window_bounds = array<i64: 8, 16, 768>}, {pipeline_mode = #tpu.pipeline_mode<synchronous>, transform_indices = @transform_1, window_bounds = array<i64: 5, 768, 256>}, {pipeline_mode = #tpu.pipeline_mode<synchronous>, transform_indices = @transform_2, window_bounds = array<i64: 1, 256>}, {pipeline_mode = #tpu.pipeline_mode<synchronous>, transform_indices = @transform_3, window_bounds = array<i64: 256, 256>}, {pipeline_mode = #tpu.pipeline_mode<synchronous>, transform_indices = @transform_4, window_bounds = array<i64: 1, 256>}, {pipeline_mode = #tpu.pipeline_mode<synchronous>, transform_indices = @transform_5, window_bounds = array<i64: 256, 128>}, {pipeline_mode = #tpu.pipeline_mode<synchronous>, transform_indices = @transform_6, window_bounds = array<i64: 1, 128>}, {transform_indices = @transform_7, window_bounds = array<i64: 8, 128>}]} {
    %c0 = arith.constant 0 : index
    %c0_0 = arith.constant 0 : index
    %c0_1 = arith.constant 0 : index
    %0 = vector.load %arg1[%c0, %c0_0, %c0_1] : memref<8x16x768xbf16, #tpu.memory_space<vmem>>, vector<8x16x768xbf16>
    %1 = vector.shape_cast %0 : vector<8x16x768xbf16> to vector<128x768xbf16>
    %cst = arith.constant 0.000000e+00 : f32
    %2 = vector.broadcast %cst : f32 to vector<8x12x256xf32>
    %c0_2 = arith.constant 0 : index
    %c0_3 = arith.constant 0 : index
    %c0_4 = arith.constant 0 : index
    %3 = vector.load %arg2[%c0_2, %c0_3, %c0_4] : memref<5x768x256xbf16, #tpu.memory_space<vmem>>, vector<1x768x256xbf16>
    %4 = vector.shape_cast %3 : vector<1x768x256xbf16> to vector<768x256xbf16>
    %cst_5 = arith.constant dense<0.000000e+00> : vector<128x256xf32>
    %5 = tpu.matmul %1, %4, %cst_5 {dimension_numbers = #tpu.dot_dimension_numbers<[1], [0], [0], [1], [0, 0, 1, 1], [], []>} : vector<128x768xbf16>, vector<768x256xbf16>, vector<128x256xf32> -> vector<128x256xf32>
    %6 = vector.shape_cast %5 : vector<128x256xf32> to vector<8x16x256xf32>
    %7 = vector.extract_strided_slice %6 {offsets = [0, 0, 0], sizes = [8, 12, 256], strides = [1, 1, 1]} : vector<8x16x256xf32> to vector<8x12x256xf32>
    %8 = arith.addf %2, %7 : vector<8x12x256xf32>
    %c1 = arith.constant 1 : index
    %c0_6 = arith.constant 0 : index
    %c0_7 = arith.constant 0 : index
    %9 = vector.load %arg2[%c1, %c0_6, %c0_7] : memref<5x768x256xbf16, #tpu.memory_space<vmem>>, vector<1x768x256xbf16>
    %10 = vector.shape_cast %9 : vector<1x768x256xbf16> to vector<768x256xbf16>
    %cst_8 = arith.constant dense<0.000000e+00> : vector<128x256xf32>
    %11 = tpu.matmul %1, %10, %cst_8 {dimension_numbers = #tpu.dot_dimension_numbers<[1], [0], [0], [1], [0, 0, 1, 1], [], []>} : vector<128x768xbf16>, vector<768x256xbf16>, vector<128x256xf32> -> vector<128x256xf32>
    %12 = vector.shape_cast %11 : vector<128x256xf32> to vector<8x16x256xf32>
    %13 = vector.extract_strided_slice %12 {offsets = [0, 1, 0], sizes = [8, 12, 256], strides = [1, 1, 1]} : vector<8x16x256xf32> to vector<8x12x256xf32>
    %14 = arith.addf %8, %13 : vector<8x12x256xf32>
    %c2 = arith.constant 2 : index
    %c0_9 = arith.constant 0 : index
    %c0_10 = arith.constant 0 : index
    %15 = vector.load %arg2[%c2, %c0_9, %c0_10] : memref<5x768x256xbf16, #tpu.memory_space<vmem>>, vector<1x768x256xbf16>
    %16 = vector.shape_cast %15 : vector<1x768x256xbf16> to vector<768x256xbf16>
    %cst_11 = arith.constant dense<0.000000e+00> : vector<128x256xf32>
    %17 = tpu.matmul %1, %16, %cst_11 {dimension_numbers = #tpu.dot_dimension_numbers<[1], [0], [0], [1], [0, 0, 1, 1], [], []>} : vector<128x768xbf16>, vector<768x256xbf16>, vector<128x256xf32> -> vector<128x256xf32>
    %18 = vector.shape_cast %17 : vector<128x256xf32> to vector<8x16x256xf32>
    %19 = vector.extract_strided_slice %18 {offsets = [0, 2, 0], sizes = [8, 12, 256], strides = [1, 1, 1]} : vector<8x16x256xf32> to vector<8x12x256xf32>
    %20 = arith.addf %14, %19 : vector<8x12x256xf32>
    %c3 = arith.constant 3 : index
    %c0_12 = arith.constant 0 : index
    %c0_13 = arith.constant 0 : index
    %21 = vector.load %arg2[%c3, %c0_12, %c0_13] : memref<5x768x256xbf16, #tpu.memory_space<vmem>>, vector<1x768x256xbf16>
    %22 = vector.shape_cast %21 : vector<1x768x256xbf16> to vector<768x256xbf16>
    %cst_14 = arith.constant dense<0.000000e+00> : vector<128x256xf32>
    %23 = tpu.matmul %1, %22, %cst_14 {dimension_numbers = #tpu.dot_dimension_numbers<[1], [0], [0], [1], [0, 0, 1, 1], [], []>} : vector<128x768xbf16>, vector<768x256xbf16>, vector<128x256xf32> -> vector<128x256xf32>
    %24 = vector.shape_cast %23 : vector<128x256xf32> to vector<8x16x256xf32>
    %25 = vector.extract_strided_slice %24 {offsets = [0, 3, 0], sizes = [8, 12, 256], strides = [1, 1, 1]} : vector<8x16x256xf32> to vector<8x12x256xf32>
    %26 = arith.addf %20, %25 : vector<8x12x256xf32>
    %c4 = arith.constant 4 : index
    %c0_15 = arith.constant 0 : index
    %c0_16 = arith.constant 0 : index
    %27 = vector.load %arg2[%c4, %c0_15, %c0_16] : memref<5x768x256xbf16, #tpu.memory_space<vmem>>, vector<1x768x256xbf16>
    %28 = vector.shape_cast %27 : vector<1x768x256xbf16> to vector<768x256xbf16>
    %cst_17 = arith.constant dense<0.000000e+00> : vector<128x256xf32>
    %29 = tpu.matmul %1, %28, %cst_17 {dimension_numbers = #tpu.dot_dimension_numbers<[1], [0], [0], [1], [0, 0, 1, 1], [], []>} : vector<128x768xbf16>, vector<768x256xbf16>, vector<128x256xf32> -> vector<128x256xf32>
    %30 = vector.shape_cast %29 : vector<128x256xf32> to vector<8x16x256xf32>
    %31 = vector.extract_strided_slice %30 {offsets = [0, 4, 0], sizes = [8, 12, 256], strides = [1, 1, 1]} : vector<8x16x256xf32> to vector<8x12x256xf32>
    %32 = arith.addf %26, %31 : vector<8x12x256xf32>
    %c0_18 = arith.constant 0 : index
    %c0_19 = arith.constant 0 : index
    %33 = vector.load %arg3[%c0_18, %c0_19] : memref<1x256xf32, #tpu.memory_space<vmem>>, vector<1x256xf32>
    %34 = vector.shape_cast %33 : vector<1x256xf32> to vector<1x1x256xf32>
    %35 = vector.broadcast %34 : vector<1x1x256xf32> to vector<8x12x256xf32>
    %36 = arith.addf %32, %35 : vector<8x12x256xf32>
    %cst_20 = arith.constant 0.000000e+00 : f32
    %37 = vector.broadcast %cst_20 : f32 to vector<8x12x256xf32>
    %38 = arith.maximumf %36, %37 : vector<8x12x256xf32>
    %cst_21 = arith.constant dense<0xFF800000> : vector<8x256xf32>
    %39 = vector.multi_reduction <maximumf>, %38, %cst_21 [1] : vector<8x12x256xf32> to vector<8x256xf32>
    %40 = arith.truncf %39 : vector<8x256xf32> to vector<8x256xbf16>
    %c0_22 = arith.constant 0 : index
    %c0_23 = arith.constant 0 : index
    %41 = vector.load %arg4[%c0_22, %c0_23] : memref<256x256xbf16, #tpu.memory_space<vmem>>, vector<256x256xbf16>
    %cst_24 = arith.constant dense<0.000000e+00> : vector<8x256xf32>
    %42 = tpu.matmul %40, %41, %cst_24 {dimension_numbers = #tpu.dot_dimension_numbers<[1], [0], [0], [1], [0, 0, 1, 1], [], []>} : vector<8x256xbf16>, vector<256x256xbf16>, vector<8x256xf32> -> vector<8x256xf32>
    %c0_25 = arith.constant 0 : index
    %c0_26 = arith.constant 0 : index
    %43 = vector.load %arg5[%c0_25, %c0_26] : memref<1x256xf32, #tpu.memory_space<vmem>>, vector<1x256xf32>
    %44 = vector.broadcast %43 : vector<1x256xf32> to vector<8x256xf32>
    %45 = arith.addf %42, %44 : vector<8x256xf32>
    %46 = arith.truncf %45 : vector<8x256xf32> to vector<8x256xbf16>
    %c0_27 = arith.constant 0 : index
    %c0_28 = arith.constant 0 : index
    %47 = vector.load %arg6[%c0_27, %c0_28] : memref<256x128xbf16, #tpu.memory_space<vmem>>, vector<256x128xbf16>
    %cst_29 = arith.constant dense<0.000000e+00> : vector<8x128xf32>
    %48 = tpu.matmul %46, %47, %cst_29 {dimension_numbers = #tpu.dot_dimension_numbers<[1], [0], [0], [1], [0, 0, 1, 1], [], []>} : vector<8x256xbf16>, vector<256x128xbf16>, vector<8x128xf32> -> vector<8x128xf32>
    %c0_30 = arith.constant 0 : index
    %c0_31 = arith.constant 0 : index
    %49 = vector.load %arg7[%c0_30, %c0_31] : memref<1x128xf32, #tpu.memory_space<vmem>>, vector<1x128xf32>
    %50 = vector.broadcast %49 : vector<1x128xf32> to vector<8x128xf32>
    %51 = arith.addf %48, %50 : vector<8x128xf32>
    %c0_32 = arith.constant 0 : index
    %c0_33 = arith.constant 0 : index
    %52 = vector.load %arg8[%c0_32, %c0_33] : memref<8x128xf32, #tpu.memory_space<vmem>>, vector<8x128xf32>
    tpu.vector_store %arg8[%c0_32, %c0_33], %51 {strides = array<i32>} : memref<8x128xf32, #tpu.memory_space<vmem>>, vector<8x128xf32>,
    return
  }
  func.func @transform_0(%arg0: i32) -> (i32, i32, i32) {
    %c0_i32 = arith.constant 0 : i32
    %c0_i32_0 = arith.constant 0 : i32
    %c0_i32_1 = arith.constant 0 : i32
    return %arg0, %c0_i32, %c0_i32_0 : i32, i32, i32
  }
  func.func @transform_1(%arg0: i32) -> (i32, i32, i32) {
    %c0_i32 = arith.constant 0 : i32
    %c0_i32_0 = arith.constant 0 : i32
    %c0_i32_1 = arith.constant 0 : i32
    %c0_i32_2 = arith.constant 0 : i32
    return %c0_i32, %c0_i32_0, %c0_i32_1 : i32, i32, i32
  }
  func.func @transform_2(%arg0: i32) -> (i32, i32) {
    %c0_i32 = arith.constant 0 : i32
    %c0_i32_0 = arith.constant 0 : i32
    %c0_i32_1 = arith.constant 0 : i32
    return %c0_i32, %c0_i32_0 : i32, i32
  }
  func.func @transform_3(%arg0: i32) -> (i32, i32) {
    %c0_i32 = arith.constant 0 : i32
    %c0_i32_0 = arith.constant 0 : i32
    %c0_i32_1 = arith.constant 0 : i32
    return %c0_i32, %c0_i32_0 : i32, i32
  }
  func.func @transform_4(%arg0: i32) -> (i32, i32) {
    %c0_i32 = arith.constant 0 : i32
    %c0_i32_0 = arith.constant 0 : i32
    %c0_i32_1 = arith.constant 0 : i32
    return %c0_i32, %c0_i32_0 : i32, i32
  }
  func.func @transform_5(%arg0: i32) -> (i32, i32) {
    %c0_i32 = arith.constant 0 : i32
    %c0_i32_0 = arith.constant 0 : i32
    %c0_i32_1 = arith.constant 0 : i32
    return %c0_i32, %c0_i32_0 : i32, i32
  }
  func.func @transform_6(%arg0: i32) -> (i32, i32) {
    %c0_i32 = arith.constant 0 : i32
    %c0_i32_0 = arith.constant 0 : i32
    %c0_i32_1 = arith.constant 0 : i32
    return %c0_i32, %c0_i32_0 : i32, i32
  }
  func.func @transform_7(%arg0: i32) -> (i32, i32) {
    %c0_i32 = arith.constant 0 : i32
    %c0_i32_0 = arith.constant 0 : i32
    return %arg0, %c0_i32 : i32, i32
  }
}

</mosaic_0001>

<bundles_post_ra>
// kernel: net_head.1
= control target key start
LH: loop header
LB: loop body
LE: loop exit
PB: predicated region body
PF: predicated region fallthrough
CT: control target
= control target key end

     0   :  { %s8837_s24 = smov 0   ;;  %s11627_s0 = inlined_call_operand.vmem [shape: bf16[16,16,768], index: 0, kind: input, shape index: {}]   ;;  %s11628_s1 = inlined_call_operand.vmem [shape: bf16[5,768,256], index: 1, kind: input, shape index: {}]   ;;  %s11629_s2 = inlined_call_operand.vmem [shape: f32[1,256], index: 2, kind: input, shape index: {}]   ;;  %s11630_s3 = inlined_call_operand.vmem [shape: bf16[256,256], index: 3, kind: input, shape index: {}]   ;;  %s11631_s4 = inlined_call_operand.vmem [shape: f32[1,256], index: 4, kind: input, shape index: {}]   ;;  %s11632_s5 = inlined_call_operand.vmem [shape: bf16[256,128], index: 5, kind: input, shape index: {}]   ;;  %s11633_s6 = inlined_call_operand.vmem [shape: f32[1,128], index: 6, kind: input, shape index: {}]   ;;  %s11634_s7 = inlined_call_operand.vmem [shape: f32[16,128], index: 7, kind: output, shape index: {}]  }
   0x1 LB: > { %s8843_s25 = sadd.s32 4294967295, %s8795_s24   ;;  %p6519_p0 = scmp.ge.s32.totalorder %s8795_s24, 1  ;;  %s8795_s24 = sphi %s8837_s24, %s17_s24  }
   0x2   : > { %p239_p1 = scmp.lt.s32.totalorder %s8795_s24, 3 }
   0x4   : > { %p240_p2 = pnand %p6519_p0, %p239_p1 }
   0x5   : > { %v7837_v0 = vld [vmem:[%s11628_s1 + $0x4] ss:$8 sps:$4 sm:$0xff] (!%p240_p2)   ;;  %v7841_v2 = vld [vmem:[%s11628_s1] ss:$8 sps:$4 sm:$0xff] (!%p240_p2)   ;;  %v7843_v4 = vld [vmem:[%s11628_s1 + $0x14] ss:$8 sps:$4 sm:$0xff] (!%p240_p2)  }
   0x6   : > { %243 = sbr.rel (%p240_p2) target bundleno = 1267 (0x4f3), region = 48  ;;  %v7839_v1 = vld [vmem:[%s11628_s1 + $0x104] ss:$8 sps:$4 sm:$0xff] (!%p240_p2)   ;;  %1147 = vmatprep.subr.bf16.mxu1 (!%p240_p2), %v7837_v0  ;;  %v7842_v3 = vld [vmem:[%s11628_s1 + $0x100] ss:$8 sps:$4 sm:$0xff] (!%p240_p2)   ;;  %s6520_s21 = sshll.u32 (!%p240_p2), %s8843_s25, 3 }
   0x7   : > { %1260 = vmatprep.subr.bf16.mxu0 (!%p240_p2), %v7839_v1  ;;  %1148 = vmatpush1.bf16.msra.mxu1 (!%p240_p2), %v7841_v2  ;;  %v7845_v5 = vld [vmem:[%s11628_s1 + $0x114] ss:$8 sps:$4 sm:$0xff] (!%p240_p2)   ;;  %v7847_v6 = vld [vmem:[%s11628_s1 + $0x10] ss:$8 sps:$4 sm:$0xff] (!%p240_p2)   ;;  %v7849_v8 = vld [vmem:[%s11628_s1 + $0x24] ss:$8 sps:$4 sm:$0xff] (!%p240_p2)  }
   0x8   : > { %1261 = vmatpush1.bf16.msra.mxu0 (!%p240_p2), %v7842_v3  ;;  %1149 = vmatprep.subr.bf16.mxu1 (!%p240_p2), %v7843_v4  ;;  %v7848_v7 = vld [vmem:[%s11628_s1 + $0x110] ss:$8 sps:$4 sm:$0xff] (!%p240_p2)   ;;  %v7851_v9 = vld [vmem:[%s11628_s1 + $0x124] ss:$8 sps:$4 sm:$0xff] (!%p240_p2)   ;;  %v7853_v10 = vld [vmem:[%s11628_s1 + $0x20] ss:$8 sps:$4 sm:$0xff] (!%p240_p2)  }
   0x9   : > { %1262 = vmatprep.subr.bf16.mxu0 (!%p240_p2), %v7845_v5  ;;  %v7854_v11 = vld [vmem:[%s11628_s1 + $0x120] ss:$8 sps:$4 sm:$0xff] (!%p240_p2)   ;;  %v7855_v12 = vld [vmem:[%s11628_s1 + $0x34] ss:$8 sps:$4 sm:$0xff] (!%p240_p2)   ;;  %v7859_v14 = vld [vmem:[%s11628_s1 + $0x30] ss:$8 sps:$4 sm:$0xff] (!%p240_p2)  }
   0xa   : > { %v7857_v13 = vld [vmem:[%s11628_s1 + $0x134] ss:$8 sps:$4 sm:$0xff] (!%p240_p2)   ;;  %v7860_v15 = vld [vmem:[%s11628_s1 + $0x130] ss:$8 sps:$4 sm:$0xff] (!%p240_p2)   ;;  %v7861_v16 = vld [vmem:[%s11628_s1 + $0x44] ss:$8 sps:$4 sm:$0xff] (!%p240_p2)  }
   0xb   : > { %1150 = vmatpush1.bf16.msra.mxu1 (!%p240_p2), %v7847_v6  ;;  %v7863_v17 = vld [vmem:[%s11628_s1 + $0x144] ss:$8 sps:$4 sm:$0xff] (!%p240_p2)   ;;  %v7865_v18 = vld [vmem:[%s11628_s1 + $0x40] ss:$8 sps:$4 sm:$0xff] (!%p240_p2)   ;;  %v7867_v20 = vld [vmem:[%s11628_s1 + $0x54] ss:$8 sps:$4 sm:$0xff] (!%p240_p2)  }
   0xc   : > { %1263 = vmatpush1.bf16.msra.mxu0 (!%p240_p2), %v7848_v7  ;;  %1151 = vmatprep.subr.bf16.mxu1 (!%p240_p2), %v7849_v8  ;;  %v7866_v19 = vld [vmem:[%s11628_s1 + $0x140] ss:$8 sps:$4 sm:$0xff] (!%p240_p2)   ;;  %v7869_v21 = vld [vmem:[%s11628_s1 + $0x154] ss:$8 sps:$4 sm:$0xff] (!%p240_p2)   ;;  %v7871_v22 = vld [vmem:[%s11628_s1 + $0x50] ss:$8 sps:$4 sm:$0xff] (!%p240_p2)  }
   0xd   : > { %1264 = vmatprep.subr.bf16.mxu0 %v7851_v9  ;;  %v7872_v23 = vld [vmem:[%s11628_s1 + $0x150] ss:$8 sps:$4 sm:$0xff]   ;;  %v7873_v24 = vld [vmem:[%s11628_s1 + $0x64] ss:$8 sps:$4 sm:$0xff]   ;;  %v7877_v26 = vld [vmem:[%s11628_s1 + $0x60] ss:$8 sps:$4 sm:$0xff]  }
   0xe   : > { %v7875_v25 = vld [vmem:[%s11628_s1 + $0x164] ss:$8 sps:$4 sm:$0xff]   ;;  %v7878_v27 = vld [vmem:[%s11628_s1 + $0x160] ss:$8 sps:$4 sm:$0xff]   ;;  %v7879_v28 = vld [vmem:[%s11628_s1 + $0x74] ss:$8 sps:$4 sm:$0xff]  }
   0xf   : > { %1152 = vmatpush1.bf16.msra.mxu1 %v7853_v10  ;;  %v7881_v29 = vld [vmem:[%s11628_s1 + $0x174] ss:$8 sps:$4 sm:$0xff]   ;;  %v7883_v30 = vld [vmem:[%s11628_s1 + $0x70] ss:$8 sps:$4 sm:$0xff]   ;;  %v7885_v32 = vld [vmem:[%s11628_s1 + $0x84] ss:$8 sps:$4 sm:$0xff]  }
  0x10   : > { %1265 = vmatpush1.bf16.msra.mxu0 %v7854_v11  ;;  %1153 = vmatprep.subr.bf16.mxu1 %v7855_v12  ;;  %v7884_v31 = vld [vmem:[%s11628_s1 + $0x170] ss:$8 sps:$4 sm:$0xff]   ;;  %p272_p3 = scmp.lt.s32.totalorder %s6520_s21, 15  ;;  %v7887_v33 = vld [vmem:[%s11628_s1 + $0x184] ss:$8 sps:$4 sm:$0xff]   ;;  %vm2466_vm0 = vcmask 1046528  }
  0x11   : > { %1266 = vmatprep.subr.bf16.mxu0 %v7857_v13  ;;  %v7889_v34 = vld [vmem:[%s11628_s1 + $0x80] ss:$8 sps:$4 sm:$0xff]   ;;  %v7891_v36 = vld [vmem:[%s11628_s1 + $0x94] ss:$8 sps:$4 sm:$0xff]   ;;  %v7895_v38 = vld [vmem:[%s11628_s1 + $0x90] ss:$8 sps:$4 sm:$0xff]  }
  0x12   : > { %v7890_v35 = vld [vmem:[%s11628_s1 + $0x180] ss:$8 sps:$4 sm:$0xff]   ;;  %s11636_s21 = smov (!%p272_p3, %s6520_s21), 15  ;;  %v7893_v37 = vld [vmem:[%s11628_s1 + $0x194] ss:$8 sps:$4 sm:$0xff]   ;;  %vm3527_vm1 = vcmask 1045504  }
  0x13   : > { %1154 = vmatpush1.bf16.msra.mxu1 %v7859_v14  ;;  %v7896_v39 = vld [vmem:[%s11628_s1 + $0x190] ss:$8 sps:$4 sm:$0xff]   ;;  %v7897_v40 = vld [vmem:[%s11628_s1 + $0xa4] ss:$8 sps:$4 sm:$0xff]   ;;  %s7828_s26 = smul.u32 48, %s11636_s21  ;;  %vm4588_vm2 = vcmask 1044480  }
  0x14   : > { %1267 = vmatpush1.bf16.msra.mxu0 %v7860_v15  ;;  %1155 = vmatprep.subr.bf16.mxu1 %v7861_v16  ;;  %v7899_v41 = vld [vmem:[%s11628_s1 + $0x1a4] ss:$8 sps:$4 sm:$0xff]   ;;  %v7901_v42 = vld [vmem:[%s11628_s1 + $0xa0] ss:$8 sps:$4 sm:$0xff]   ;;  %v7903_v44 = vld [vmem:[%s11628_s1 + $0xb4] ss:$8 sps:$4 sm:$0xff]  }
  0x15   : > { %1268 = vmatprep.subr.bf16.mxu0 %v7863_v17  ;;  %v7902_v43 = vld [vmem:[%s11628_s1 + $0x1a0] ss:$8 sps:$4 sm:$0xff]   ;;  %s8986_s13 = scalar_lea.vmem %s11627_s0, %s7828_s26  ;;  %v7905_v45 = vld [vmem:[%s11628_s1 + $0x1b4] ss:$8 sps:$4 sm:$0xff]   ;;  %v7907_v46 = vld [vmem:[%s11628_s1 + $0xb0] ss:$8 sps:$4 sm:$0xff]  }
  0x16   : > { %v7908_v47 = vld [vmem:[%s11628_s1 + $0x1b0] ss:$8 sps:$4 sm:$0xff]   ;;  %v8998_v48 = vld [vmem:[%s8986_s13 + $0x4] ss:$24 sps:$4 sm:$0xff]   ;;  %v7913_v52 = vld [vmem:[%s11628_s1 + $0xc0] ss:$8 sps:$4 sm:$0xff]  }
  0x17   : > { %1156 = vmatpush1.bf16.msra.mxu1 %v7865_v18  ;;  %v7909_v49 = vld [vmem:[%s11628_s1 + $0xc4] ss:$8 sps:$4 sm:$0xff]   ;;  %1179 = vmatprep.mubr.bf16.mxu1 %v8998_v48  ;;  %v7914_v53 = vld [vmem:[%s11628_s1 + $0x1c0] ss:$8 sps:$4 sm:$0xff]   ;;  %v7915_v54 = vld [vmem:[%s11628_s1 + $0xd4] ss:$8 sps:$4 sm:$0xff]  }
  0x18   : > { %1269 = vmatpush1.bf16.msra.mxu0 %v7866_v19  ;;  %1157 = vmatprep.subr.bf16.mxu1 %v7867_v20  ;;  %v7935_v50 = vld [vmem:[%s8986_s13 + $0xc] ss:$24 sps:$4 sm:$0xff]   ;;  %v7917_v55 = vld [vmem:[%s11628_s1 + $0x1d4] ss:$8 sps:$4 sm:$0xff]   ;;  %v7919_v56 = vld [vmem:[%s11628_s1 + $0xd0] ss:$8 sps:$4 sm:$0xff]  }
  0x19   : > { %1270 = vmatprep.subr.bf16.mxu0 %v7869_v21  ;;  %v7911_v51 = vld [vmem:[%s11628_s1 + $0x1c4] ss:$8 sps:$4 sm:$0xff]   ;;  %1292 = vmatprep.mubr.bf16.mxu0 %v7935_v50  ;;  %v7920_v57 = vld [vmem:[%s11628_s1 + $0x1d0] ss:$8 sps:$4 sm:$0xff]   ;;  %v7925_v60 = vld [vmem:[%s11628_s1 + $0xe0] ss:$8 sps:$4 sm:$0xff]  }
  0x1a   : > { %v7921_v58 = vld [vmem:[%s11628_s1 + $0xe4] ss:$8 sps:$4 sm:$0xff]   ;;  %v7926_v61 = vld [vmem:[%s11628_s1 + $0x1e0] ss:$8 sps:$4 sm:$0xff]   ;;  %v7927_v62 = vld [vmem:[%s11628_s1 + $0xf4] ss:$8 sps:$4 sm:$0xff]  }
  0x1b   : > { %1158 = vmatpush1.bf16.msra.mxu1 %v7871_v22  ;;  %v7923_v59 = vld [vmem:[%s11628_s1 + $0x1e4] ss:$8 sps:$4 sm:$0xff]   ;;  %v7929_v63 = vld [vmem:[%s11628_s1 + $0x1f4] ss:$8 sps:$4 sm:$0xff]   ;;  %v7931_v0 = vld [vmem:[%s11628_s1 + $0xf0] ss:$8 sps:$4 sm:$0xff]  }
  0x1c   : > { %1271 = vmatpush1.bf16.msra.mxu0 %v7872_v23  ;;  %1159 = vmatprep.subr.bf16.mxu1 %v7873_v24  ;;  %v7932_v1 = vld [vmem:[%s11628_s1 + $0x1f0] ss:$8 sps:$4 sm:$0xff]   ;;  %v7941_v2 = vld [vmem:[%s11628_s1 + $0x204] ss:$8 sps:$4 sm:$0xff]   ;;  %v7938_v5 = vld [vmem:[%s8986_s13 + $0x8] ss:$24 sps:$4 sm:$0xff]  }
  0x1d   : > { %1272 = vmatprep.subr.bf16.mxu0 %v7875_v25  ;;  %v7944_v3 = vld [vmem:[%s11628_s1 + $0x304] ss:$8 sps:$4 sm:$0xff]   ;;  %v9057_v4 = vld [vmem:[%s8986_s13] ss:$24 sps:$4 sm:$0xff]   ;;  %v7947_v8 = vld [vmem:[%s11628_s1 + $0x214] ss:$8 sps:$4 sm:$0xff]  }
  0x1e   : > { %v7939_v6 = vld [vmem:[%s11628_s1 + $0x200] ss:$8 sps:$4 sm:$0xff]   ;;  %v7950_v9 = vld [vmem:[%s11628_s1 + $0x314] ss:$8 sps:$4 sm:$0xff]   ;;  %v7945_v12 = vld [vmem:[%s11628_s1 + $0x210] ss:$8 sps:$4 sm:$0xff]  }
  0x1f   : > { %1160 = vmatpush1.bf16.msra.mxu1 %v7877_v26  ;;  %v7942_v7 = vld [vmem:[%s11628_s1 + $0x300] ss:$8 sps:$4 sm:$0xff]   ;;  %v9073_v10 = vld [vmem:[%s8986_s13 + $0x34] ss:$24 sps:$4 sm:$0xff]   ;;  %v7948_v13 = vld [vmem:[%s11628_s1 + $0x310] ss:$8 sps:$4 sm:$0xff]  }
  0x20   : > { %1273 = vmatpush1.bf16.msra.mxu0 %v7878_v27  ;;  %1161 = vmatprep.subr.bf16.mxu1 %v7879_v28  ;;  %v7953_v11 = vld [vmem:[%s8986_s13 + $0x3c] ss:$24 sps:$4 sm:$0xff]   ;;  %v7959_v14 = vld [vmem:[%s11628_s1 + $0x224] ss:$8 sps:$4 sm:$0xff]   ;;  %v9091_v16 = vld [vmem:[%s8986_s13 + $0x30] ss:$24 sps:$4 sm:$0xff]  }
  0x21   : > { %1274 = vmatprep.subr.bf16.mxu0 %v7881_v29  ;;  %v7962_v15 = vld [vmem:[%s11628_s1 + $0x324] ss:$8 sps:$4 sm:$0xff]   ;;  %v7956_v17 = vld [vmem:[%s8986_s13 + $0x38] ss:$24 sps:$4 sm:$0xff]   ;;  %v7957_v18 = vld [vmem:[%s11628_s1 + $0x220] ss:$8 sps:$4 sm:$0xff]  }
  0x22   : > { %v7960_v19 = vld [vmem:[%s11628_s1 + $0x320] ss:$8 sps:$4 sm:$0xff]   ;;  %v7965_v20 = vld [vmem:[%s11628_s1 + $0x234] ss:$8 sps:$4 sm:$0xff]   ;;  %v7971_v23 = vld [vmem:[%s8986_s13 + $0x6c] ss:$24 sps:$4 sm:$0xff]  }
  0x23   : > { %1162 = vmatpush1.bf16.msra.mxu1 %v7883_v30  ;;  %v7968_v21 = vld [vmem:[%s11628_s1 + $0x334] ss:$8 sps:$4 sm:$0xff]   ;;  %v7963_v24 = vld [vmem:[%s11628_s1 + $0x230] ss:$8 sps:$4 sm:$0xff]   ;;  %v7977_v26 = vld [vmem:[%s11628_s1 + $0x244] ss:$8 sps:$4 sm:$0xff]  }
  0x24   : > { %1275 = vmatpush1.bf16.msra.mxu0 %v7884_v31  ;;  %1163 = vmatprep.subr.bf16.mxu1 %v7885_v32  ;;  %v9107_v22 = vld [vmem:[%s8986_s13 + $0x64] ss:$24 sps:$4 sm:$0xff]   ;;  %v7966_v25 = vld [vmem:[%s11628_s1 + $0x330] ss:$8 sps:$4 sm:$0xff]   ;;  %v7974_v29 = vld [vmem:[%s8986_s13 + $0x68] ss:$24 sps:$4 sm:$0xff]  }
  0x25   : > { %1276 = vmatprep.subr.bf16.mxu0 %v7887_v33  ;;  %v7980_v27 = vld [vmem:[%s11628_s1 + $0x344] ss:$8 sps:$4 sm:$0xff]   ;;  %v9125_v28 = vld [vmem:[%s8986_s13 + $0x60] ss:$24 sps:$4 sm:$0xff]   ;;  %v7983_v32 = vld [vmem:[%s11628_s1 + $0x254] ss:$8 sps:$4 sm:$0xff]  }
  0x26   : > { %v7975_v30 = vld [vmem:[%s11628_s1 + $0x240] ss:$8 sps:$4 sm:$0xff]   ;;  %v7986_v33 = vld [vmem:[%s11628_s1 + $0x354] ss:$8 sps:$4 sm:$0xff]   ;;  %v8002_v50 = vld [vmem:[%s11628_s1 + $0x370] ss:$8 sps:$4 sm:$0xff]  }
  0x27   : > { %1164 = vmatpush1.bf16.msra.mxu1 %v7889_v34  ;;  %v7978_v31 = vld [vmem:[%s11628_s1 + $0x340] ss:$8 sps:$4 sm:$0xff]   ;;  %v9141_v34 = vld [vmem:[%s8986_s13 + $0x94] ss:$24 sps:$4 sm:$0xff]   ;;  %vm5649_vm3 = vcmask 1043456   ;;  %vm6058_vm4 = vcmask 1041409  }
  0x28   : > { %1277 = vmatpush1.bf16.msra.mxu0 %v7890_v35  ;;  %1165 = vmatprep.subr.bf16.mxu1 %v7891_v36  ;;  %v7989_v35 = vld [vmem:[%s8986_s13 + $0x9c] ss:$24 sps:$4 sm:$0xff]   ;;  %v7981_v36 = vld [vmem:[%s11628_s1 + $0x250] ss:$8 sps:$4 sm:$0xff]   ;;  %vm6060_vm5 = vcmask 1042434   ;;  %vm6062_vm6 = vcmask 1043459  }
  0x29   : > { %1278 = vmatprep.subr.bf16.mxu0 %v7893_v37  ;;  %v7984_v37 = vld [vmem:[%s11628_s1 + $0x350] ss:$8 sps:$4 sm:$0xff]   ;;  %vm6064_vm7 = vcmask 1044484   ;;  %vm6066_vm8 = vcmask 1045509   ;;  %vm6068_vm9 = vcmask 1046534   ;;  %vm6070_vm10 = vcmask 1047559  }
  0x2a   : > { %p278_p4 = scmp.lt.s32.totalorder %s8843_s25, 1 }
  0x2b   : > { %1166 = vmatpush1.bf16.msra.mxu1 %v7895_v38  ;;  %v7995_v38 = vld [vmem:[%s11628_s1 + $0x264] ss:$8 sps:$4 sm:$0xff]  }
  0x2c   : > { %1279 = vmatpush1.bf16.msra.mxu0 %v7896_v39  ;;  %1167 = vmatprep.subr.bf16.mxu1 %v7897_v40  ;;  %v7998_v39 = vld [vmem:[%s11628_s1 + $0x364] ss:$8 sps:$4 sm:$0xff]   ;;  %v9159_v40 = vld [vmem:[%s8986_s13 + $0x90] ss:$24 sps:$4 sm:$0xff]   ;;  %s11638_s25 = smov (!%p278_p4, %s8843_s25), 1 }
  0x2d   : > { %1280 = vmatprep.subr.bf16.mxu0 %v7899_v41  ;;  %v7992_v41 = vld [vmem:[%s8986_s13 + $0x98] ss:$24 sps:$4 sm:$0xff]   ;;  %s6522_s19 = sshll.u32 %s11638_s25, 3 }
  0x2f   : > { %1168 = vmatpush1.bf16.msra.mxu1 %v7901_v42  ;;  %v7993_v42 = vld [vmem:[%s11628_s1 + $0x260] ss:$8 sps:$4 sm:$0xff]  }
  0x30   : > { %1281 = vmatpush1.bf16.msra.mxu0 %v7902_v43  ;;  %1169 = vmatprep.subr.bf16.mxu1 %v7903_v44  ;;  %v7996_v43 = vld [vmem:[%s11628_s1 + $0x360] ss:$8 sps:$4 sm:$0xff]   ;;  %v8001_v44 = vld [vmem:[%s11628_s1 + $0x274] ss:$8 sps:$4 sm:$0xff]  }
  0x31   : > { %1282 = vmatprep.subr.bf16.mxu0 %v7905_v45  ;;  %v8004_v45 = vld [vmem:[%s11628_s1 + $0x374] ss:$8 sps:$4 sm:$0xff]  }
  0x33   : > { %1170 = vmatpush1.bf16.msra.mxu1 %v7907_v46  ;;  %v9175_v46 = vld [vmem:[%s8986_s13 + $0xc4] ss:$24 sps:$4 sm:$0xff]  }
  0x34   : > { %1283 = vmatpush1.bf16.msra.mxu0 %v7908_v47  ;;  %1171 = vmatprep.subr.bf16.mxu1 %v7909_v49  ;;  %v8007_v47 = vld [vmem:[%s8986_s13 + $0xcc] ss:$24 sps:$4 sm:$0xff]   ;;  %v7999_v49 = vld [vmem:[%s11628_s1 + $0x270] ss:$8 sps:$4 sm:$0xff]  }
  0x35   : > { %1284 = vmatprep.subr.bf16.mxu0 %v7911_v51  ;;  %v8013_v51 = vld [vmem:[%s11628_s1 + $0x284] ss:$8 sps:$4 sm:$0xff]  }
  0x37   : > { %1172 = vmatpush1.bf16.msra.mxu1 %v7913_v52  ;;  %v8016_v52 = vld [vmem:[%s11628_s1 + $0x384] ss:$8 sps:$4 sm:$0xff]  }
  0x38   : > { %1285 = vmatpush1.bf16.msra.mxu0 %v7914_v53  ;;  %1173 = vmatprep.subr.bf16.mxu1 %v7915_v54  ;;  %v9193_v53 = vld [vmem:[%s8986_s13 + $0xc0] ss:$24 sps:$4 sm:$0xff]  }
  0x39   : > { %1286 = vmatprep.subr.bf16.mxu0 %v7917_v55  ;;  %v8010_v54 = vld [vmem:[%s8986_s13 + $0xc8] ss:$24 sps:$4 sm:$0xff]  }
  0x3a   : > { %v8011_v55 = vld [vmem:[%s11628_s1 + $0x280] ss:$8 sps:$4 sm:$0xff]  }
  0x3b   : > { %1174 = vmatpush1.bf16.msra.mxu1 %v7919_v56  ;;  %v8014_v56 = vld [vmem:[%s11628_s1 + $0x380] ss:$8 sps:$4 sm:$0xff]  }
  0x3c   : > { %1287 = vmatpush1.bf16.msra.mxu0 %v7920_v57  ;;  %1175 = vmatprep.subr.bf16.mxu1 %v7921_v58  ;;  %v8019_v57 = vld [vmem:[%s11628_s1 + $0x294] ss:$8 sps:$4 sm:$0xff]  }
  0x3d   : > { %1288 = vmatprep.subr.bf16.mxu0 %v7923_v59  ;;  %v8022_v58 = vld [vmem:[%s11628_s1 + $0x394] ss:$8 sps:$4 sm:$0xff]  }
  0x3e   : > { %v9209_v59 = vld [vmem:[%s8986_s13 + $0xf4] ss:$24 sps:$4 sm:$0xff]  }
  0x3f   : > { %1176 = vmatpush1.bf16.msra.mxu1 %v7925_v60  ;;  %v8025_v60 = vld [vmem:[%s8986_s13 + $0xfc] ss:$24 sps:$4 sm:$0xff]  }
  0x40   : > { %1289 = vmatpush1.bf16.msra.mxu0 %v7926_v61  ;;  %1177 = vmatprep.subr.bf16.mxu1 %v7927_v62  ;;  %v8017_v61 = vld [vmem:[%s11628_s1 + $0x290] ss:$8 sps:$4 sm:$0xff]  }
  0x41   : > { %1290 = vmatprep.subr.bf16.mxu0 %v7929_v63  ;;  %v8020_v62 = vld [vmem:[%s11628_s1 + $0x390] ss:$8 sps:$4 sm:$0xff]   ;;  %v8031_v63 = vld [vmem:[%s11628_s1 + $0x2a4] ss:$8 sps:$4 sm:$0xff]  }
  0x43   : > { %1178 = vmatpush1.bf16.msra.mxu1 %v7931_v0  ;;  %v8034_v0 = vld [vmem:[%s11628_s1 + $0x3a4] ss:$8 sps:$4 sm:$0xff]  }
  0x44   : > { %1291 = vmatpush1.bf16.msra.mxu0 %v7932_v1  ;;  %2095 = vmatprep.subr.bf16.mxu1 %v7944_v3  ;;  %v9227_v1 = vld [vmem:[%s8986_s13 + $0xf0] ss:$24 sps:$4 sm:$0xff]  }
  0x45   : > { %1373 = vmatprep.subr.bf16.mxu0 %v7941_v2  ;;  %v8028_v2 = vld [vmem:[%s8986_s13 + $0xf8] ss:$24 sps:$4 sm:$0xff]   ;;  %v8029_v3 = vld [vmem:[%s11628_s1 + $0x2a0] ss:$8 sps:$4 sm:$0xff]  }
  0x46   : > { %1180 = vmatmul.mubr.bf16.vlgmr.msra.gmra.mrb[0].mxu1 %v9057_v4 }
  0x47   : > { %1293 = vmatmul.mubr.bf16.vlgmr.msra.gmra.mrb[0].mxu0 %v7938_v5  ;;  %2096 = vmatpush1.bf16.msra.mxu1 %v7942_v7  ;;  %v8032_v5 = vld [vmem:[%s11628_s1 + $0x3a0] ss:$8 sps:$4 sm:$0xff]   ;;  %v8040_v7 = vld [vmem:[%s11628_s1 + $0x3b4] ss:$8 sps:$4 sm:$0xff]  }
  0x48   : > { %1374 = vmatpush1.bf16.msra.mxu0 %v7939_v6  ;;  %2097 = vmatprep.subr.bf16.mxu1 %v7950_v9  ;;  %v8037_v6 = vld [vmem:[%s11628_s1 + $0x2b4] ss:$8 sps:$4 sm:$0xff]   ;;  %v8043_v9 = vld [vmem:[%s8986_s13 + $0x12c] ss:$24 sps:$4 sm:$0xff]  }
  0x49   : > { %1375 = vmatprep.subr.bf16.mxu0 %v7947_v8  ;;  %1189 = vmatprep.mubr.bf16.mxu1 %v9073_v10  ;;  %v9243_v8 = vld [vmem:[%s8986_s13 + $0x124] ss:$24 sps:$4 sm:$0xff]  }
  0x4a   : > { %1302 = vmatprep.mubr.bf16.mxu0 %v7953_v11  ;;  %v8035_v11 = vld [vmem:[%s11628_s1 + $0x2b0] ss:$8 sps:$4 sm:$0xff]  }
  0x4b   : > { %2098 = vmatpush1.bf16.msra.mxu1 %v7948_v13  ;;  %v8049_v13 = vld [vmem:[%s11628_s1 + $0x2c4] ss:$8 sps:$4 sm:$0xff]  }
  0x4c   : > { %1376 = vmatpush1.bf16.msra.mxu0 %v7945_v12  ;;  %2099 = vmatprep.subr.bf16.mxu1 %v7962_v15  ;;  %v8038_v12 = vld [vmem:[%s11628_s1 + $0x3b0] ss:$8 sps:$4 sm:$0xff]  }
  0x4d   : > { %1377 = vmatprep.subr.bf16.mxu0 %v7959_v14  ;;  %v8052_v14 = vld [vmem:[%s11628_s1 + $0x3c4] ss:$8 sps:$4 sm:$0xff]   ;;  %v9261_v15 = vld [vmem:[%s8986_s13 + $0x120] ss:$24 sps:$4 sm:$0xff]  }
  0x4e   : > { %1190 = vmatmul.mubr.bf16.gmra.mrb[4].mxu1 %v9091_v16 }
  0x4f   : > { %1303 = vmatmul.mubr.bf16.gmra.mrb[4].mxu0 %v7956_v17  ;;  %2100 = vmatpush1.bf16.msra.mxu1 %v7960_v19  ;;  %v8046_v17 = vld [vmem:[%s8986_s13 + $0x128] ss:$24 sps:$4 sm:$0xff]  }
  0x50   : > { %1378 = vmatpush1.bf16.msra.mxu0 %v7957_v18  ;;  %2101 = vmatprep.subr.bf16.mxu1 %v7968_v21  ;;  %v8047_v18 = vld [vmem:[%s11628_s1 + $0x2c0] ss:$8 sps:$4 sm:$0xff]   ;;  %v8058_v21 = vld [vmem:[%s11628_s1 + $0x3d4] ss:$8 sps:$4 sm:$0xff]  }
  0x51   : > { %1379 = vmatprep.subr.bf16.mxu0 %v7965_v20  ;;  %1199 = vmatprep.mubr.bf16.mxu1 %v9107_v22  ;;  %v8050_v19 = vld [vmem:[%s11628_s1 + $0x3c0] ss:$8 sps:$4 sm:$0xff]   ;;  %v8055_v20 = vld [vmem:[%s11628_s1 + $0x2d4] ss:$8 sps:$4 sm:$0xff]  }
  0x52   : > { %1312 = vmatprep.mubr.bf16.mxu0 %v7971_v23  ;;  %v9277_v23 = vld [vmem:[%s8986_s13 + $0x154] ss:$24 sps:$4 sm:$0xff]  }
  0x53   : > { %2102 = vmatpush1.bf16.msra.mxu1 %v7966_v25  ;;  %v8053_v25 = vld [vmem:[%s11628_s1 + $0x2d0] ss:$8 sps:$4 sm:$0xff]  }
  0x54   : > { %1380 = vmatpush1.bf16.msra.mxu0 %v7963_v24  ;;  %2103 = vmatprep.subr.bf16.mxu1 %v7980_v27  ;;  %v8061_v24 = vld [vmem:[%s8986_s13 + $0x15c] ss:$24 sps:$4 sm:$0xff]   ;;  %v8067_v27 = vld [vmem:[%s11628_s1 + $0x2e4] ss:$8 sps:$4 sm:$0xff]  }
  0x55   : > { %1381 = vmatprep.subr.bf16.mxu0 %v7977_v26  ;;  %v8056_v26 = vld [vmem:[%s11628_s1 + $0x3d0] ss:$8 sps:$4 sm:$0xff]  }
  0x56   : > { %1200 = vmatmul.mubr.bf16.gmra.mrb[8].mxu1 %v9125_v28 }
  0x57   : > { %1313 = vmatmul.mubr.bf16.gmra.mrb[8].mxu0 %v7974_v29  ;;  %2104 = vmatpush1.bf16.msra.mxu1 %v7978_v31  ;;  %v8070_v29 = vld [vmem:[%s11628_s1 + $0x3e4] ss:$8 sps:$4 sm:$0xff]   ;;  %v8064_v31 = vld [vmem:[%s8986_s13 + $0x158] ss:$24 sps:$4 sm:$0xff]  }
  0x58   : > { %1382 = vmatpush1.bf16.msra.mxu0 %v7975_v30  ;;  %2105 = vmatprep.subr.bf16.mxu1 %v7986_v33  ;;  %v9295_v30 = vld [vmem:[%s8986_s13 + $0x150] ss:$24 sps:$4 sm:$0xff]  }
  0x59   : > { %1383 = vmatprep.subr.bf16.mxu0 %v7983_v32  ;;  %1209 = vmatprep.mubr.bf16.mxu1 %v9141_v34  ;;  %v8065_v32 = vld [vmem:[%s11628_s1 + $0x2e0] ss:$8 sps:$4 sm:$0xff]  }
  0x5a   : > { %1322 = vmatprep.mubr.bf16.mxu0 %v7989_v35  ;;  %v8068_v33 = vld [vmem:[%s11628_s1 + $0x3e0] ss:$8 sps:$4 sm:$0xff]   ;;  %v8073_v35 = vld [vmem:[%s11628_s1 + $0x2f4] ss:$8 sps:$4 sm:$0xff]  }
  0x5b   : > { %2106 = vmatpush1.bf16.msra.mxu1 %v7984_v37  ;;  %v8077_v37 = vld [vmem:[%s8986_s13 + $0x14] ss:$24 sps:$4 sm:$0xff]  }
  0x5c   : > { %1384 = vmatpush1.bf16.msra.mxu0 %v7981_v36  ;;  %2107 = vmatprep.subr.bf16.mxu1 %v7998_v39  ;;  %v8076_v36 = vld [vmem:[%s11628_s1 + $0x3f4] ss:$8 sps:$4 sm:$0xff]   ;;  %v8074_v39 = vld [vmem:[%s11628_s1 + $0x3f0] ss:$8 sps:$4 sm:$0xff]  }
  0x5d   : > { %1385 = vmatprep.subr.bf16.mxu0 %v7995_v38  ;;  %v8071_v38 = vld [vmem:[%s11628_s1 + $0x2f0] ss:$8 sps:$4 sm:$0xff]  }
  0x5e   : > { %1210 = vmatmul.mubr.bf16.gmra.mrb[12].mxu1 %v9159_v40 }
  0x5f   : > { %1323 = vmatmul.mubr.bf16.gmra.mrb[12].mxu0 %v7992_v41  ;;  %2108 = vmatpush1.bf16.msra.mxu1 %v7996_v43  ;;  %v8082_v41 = vld [vmem:[%s11628_s1 + $0x404] ss:$8 sps:$4 sm:$0xff]   ;;  %v8079_v43 = vld [vmem:[%s8986_s13 + $0x10] ss:$24 sps:$4 sm:$0xff]  }
  0x60   : > { %1386 = vmatpush1.bf16.msra.mxu0 %v7993_v42  ;;  %2109 = vmatprep.subr.bf16.mxu1 %v8004_v45  ;;  %v8085_v42 = vld [vmem:[%s11628_s1 + $0x604] ss:$8 sps:$4 sm:$0xff]   ;;  %v8083_v45 = vld [vmem:[%s11628_s1 + $0x600] ss:$8 sps:$4 sm:$0xff]  }
  0x61   : > { %1387 = vmatprep.subr.bf16.mxu0 %v8001_v44  ;;  %1219 = vmatprep.mubr.bf16.mxu1 %v9175_v46  ;;  %v8080_v44 = vld [vmem:[%s11628_s1 + $0x400] ss:$8 sps:$4 sm:$0xff]  }
  0x62   : > { %1332 = vmatprep.mubr.bf16.mxu0 %v8007_v47  ;;  %v8088_v47 = vld [vmem:[%s11628_s1 + $0x414] ss:$8 sps:$4 sm:$0xff]  }
  0x63   : > { %2110 = vmatpush1.bf16.msra.mxu1 %v8002_v50  ;;  %v8086_v50 = vld [vmem:[%s11628_s1 + $0x410] ss:$8 sps:$4 sm:$0xff]  }
  0x64   : > { %1388 = vmatpush1.bf16.msra.mxu0 %v7999_v49  ;;  %2111 = vmatprep.subr.bf16.mxu1 %v8016_v52  ;;  %v8092_v49 = vld [vmem:[%s8986_s13 + $0x44] ss:$24 sps:$4 sm:$0xff]  }
  0x65   : > { %1389 = vmatprep.subr.bf16.mxu0 %v8013_v51  ;;  %v8089_v51 = vld [vmem:[%s11628_s1 + $0x610] ss:$8 sps:$4 sm:$0xff]   ;;  %v8097_v52 = vld [vmem:[%s11628_s1 + $0x424] ss:$8 sps:$4 sm:$0xff]  }
  0x66   : > { %1220 = vmatmul.mubr.bf16.gmra.mrb[16].mxu1 %v9193_v53 }
  0x67   : > { %1333 = vmatmul.mubr.bf16.gmra.mrb[16].mxu0 %v8010_v54  ;;  %2112 = vmatpush1.bf16.msra.mxu1 %v8014_v56  ;;  %v8094_v54 = vld [vmem:[%s8986_s13 + $0x40] ss:$24 sps:$4 sm:$0xff]  }
  0x68   : > { %1390 = vmatpush1.bf16.msra.mxu0 %v8011_v55  ;;  %2113 = vmatprep.subr.bf16.mxu1 %v8022_v58  ;;  %v8095_v55 = vld [vmem:[%s11628_s1 + $0x420] ss:$8 sps:$4 sm:$0xff]   ;;  %v8107_v58 = vld [vmem:[%s8986_s13 + $0x74] ss:$24 sps:$4 sm:$0xff]  }
  0x69   : > { %1391 = vmatprep.subr.bf16.mxu0 %v8019_v57  ;;  %1229 = vmatprep.mubr.bf16.mxu1 %v9209_v59  ;;  %v8098_v56 = vld [vmem:[%s11628_s1 + $0x620] ss:$8 sps:$4 sm:$0xff]   ;;  %v8103_v57 = vld [vmem:[%s11628_s1 + $0x434] ss:$8 sps:$4 sm:$0xff]  }
  0x6a   : > { %1342 = vmatprep.mubr.bf16.mxu0 %v8025_v60  ;;  %v8101_v60 = vld [vmem:[%s11628_s1 + $0x430] ss:$8 sps:$4 sm:$0xff]  }
  0x6b   : > { %2114 = vmatpush1.bf16.msra.mxu1 %v8020_v62  ;;  %v8112_v62 = vld [vmem:[%s11628_s1 + $0x444] ss:$8 sps:$4 sm:$0xff]  }
  0x6c   : > { %1392 = vmatpush1.bf16.msra.mxu0 %v8017_v61  ;;  %2115 = vmatprep.subr.bf16.mxu1 %v8034_v0  ;;  %v8104_v61 = vld [vmem:[%s11628_s1 + $0x630] ss:$8 sps:$4 sm:$0xff]   ;;  %v8110_v0 = vld [vmem:[%s11628_s1 + $0x440] ss:$8 sps:$4 sm:$0xff]  }
  0x6d   : > { %1393 = vmatprep.subr.bf16.mxu0 %v8031_v63  ;;  %v8109_v63 = vld [vmem:[%s8986_s13 + $0x70] ss:$24 sps:$4 sm:$0xff]  }
  0x6e   : > { %1230 = vmatmul.mubr.bf16.gmra.mrb[20].mxu1 %v9227_v1 }
  0x6f   : > { %1343 = vmatmul.mubr.bf16.gmra.mrb[20].mxu0 %v8028_v2  ;;  %2116 = vmatpush1.bf16.msra.mxu1 %v8032_v5  ;;  %v8113_v2 = vld [vmem:[%s11628_s1 + $0x640] ss:$8 sps:$4 sm:$0xff]   ;;  %v8122_v5 = vld [vmem:[%s8986_s13 + $0xa4] ss:$24 sps:$4 sm:$0xff]  }
  0x70   : > { %1394 = vmatpush1.bf16.msra.mxu0 %v8029_v3  ;;  %2117 = vmatprep.subr.bf16.mxu1 %v8040_v7  ;;  %v8118_v3 = vld [vmem:[%s11628_s1 + $0x454] ss:$8 sps:$4 sm:$0xff]   ;;  %v8119_v7 = vld [vmem:[%s11628_s1 + $0x650] ss:$8 sps:$4 sm:$0xff]  }
  0x71   : > { %1395 = vmatprep.subr.bf16.mxu0 %v8037_v6  ;;  %1239 = vmatprep.mubr.bf16.mxu1 %v9243_v8  ;;  %v8116_v6 = vld [vmem:[%s11628_s1 + $0x450] ss:$8 sps:$4 sm:$0xff]  }
  0x72   : > { %1352 = vmatprep.mubr.bf16.mxu0 %v8043_v9  ;;  %v8127_v9 = vld [vmem:[%s11628_s1 + $0x464] ss:$8 sps:$4 sm:$0xff]  }
  0x73   : > { %2118 = vmatpush1.bf16.msra.mxu1 %v8038_v12  ;;  %v8125_v12 = vld [vmem:[%s11628_s1 + $0x460] ss:$8 sps:$4 sm:$0xff]  }
  0x74   : > { %1396 = vmatpush1.bf16.msra.mxu0 %v8035_v11  ;;  %2119 = vmatprep.subr.bf16.mxu1 %v8052_v14  ;;  %v8124_v11 = vld [vmem:[%s8986_s13 + $0xa0] ss:$24 sps:$4 sm:$0xff]   ;;  %v8133_v14 = vld [vmem:[%s11628_s1 + $0x474] ss:$8 sps:$4 sm:$0xff]  }
  0x75   : > { %1397 = vmatprep.subr.bf16.mxu0 %v8049_v13  ;;  %v8128_v13 = vld [vmem:[%s11628_s1 + $0x660] ss:$8 sps:$4 sm:$0xff]  }
  0x76   : > { %1240 = vmatmul.mubr.bf16.gmra.mrb[24].mxu1 %v9261_v15 }
  0x77   : > { %1353 = vmatmul.mubr.bf16.gmra.mrb[24].mxu0 %v8046_v17  ;;  %2120 = vmatpush1.bf16.msra.mxu1 %v8050_v19  ;;  %v8137_v17 = vld [vmem:[%s8986_s13 + $0xd4] ss:$24 sps:$4 sm:$0xff]   ;;  %v8134_v19 = vld [vmem:[%s11628_s1 + $0x670] ss:$8 sps:$4 sm:$0xff]  }
  0x78   : > { %1398 = vmatpush1.bf16.msra.mxu0 %v8047_v18  ;;  %2121 = vmatprep.subr.bf16.mxu1 %v8058_v21  ;;  %v8131_v18 = vld [vmem:[%s11628_s1 + $0x470] ss:$8 sps:$4 sm:$0xff]  }
  0x79   : > { %1399 = vmatprep.subr.bf16.mxu0 %v8055_v20  ;;  %1249 = vmatprep.mubr.bf16.mxu1 %v9277_v23  ;;  %v8142_v20 = vld [vmem:[%s11628_s1 + $0x484] ss:$8 sps:$4 sm:$0xff]   ;;  %v8139_v21 = vld [vmem:[%s8986_s13 + $0xd0] ss:$24 sps:$4 sm:$0xff]  }
  0x7a   : > { %1362 = vmatprep.mubr.bf16.mxu0 %v8061_v24  ;;  %v8140_v24 = vld [vmem:[%s11628_s1 + $0x480] ss:$8 sps:$4 sm:$0xff]  }
  0x7b   : > { %2122 = vmatpush1.bf16.msra.mxu1 %v8056_v26  ;;  %v8148_v26 = vld [vmem:[%s11628_s1 + $0x494] ss:$8 sps:$4 sm:$0xff]  }
  0x7c   : > { %1400 = vmatpush1.bf16.msra.mxu0 %v8053_v25  ;;  %2123 = vmatprep.subr.bf16.mxu1 %v8070_v29  ;;  %v8143_v25 = vld [vmem:[%s11628_s1 + $0x680] ss:$8 sps:$4 sm:$0xff]   ;;  %v8146_v29 = vld [vmem:[%s11628_s1 + $0x490] ss:$8 sps:$4 sm:$0xff]  }
  0x7d   : > { %1401 = vmatprep.subr.bf16.mxu0 %v8067_v27  ;;  %v8152_v27 = vld [vmem:[%s8986_s13 + $0x104] ss:$24 sps:$4 sm:$0xff]  }
  0x7e   : > { %1250 = vmatmul.mubr.bf16.gmra.mrb[28].mxu1 %v9295_v30 }
  0x7f   : > { %1363 = vmatmul.mubr.bf16.gmra.mrb[28].mxu0 %v8064_v31  ;;  %2124 = vmatpush1.bf16.msra.mxu1 %v8068_v33  ;;  %v8149_v31 = vld [vmem:[%s11628_s1 + $0x690] ss:$8 sps:$4 sm:$0xff]  }
  0x80   : > { %1402 = vmatpush1.bf16.msra.mxu0 %v8065_v32  ;;  %2125 = vmatprep.subr.bf16.mxu1 %v8076_v36  ;;  %v8157_v32 = vld [vmem:[%s11628_s1 + $0x4a4] ss:$8 sps:$4 sm:$0xff]   ;;  %v8154_v33 = vld [vmem:[%s8986_s13 + $0x100] ss:$24 sps:$4 sm:$0xff]  }
  0x81   : > { %1403 = vmatprep.subr.bf16.mxu0 %v8073_v35  ;;  %1405 = vmatprep.mubr.bf16.mxu0 %v8077_v37  ;;  %v8155_v35 = vld [vmem:[%s11628_s1 + $0x4a0] ss:$8 sps:$4 sm:$0xff]   ;;  %v8163_v37 = vld [vmem:[%s11628_s1 + $0x4b4] ss:$8 sps:$4 sm:$0xff]  }
  0x82   : > { %2127 = vmatprep.mubr.bf16.mxu1 %v8998_v48  ;;  %v8091_v48 = vld [vmem:[%s11628_s1 + $0x614] ss:$8 sps:$4 sm:$0xff]   ;;  %v8158_v36 = vld [vmem:[%s11628_s1 + $0x6a0] ss:$8 sps:$4 sm:$0xff]  }
  0x83   : > { %2126 = vmatpush1.bf16.msra.mxu1 %v8074_v39  ;;  %v8161_v39 = vld [vmem:[%s11628_s1 + $0x4b0] ss:$8 sps:$4 sm:$0xff]  }
  0x84   : > { %1404 = vmatpush1.bf16.msra.mxu0 %v8071_v38  ;;  %2208 = vmatprep.subr.bf16.mxu1 %v8082_v41  ;;  %v8167_v38 = vld [vmem:[%s8986_s13 + $0x134] ss:$24 sps:$4 sm:$0xff]   ;;  %v8164_v41 = vld [vmem:[%s11628_s1 + $0x6b0] ss:$8 sps:$4 sm:$0xff]  }
  0x85   : > { %3156 = vmatprep.subr.bf16.mxu0 %v8085_v42  ;;  %v8172_v42 = vld [vmem:[%s11628_s1 + $0x4c4] ss:$8 sps:$4 sm:$0xff]  }
  0x86   : > { %2128 = vmatmul.mubr.bf16.vlgmr.msra.gmra.mrb[32].mxu1 %v9057_v4  ;;  %v8100_v4 = vld [vmem:[%s11628_s1 + $0x624] ss:$8 sps:$4 sm:$0xff]  }
  0x87   : > { %1406 = vmatmul.mubr.bf16.vlgmr.msra.gmra.mrb[0].mxu0 %v8079_v43  ;;  %2209 = vmatpush1.bf16.msra.mxu1 %v8080_v44  ;;  %v8169_v43 = vld [vmem:[%s8986_s13 + $0x130] ss:$24 sps:$4 sm:$0xff]  }
  0x88   : > { %3157 = vmatpush1.bf16.msra.mxu0 %v8083_v45  ;;  %2210 = vmatprep.subr.bf16.mxu1 %v8088_v47  ;;  %v8170_v44 = vld [vmem:[%s11628_s1 + $0x4c0] ss:$8 sps:$4 sm:$0xff]   ;;  %v8178_v47 = vld [vmem:[%s11628_s1 + $0x4d4] ss:$8 sps:$4 sm:$0xff]  }
  0x89   : > { %3158 = vmatprep.subr.bf16.mxu0 %v8091_v48  ;;  %1415 = vmatprep.mubr.bf16.mxu0 %v8092_v49  ;;  %v8173_v45 = vld [vmem:[%s11628_s1 + $0x6c0] ss:$8 sps:$4 sm:$0xff]   ;;  %v8182_v48 = vld [vmem:[%s8986_s13 + $0x164] ss:$24 sps:$4 sm:$0xff]   ;;  %v8176_v49 = vld [vmem:[%s11628_s1 + $0x4d0] ss:$8 sps:$4 sm:$0xff]  }
  0x8a   : > { %2137 = vmatprep.mubr.bf16.mxu1 %v9073_v10  ;;  %v8106_v10 = vld [vmem:[%s11628_s1 + $0x634] ss:$8 sps:$4 sm:$0xff]  }
  0x8b   : > { %2211 = vmatpush1.bf16.msra.mxu1 %v8086_v50  ;;  %v8179_v50 = vld [vmem:[%s11628_s1 + $0x6d0] ss:$8 sps:$4 sm:$0xff]  }
  0x8c   : > { %3159 = vmatpush1.bf16.msra.mxu0 %v8089_v51  ;;  %2212 = vmatprep.subr.bf16.mxu1 %v8097_v52  ;;  %v8187_v51 = vld [vmem:[%s11628_s1 + $0x4e4] ss:$8 sps:$4 sm:$0xff]   ;;  %v8184_v52 = vld [vmem:[%s8986_s13 + $0x160] ss:$24 sps:$4 sm:$0xff]  }
  0x8d   : > { %3160 = vmatprep.subr.bf16.mxu0 %v8100_v4  ;;  %v8185_v4 = vld [vmem:[%s11628_s1 + $0x4e0] ss:$8 sps:$4 sm:$0xff]  }
  0x8e   : > { %2138 = vmatmul.mubr.bf16.gmra.mrb[36].mxu1 %v9091_v16  ;;  %v8115_v16 = vld [vmem:[%s11628_s1 + $0x644] ss:$8 sps:$4 sm:$0xff]  }
  0x8f   : > { %1416 = vmatmul.mubr.bf16.gmra.mrb[4].mxu0 %v8094_v54  ;;  %2213 = vmatpush1.bf16.msra.mxu1 %v8095_v55  ;;  %v8188_v54 = vld [vmem:[%s11628_s1 + $0x6e0] ss:$8 sps:$4 sm:$0xff]   ;;  %v8193_v55 = vld [vmem:[%s11628_s1 + $0x4f4] ss:$8 sps:$4 sm:$0xff]  }
  0x90   : > { %3161 = vmatpush1.bf16.msra.mxu0 %v8098_v56  ;;  %2214 = vmatprep.subr.bf16.mxu1 %v8103_v57  ;;  %v8191_v56 = vld [vmem:[%s11628_s1 + $0x4f0] ss:$8 sps:$4 sm:$0xff]  }
  0x91   : > { %3162 = vmatprep.subr.bf16.mxu0 %v8106_v10  ;;  %1425 = vmatprep.mubr.bf16.mxu0 %v8107_v58  ;;  %v8194_v57 = vld [vmem:[%s11628_s1 + $0x6f0] ss:$8 sps:$4 sm:$0xff]   ;;  %v8199_v10 = vld [vmem:[%s11628_s1 + $0x504] ss:$8 sps:$4 sm:$0xff]  }
  0x92   : > { %2147 = vmatprep.mubr.bf16.mxu1 %v9107_v22  ;;  %v8121_v22 = vld [vmem:[%s11628_s1 + $0x654] ss:$8 sps:$4 sm:$0xff]   ;;  %v9548_v58 = vld [vmem:[%s8986_s13 + $0xc] ss:$24 sps:$4 sm:$0xff]  }
  0x93   : > { %2215 = vmatpush1.bf16.msra.mxu1 %v8101_v60  ;;  %v8694_v60 = vld [vmem:[%s8986_s13 + $0x4] ss:$24 sps:$4 sm:$0xff]  }
  0x94   : > { %3163 = vmatpush1.bf16.msra.mxu0 %v8104_v61  ;;  %2216 = vmatprep.subr.bf16.mxu1 %v8112_v62  ;;  %v8197_v61 = vld [vmem:[%s11628_s1 + $0x500] ss:$8 sps:$4 sm:$0xff]  }
  0x95   : > { %3164 = vmatprep.subr.bf16.mxu0 %v8115_v16  ;;  %v8200_v62 = vld [vmem:[%s11628_s1 + $0x700] ss:$8 sps:$4 sm:$0xff]   ;;  %v8205_v16 = vld [vmem:[%s11628_s1 + $0x514] ss:$8 sps:$4 sm:$0xff]  }
  0x96   : > { %2148 = vmatmul.mubr.bf16.gmra.mrb[40].mxu1 %v9125_v28  ;;  %v8130_v28 = vld [vmem:[%s11628_s1 + $0x664] ss:$8 sps:$4 sm:$0xff]  }
  0x97   : > { %1426 = vmatmul.mubr.bf16.gmra.mrb[8].mxu0 %v8109_v63  ;;  %2217 = vmatpush1.bf16.msra.mxu1 %v8110_v0  ;;  %v8208_v63 = vld [vmem:[%s11628_s1 + $0x714] ss:$8 sps:$4 sm:$0xff]   ;;  %v9565_v0 = vld [vmem:[%s8986_s13 + $0x8] ss:$24 sps:$4 sm:$0xff]  }
  0x98   : > { %3165 = vmatpush1.bf16.msra.mxu0 %v8113_v2  ;;  %2218 = vmatprep.subr.bf16.mxu1 %v8118_v3  ;;  %v8696_v2 = vld [vmem:[%s8986_s13] ss:$24 sps:$4 sm:$0xff]  }
  0x99   : > { %3166 = vmatprep.subr.bf16.mxu0 %v8121_v22  ;;  %1435 = vmatprep.mubr.bf16.mxu0 %v8122_v5  ;;  %v8203_v3 = vld [vmem:[%s11628_s1 + $0x510] ss:$8 sps:$4 sm:$0xff]   ;;  %v8211_v5 = vld [vmem:[%s11628_s1 + $0x524] ss:$8 sps:$4 sm:$0xff]  }
  0x9a   : > { %2157 = vmatprep.mubr.bf16.mxu1 %v9141_v34  ;;  %v8136_v34 = vld [vmem:[%s11628_s1 + $0x674] ss:$8 sps:$4 sm:$0xff]   ;;  %v8206_v22 = vld [vmem:[%s11628_s1 + $0x710] ss:$8 sps:$4 sm:$0xff]  }
  0x9b   : > { %2219 = vmatpush1.bf16.msra.mxu1 %v8116_v6  ;;  %v8214_v6 = vld [vmem:[%s11628_s1 + $0x724] ss:$8 sps:$4 sm:$0xff]  }
  0x9c   : > { %3167 = vmatpush1.bf16.msra.mxu0 %v8119_v7  ;;  %2220 = vmatprep.subr.bf16.mxu1 %v8127_v9  ;;  %v9582_v7 = vld [vmem:[%s8986_s13 + $0x3c] ss:$24 sps:$4 sm:$0xff]  }
  0x9d   : > { %3168 = vmatprep.subr.bf16.mxu0 %v8130_v28  ;;  %v8698_v9 = vld [vmem:[%s8986_s13 + $0x34] ss:$24 sps:$4 sm:$0xff]   ;;  %v8209_v28 = vld [vmem:[%s11628_s1 + $0x520] ss:$8 sps:$4 sm:$0xff]  }
  0x9e   : > { %2158 = vmatmul.mubr.bf16.gmra.mrb[44].mxu1 %v9159_v40  ;;  %v8145_v40 = vld [vmem:[%s11628_s1 + $0x684] ss:$8 sps:$4 sm:$0xff]  }
  0x9f   : > { %1436 = vmatmul.mubr.bf16.gmra.mrb[12].mxu0 %v8124_v11  ;;  %2221 = vmatpush1.bf16.msra.mxu1 %v8125_v12  ;;  %v8212_v11 = vld [vmem:[%s11628_s1 + $0x720] ss:$8 sps:$4 sm:$0xff]   ;;  %v8217_v12 = vld [vmem:[%s11628_s1 + $0x534] ss:$8 sps:$4 sm:$0xff]  }
  0xa0   : > { %3169 = vmatpush1.bf16.msra.mxu0 %v8128_v13  ;;  %2222 = vmatprep.subr.bf16.mxu1 %v8133_v14  ;;  %v8220_v13 = vld [vmem:[%s11628_s1 + $0x734] ss:$8 sps:$4 sm:$0xff]   ;;  %v9599_v14 = vld [vmem:[%s8986_s13 + $0x38] ss:$24 sps:$4 sm:$0xff]  }
  0xa1   : > { %3170 = vmatprep.subr.bf16.mxu0 %v8136_v34  ;;  %1445 = vmatprep.mubr.bf16.mxu0 %v8137_v17  ;;  %v8700_v34 = vld [vmem:[%s8986_s13 + $0x30] ss:$24 sps:$4 sm:$0xff]  }
  0xa2   : > { %2167 = vmatprep.mubr.bf16.mxu1 %v9175_v46  ;;  %v8151_v46 = vld [vmem:[%s11628_s1 + $0x694] ss:$8 sps:$4 sm:$0xff]   ;;  %v8215_v17 = vld [vmem:[%s11628_s1 + $0x530] ss:$8 sps:$4 sm:$0xff]  }
  0xa3   : > { %2223 = vmatpush1.bf16.msra.mxu1 %v8131_v18  ;;  %v8218_v18 = vld [vmem:[%s11628_s1 + $0x730] ss:$8 sps:$4 sm:$0xff]  }
  0xa4   : > { %3171 = vmatpush1.bf16.msra.mxu0 %v8134_v19  ;;  %2224 = vmatprep.subr.bf16.mxu1 %v8142_v20  ;;  %v8223_v19 = vld [vmem:[%s11628_s1 + $0x544] ss:$8 sps:$4 sm:$0xff]  }
  0xa5   : > { %3172 = vmatprep.subr.bf16.mxu0 %v8145_v40  ;;  %v8226_v20 = vld [vmem:[%s11628_s1 + $0x744] ss:$8 sps:$4 sm:$0xff]  }
  0xa6   : > { %2168 = vmatmul.mubr.bf16.gmra.mrb[48].mxu1 %v9193_v53  ;;  %v8160_v53 = vld [vmem:[%s11628_s1 + $0x6a4] ss:$8 sps:$4 sm:$0xff]  }
  0xa7   : > { %1446 = vmatmul.mubr.bf16.gmra.mrb[16].mxu0 %v8139_v21  ;;  %2225 = vmatpush1.bf16.msra.mxu1 %v8140_v24  ;;  %v9616_v40 = vld [vmem:[%s8986_s13 + $0x6c] ss:$24 sps:$4 sm:$0xff]   ;;  %v8221_v24 = vld [vmem:[%s11628_s1 + $0x540] ss:$8 sps:$4 sm:$0xff]  }
  0xa8   : > { %3173 = vmatpush1.bf16.msra.mxu0 %v8143_v25  ;;  %2226 = vmatprep.subr.bf16.mxu1 %v8148_v26  ;;  %v8702_v21 = vld [vmem:[%s8986_s13 + $0x64] ss:$24 sps:$4 sm:$0xff]   ;;  %v8224_v25 = vld [vmem:[%s11628_s1 + $0x740] ss:$8 sps:$4 sm:$0xff]  }
  0xa9   : > { %3174 = vmatprep.subr.bf16.mxu0 %v8151_v46  ;;  %1455 = vmatprep.mubr.bf16.mxu0 %v8152_v27  ;;  %v8229_v26 = vld [vmem:[%s11628_s1 + $0x554] ss:$8 sps:$4 sm:$0xff]   ;;  %v9633_v27 = vld [vmem:[%s8986_s13 + $0x68] ss:$24 sps:$4 sm:$0xff]  }
  0xaa   : > { %2177 = vmatprep.mubr.bf16.mxu1 %v9209_v59  ;;  %v8166_v59 = vld [vmem:[%s11628_s1 + $0x6b4] ss:$8 sps:$4 sm:$0xff]  }
  0xab   : > { %2227 = vmatpush1.bf16.msra.mxu1 %v8146_v29  ;;  %v8232_v46 = vld [vmem:[%s11628_s1 + $0x754] ss:$8 sps:$4 sm:$0xff]   ;;  %v8704_v29 = vld [vmem:[%s8986_s13 + $0x60] ss:$24 sps:$4 sm:$0xff]  }
  0xac   : > { %3175 = vmatpush1.bf16.msra.mxu0 %v8149_v31  ;;  %2228 = vmatprep.subr.bf16.mxu1 %v8157_v32  ;;  %v8227_v31 = vld [vmem:[%s11628_s1 + $0x550] ss:$8 sps:$4 sm:$0xff]  }
  0xad   : > { %3176 = vmatprep.subr.bf16.mxu0 %v8160_v53  ;;  %v8230_v32 = vld [vmem:[%s11628_s1 + $0x750] ss:$8 sps:$4 sm:$0xff]   ;;  %v8235_v53 = vld [vmem:[%s11628_s1 + $0x564] ss:$8 sps:$4 sm:$0xff]  }
  0xae   : > { %2178 = vmatmul.mubr.bf16.gmra.mrb[52].mxu1 %v9227_v1  ;;  %v8175_v1 = vld [vmem:[%s11628_s1 + $0x6c4] ss:$8 sps:$4 sm:$0xff]  }
  0xaf   : > { %1456 = vmatmul.mubr.bf16.gmra.mrb[20].mxu0 %v8154_v33  ;;  %2229 = vmatpush1.bf16.msra.mxu1 %v8155_v35  ;;  %v8238_v33 = vld [vmem:[%s11628_s1 + $0x764] ss:$8 sps:$4 sm:$0xff]   ;;  %v9650_v35 = vld [vmem:[%s8986_s13 + $0x9c] ss:$24 sps:$4 sm:$0xff]  }
  0xb0   : > { %3177 = vmatpush1.bf16.msra.mxu0 %v8158_v36  ;;  %2230 = vmatprep.subr.bf16.mxu1 %v8163_v37  ;;  %v8706_v36 = vld [vmem:[%s8986_s13 + $0x94] ss:$24 sps:$4 sm:$0xff]   ;;  %v8233_v37 = vld [vmem:[%s11628_s1 + $0x560] ss:$8 sps:$4 sm:$0xff]  }
  0xb1   : > { %3178 = vmatprep.subr.bf16.mxu0 %v8166_v59  ;;  %1465 = vmatprep.mubr.bf16.mxu0 %v8167_v38  ;;  %v8236_v59 = vld [vmem:[%s11628_s1 + $0x760] ss:$8 sps:$4 sm:$0xff]   ;;  %v8241_v38 = vld [vmem:[%s11628_s1 + $0x574] ss:$8 sps:$4 sm:$0xff]  }
  0xb2   : > { %2187 = vmatprep.mubr.bf16.mxu1 %v9243_v8  ;;  %v8181_v8 = vld [vmem:[%s11628_s1 + $0x6d4] ss:$8 sps:$4 sm:$0xff]  }
  0xb3   : > { %2231 = vmatpush1.bf16.msra.mxu1 %v8161_v39  ;;  %v8244_v39 = vld [vmem:[%s11628_s1 + $0x774] ss:$8 sps:$4 sm:$0xff]  }
  0xb4   : > { %3179 = vmatpush1.bf16.msra.mxu0 %v8164_v41  ;;  %2232 = vmatprep.subr.bf16.mxu1 %v8172_v42  ;;  %v9667_v41 = vld [vmem:[%s8986_s13 + $0x98] ss:$24 sps:$4 sm:$0xff]  }
  0xb5   : > { %3180 = vmatprep.subr.bf16.mxu0 %v8175_v1  ;;  %v8708_v42 = vld [vmem:[%s8986_s13 + $0x90] ss:$24 sps:$4 sm:$0xff]  }
  0xb6   : > { %2188 = vmatmul.mubr.bf16.gmra.mrb[56].mxu1 %v9261_v15  ;;  %v8190_v15 = vld [vmem:[%s11628_s1 + $0x6e4] ss:$8 sps:$4 sm:$0xff]   ;;  %v8239_v1 = vld [vmem:[%s11628_s1 + $0x570] ss:$8 sps:$4 sm:$0xff]  }
  0xb7   : > { %1466 = vmatmul.mubr.bf16.gmra.mrb[24].mxu0 %v8169_v43  ;;  %2233 = vmatpush1.bf16.msra.mxu1 %v8170_v44  ;;  %v8242_v43 = vld [vmem:[%s11628_s1 + $0x770] ss:$8 sps:$4 sm:$0xff]   ;;  %v8247_v44 = vld [vmem:[%s11628_s1 + $0x584] ss:$8 sps:$4 sm:$0xff]  }
  0xb8   : > { %3181 = vmatpush1.bf16.msra.mxu0 %v8173_v45  ;;  %2234 = vmatprep.subr.bf16.mxu1 %v8178_v47  ;;  %v8250_v45 = vld [vmem:[%s11628_s1 + $0x784] ss:$8 sps:$4 sm:$0xff]  }
  0xb9   : > { %3182 = vmatprep.subr.bf16.mxu0 %v8181_v8  ;;  %1475 = vmatprep.mubr.bf16.mxu0 %v8182_v48  ;;  %v9684_v47 = vld [vmem:[%s8986_s13 + $0xcc] ss:$24 sps:$4 sm:$0xff]   ;;  %v8245_v48 = vld [vmem:[%s11628_s1 + $0x580] ss:$8 sps:$4 sm:$0xff]  }
  0xba   : > { %2197 = vmatprep.mubr.bf16.mxu1 %v9277_v23  ;;  %v8196_v23 = vld [vmem:[%s11628_s1 + $0x6f4] ss:$8 sps:$4 sm:$0xff]  }
  0xbb   : > { %2235 = vmatpush1.bf16.msra.mxu1 %v8176_v49  ;;  %v8710_v8 = vld [vmem:[%s8986_s13 + $0xc4] ss:$24 sps:$4 sm:$0xff]   ;;  %v8248_v49 = vld [vmem:[%s11628_s1 + $0x780] ss:$8 sps:$4 sm:$0xff]  }
  0xbc   : > { %3183 = vmatpush1.bf16.msra.mxu0 %v8179_v50  ;;  %2236 = vmatprep.subr.bf16.mxu1 %v8187_v51  ;;  %v8253_v50 = vld [vmem:[%s11628_s1 + $0x594] ss:$8 sps:$4 sm:$0xff]  }
  0xbd   : > { %3184 = vmatprep.subr.bf16.mxu0 %v8190_v15  ;;  %v8256_v51 = vld [vmem:[%s11628_s1 + $0x794] ss:$8 sps:$4 sm:$0xff]   ;;  %v9701_v15 = vld [vmem:[%s8986_s13 + $0xc8] ss:$24 sps:$4 sm:$0xff]  }
  0xbe   : > { %2198 = vmatmul.mubr.bf16.gmra.mrb[60].mxu1 %v9295_v30  ;;  %v8202_v30 = vld [vmem:[%s11628_s1 + $0x704] ss:$8 sps:$4 sm:$0xff]  }
  0xbf   : > { %1476 = vmatmul.mubr.bf16.gmra.mrb[28].mxu0 %v8184_v52  ;;  %2237 = vmatpush1.bf16.msra.mxu1 %v8185_v4  ;;  %v8712_v52 = vld [vmem:[%s8986_s13 + $0xc0] ss:$24 sps:$4 sm:$0xff]  }
  0xc0   : > { %3185 = vmatpush1.bf16.msra.mxu0 %v8188_v54  ;;  %2238 = vmatprep.subr.bf16.mxu1 %v8193_v55  ;;  %v8251_v4 = vld [vmem:[%s11628_s1 + $0x590] ss:$8 sps:$4 sm:$0xff]   ;;  %v8259_v55 = vld [vmem:[%s11628_s1 + $0x5a4] ss:$8 sps:$4 sm:$0xff]  }
  0xc1   : > { %3186 = vmatprep.subr.bf16.mxu0 %v8196_v23  ;;  %2240 = vmatprep.mubr.bf16.mxu1 %v9548_v58  ;;  %v8254_v54 = vld [vmem:[%s11628_s1 + $0x790] ss:$8 sps:$4 sm:$0xff]   ;;  %v8262_v23 = vld [vmem:[%s11628_s1 + $0x7a4] ss:$8 sps:$4 sm:$0xff]  }
  0xc2   : > { %3188 = vmatprep.mubr.bf16.mxu0 %v8694_v60  ;;  %v8265_v60 = vld [vmem:[%s11628_s1 + $0x5b4] ss:$8 sps:$4 sm:$0xff]  }
  0xc3   : > { %2239 = vmatpush1.bf16.msra.mxu1 %v8191_v56  ;;  %v9718_v56 = vld [vmem:[%s8986_s13 + $0xfc] ss:$24 sps:$4 sm:$0xff]  }
  0xc4   : > { %3187 = vmatpush1.bf16.msra.mxu0 %v8194_v57  ;;  %2321 = vmatprep.subr.bf16.mxu1 %v8199_v10  ;;  %v8714_v57 = vld [vmem:[%s8986_s13 + $0xf4] ss:$24 sps:$4 sm:$0xff]   ;;  %v8257_v10 = vld [vmem:[%s11628_s1 + $0x5a0] ss:$8 sps:$4 sm:$0xff]  }
  0xc5   : > { %3269 = vmatprep.subr.bf16.mxu0 %v8202_v30  ;;  %v8260_v30 = vld [vmem:[%s11628_s1 + $0x7a0] ss:$8 sps:$4 sm:$0xff]  }
  0xc6   : > { %2241 = vmatmul.mubr.bf16.vlgmr.msra.gmra.mrb[32].mxu1 %v9565_v0 }
  0xc7   : > { %3189 = vmatmul.mubr.bf16.vlgmr.msra.gmra.mrb[32].mxu0 %v8696_v2  ;;  %2322 = vmatpush1.bf16.msra.mxu1 %v8197_v61  ;;  %v8268_v61 = vld [vmem:[%s11628_s1 + $0x7b4] ss:$8 sps:$4 sm:$0xff]   ;;  %v8266_v2 = vld [vmem:[%s11628_s1 + $0x7b0] ss:$8 sps:$4 sm:$0xff]  }
  0xc8   : > { %3270 = vmatpush1.bf16.msra.mxu0 %v8200_v62  ;;  %2323 = vmatprep.subr.bf16.mxu1 %v8205_v16  ;;  %v9735_v62 = vld [vmem:[%s8986_s13 + $0xf8] ss:$24 sps:$4 sm:$0xff]  }
  0xc9   : > { %3271 = vmatprep.subr.bf16.mxu0 %v8208_v63  ;;  %2250 = vmatprep.mubr.bf16.mxu1 %v9582_v7  ;;  %v8716_v16 = vld [vmem:[%s8986_s13 + $0xf0] ss:$24 sps:$4 sm:$0xff]  }
  0xca   : > { %3198 = vmatprep.mubr.bf16.mxu0 %v8698_v9  ;;  %v8263_v63 = vld [vmem:[%s11628_s1 + $0x5b0] ss:$8 sps:$4 sm:$0xff]   ;;  %v8269_v9 = vld [vmem:[%s11628_s1 + $0x5c0] ss:$8 sps:$4 sm:$0xff]  }
  0xcb   : > { %2324 = vmatpush1.bf16.msra.mxu1 %v8203_v3  ;;  %v8271_v3 = vld [vmem:[%s11628_s1 + $0x5c4] ss:$8 sps:$4 sm:$0xff]  }
  0xcc   : > { %3272 = vmatpush1.bf16.msra.mxu0 %v8206_v22  ;;  %2325 = vmatprep.subr.bf16.mxu1 %v8211_v5  ;;  %v8274_v22 = vld [vmem:[%s11628_s1 + $0x7c4] ss:$8 sps:$4 sm:$0xff]  }
  0xcd   : > { %3273 = vmatprep.subr.bf16.mxu0 %v8214_v6  ;;  %v9752_v5 = vld [vmem:[%s8986_s13 + $0x12c] ss:$24 sps:$4 sm:$0xff]  }
  0xce   : > { %2251 = vmatmul.mubr.bf16.gmra.mrb[36].mxu1 %v9599_v14  ;;  %v8718_v6 = vld [vmem:[%s8986_s13 + $0x124] ss:$24 sps:$4 sm:$0xff]  }
  0xcf   : > { %3199 = vmatmul.mubr.bf16.gmra.mrb[36].mxu0 %v8700_v34  ;;  %2326 = vmatpush1.bf16.msra.mxu1 %v8209_v28  ;;  %v8272_v28 = vld [vmem:[%s11628_s1 + $0x7c0] ss:$8 sps:$4 sm:$0xff]  }
  0xd0   : > { %3274 = vmatpush1.bf16.msra.mxu0 %v8212_v11  ;;  %2327 = vmatprep.subr.bf16.mxu1 %v8217_v12  ;;  %v8277_v11 = vld [vmem:[%s11628_s1 + $0x5d4] ss:$8 sps:$4 sm:$0xff]   ;;  %v8720_v34 = vld [vmem:[%s8986_s13 + $0x120] ss:$24 sps:$4 sm:$0xff]  }
  0xd1   : > { %3275 = vmatprep.subr.bf16.mxu0 %v8220_v13  ;;  %2260 = vmatprep.mubr.bf16.mxu1 %v9616_v40  ;;  %v8280_v12 = vld [vmem:[%s11628_s1 + $0x7d4] ss:$8 sps:$4 sm:$0xff]   ;;  %v9769_v13 = vld [vmem:[%s8986_s13 + $0x128] ss:$24 sps:$4 sm:$0xff]  }
  0xd2   : > { %3208 = vmatprep.mubr.bf16.mxu0 %v8702_v21  ;;  %v9786_v21 = vld [vmem:[%s8986_s13 + $0x15c] ss:$24 sps:$4 sm:$0xff]  }
  0xd3   : > { %2328 = vmatpush1.bf16.msra.mxu1 %v8215_v17  ;;  %v8275_v17 = vld [vmem:[%s11628_s1 + $0x5d0] ss:$8 sps:$4 sm:$0xff]  }
  0xd4   : > { %3276 = vmatpush1.bf16.msra.mxu0 %v8218_v18  ;;  %2329 = vmatprep.subr.bf16.mxu1 %v8223_v19  ;;  %v8278_v18 = vld [vmem:[%s11628_s1 + $0x7d0] ss:$8 sps:$4 sm:$0xff]   ;;  %v8283_v19 = vld [vmem:[%s11628_s1 + $0x5e4] ss:$8 sps:$4 sm:$0xff]  }
  0xd5   : > { %3277 = vmatprep.subr.bf16.mxu0 %v8226_v20  ;;  %v8286_v20 = vld [vmem:[%s11628_s1 + $0x7e4] ss:$8 sps:$4 sm:$0xff]  }
  0xd6   : > { %2261 = vmatmul.mubr.bf16.gmra.mrb[40].mxu1 %v9633_v27 }
  0xd7   : > { %3209 = vmatmul.mubr.bf16.gmra.mrb[40].mxu0 %v8704_v29  ;;  %2330 = vmatpush1.bf16.msra.mxu1 %v8221_v24  ;;  %v8722_v24 = vld [vmem:[%s8986_s13 + $0x154] ss:$24 sps:$4 sm:$0xff]  }
  0xd8   : > { %3278 = vmatpush1.bf16.msra.mxu0 %v8224_v25  ;;  %2331 = vmatprep.subr.bf16.mxu1 %v8229_v26  ;;  %v8281_v25 = vld [vmem:[%s11628_s1 + $0x5e0] ss:$8 sps:$4 sm:$0xff]   ;;  %v8292_v29 = vld [vmem:[%s11628_s1 + $0x7f4] ss:$8 sps:$4 sm:$0xff]  }
  0xd9   : > { %3279 = vmatprep.subr.bf16.mxu0 %v8232_v46  ;;  %2270 = vmatprep.mubr.bf16.mxu1 %v9650_v35  ;;  %v8284_v26 = vld [vmem:[%s11628_s1 + $0x7e0] ss:$8 sps:$4 sm:$0xff]   ;;  %v8289_v46 = vld [vmem:[%s11628_s1 + $0x5f4] ss:$8 sps:$4 sm:$0xff]  }
  0xda   : > { %3218 = vmatprep.mubr.bf16.mxu0 %v8706_v36  ;;  %v8295_v36 = vld [vmem:[%s11628_s1 + $0x804] ss:$8 sps:$4 sm:$0xff]  }
  0xdb   : > { %2332 = vmatpush1.bf16.msra.mxu1 %v8227_v31  ;;  %v9803_v31 = vld [vmem:[%s8986_s13 + $0x158] ss:$24 sps:$4 sm:$0xff]  }
  0xdc   : > { %3280 = vmatpush1.bf16.msra.mxu0 %v8230_v32  ;;  %2333 = vmatprep.subr.bf16.mxu1 %v8235_v53  ;;  %v8724_v32 = vld [vmem:[%s8986_s13 + $0x150] ss:$24 sps:$4 sm:$0xff]  }
  0xdd   : > { %3281 = vmatprep.subr.bf16.mxu0 %v8238_v33  ;;  %v8287_v53 = vld [vmem:[%s11628_s1 + $0x5f0] ss:$8 sps:$4 sm:$0xff]  }
  0xde   : > { %2271 = vmatmul.mubr.bf16.gmra.mrb[44].mxu1 %v9667_v41  ;;  %v8290_v33 = vld [vmem:[%s11628_s1 + $0x7f0] ss:$8 sps:$4 sm:$0xff]  }
  0xdf   : > { %3219 = vmatmul.mubr.bf16.gmra.mrb[44].mxu0 %v8708_v42  ;;  %2334 = vmatpush1.bf16.msra.mxu1 %v8233_v37  ;;  %v8298_v37 = vld [vmem:[%s11628_s1 + $0x904] ss:$8 sps:$4 sm:$0xff]   ;;  %v8301_v42 = vld [vmem:[%s11628_s1 + $0x814] ss:$8 sps:$4 sm:$0xff]  }
  0xe0   : > { %3282 = vmatpush1.bf16.msra.mxu0 %v8236_v59  ;;  %2335 = vmatprep.subr.bf16.mxu1 %v8241_v38  ;;  %v9820_v59 = vld [vmem:[%s8986_s13 + $0x14] ss:$24 sps:$4 sm:$0xff]   ;;  %v8293_v38 = vld [vmem:[%s11628_s1 + $0x800] ss:$8 sps:$4 sm:$0xff]  }
  0xe1   : > { %3283 = vmatprep.subr.bf16.mxu0 %v8244_v39  ;;  %2280 = vmatprep.mubr.bf16.mxu1 %v9684_v47  ;;  %v8296_v39 = vld [vmem:[%s11628_s1 + $0x900] ss:$8 sps:$4 sm:$0xff]  }
  0xe2   : > { %3228 = vmatprep.mubr.bf16.mxu0 %v8710_v8  ;;  %v9854_v8 = vld [vmem:[%s8986_s13 + $0x44] ss:$24 sps:$4 sm:$0xff]  }
  0xe3   : > { %2336 = vmatpush1.bf16.msra.mxu1 %v8239_v1  ;;  %v9837_v1 = vld [vmem:[%s8986_s13 + $0x10] ss:$24 sps:$4 sm:$0xff]  }
  0xe4   : > { %3284 = vmatpush1.bf16.msra.mxu0 %v8242_v43  ;;  %2337 = vmatprep.subr.bf16.mxu1 %v8247_v44  ;;  %v8299_v43 = vld [vmem:[%s11628_s1 + $0x810] ss:$8 sps:$4 sm:$0xff]  }
  0xe5   : > { %3285 = vmatprep.subr.bf16.mxu0 %v8250_v45  ;;  %v8302_v44 = vld [vmem:[%s11628_s1 + $0x910] ss:$8 sps:$4 sm:$0xff]   ;;  %v8307_v45 = vld [vmem:[%s11628_s1 + $0x824] ss:$8 sps:$4 sm:$0xff]  }
  0xe6   : > { %2281 = vmatmul.mubr.bf16.gmra.mrb[48].mxu1 %v9701_v15 }
  0xe7   : > { %3229 = vmatmul.mubr.bf16.gmra.mrb[48].mxu0 %v8712_v52  ;;  %2338 = vmatpush1.bf16.msra.mxu1 %v8245_v48  ;;  %v8305_v48 = vld [vmem:[%s11628_s1 + $0x820] ss:$8 sps:$4 sm:$0xff]   ;;  %v8311_v52 = vld [vmem:[%s11628_s1 + $0x830] ss:$8 sps:$4 sm:$0xff]  }
  0xe8   : > { %3286 = vmatpush1.bf16.msra.mxu0 %v8248_v49  ;;  %2339 = vmatprep.subr.bf16.mxu1 %v8253_v50  ;;  %v8308_v49 = vld [vmem:[%s11628_s1 + $0x920] ss:$8 sps:$4 sm:$0xff]   ;;  %v8313_v50 = vld [vmem:[%s11628_s1 + $0x834] ss:$8 sps:$4 sm:$0xff]  }
  0xe9   : > { %3287 = vmatprep.subr.bf16.mxu0 %v8256_v51  ;;  %2290 = vmatprep.mubr.bf16.mxu1 %v9718_v56  ;;  %v9871_v51 = vld [vmem:[%s8986_s13 + $0x40] ss:$24 sps:$4 sm:$0xff]  }
  0xea   : > { %3238 = vmatprep.mubr.bf16.mxu0 %v8714_v57  ;;  %v8320_v57 = vld [vmem:[%s11628_s1 + $0x940] ss:$8 sps:$4 sm:$0xff]  }
  0xeb   : > { %2340 = vmatpush1.bf16.msra.mxu1 %v8251_v4  ;;  %v8314_v4 = vld [vmem:[%s11628_s1 + $0x930] ss:$8 sps:$4 sm:$0xff]  }
  0xec   : > { %3288 = vmatpush1.bf16.msra.mxu0 %v8254_v54  ;;  %2341 = vmatprep.subr.bf16.mxu1 %v8259_v55  ;;  %v8319_v54 = vld [vmem:[%s11628_s1 + $0x844] ss:$8 sps:$4 sm:$0xff]  }
  0xed   : > { %3289 = vmatprep.subr.bf16.mxu0 %v8262_v23  ;;  %v9888_v55 = vld [vmem:[%s8986_s13 + $0x74] ss:$24 sps:$4 sm:$0xff]   ;;  %v8317_v23 = vld [vmem:[%s11628_s1 + $0x840] ss:$8 sps:$4 sm:$0xff]  }
  0xee   : > { %2291 = vmatmul.mubr.bf16.gmra.mrb[52].mxu1 %v9735_v62 }
  0xef   : > { %3239 = vmatmul.mubr.bf16.gmra.mrb[52].mxu0 %v8716_v16  ;;  %2342 = vmatpush1.bf16.msra.mxu1 %v8257_v10  ;;  %v8325_v10 = vld [vmem:[%s11628_s1 + $0x854] ss:$8 sps:$4 sm:$0xff]   ;;  %v8331_v16 = vld [vmem:[%s11628_s1 + $0x864] ss:$8 sps:$4 sm:$0xff]  }
  0xf0   : > { %3290 = vmatpush1.bf16.msra.mxu0 %v8260_v30  ;;  %2343 = vmatprep.subr.bf16.mxu1 %v8265_v60  ;;  %v9905_v30 = vld [vmem:[%s8986_s13 + $0x70] ss:$24 sps:$4 sm:$0xff]  }
  0xf1   : > { %3291 = vmatprep.subr.bf16.mxu0 %v8268_v61  ;;  %2300 = vmatprep.mubr.bf16.mxu1 %v9752_v5  ;;  %v8323_v60 = vld [vmem:[%s11628_s1 + $0x850] ss:$8 sps:$4 sm:$0xff]  }
  0xf2   : > { %3248 = vmatprep.mubr.bf16.mxu0 %v8718_v6  ;;  %v8326_v61 = vld [vmem:[%s11628_s1 + $0x950] ss:$8 sps:$4 sm:$0xff]  }
  0xf3   : > { %2344 = vmatpush1.bf16.msra.mxu1 %v8263_v63  ;;  %v9922_v63 = vld [vmem:[%s8986_s13 + $0xa4] ss:$24 sps:$4 sm:$0xff]  }
  0xf4   : > { %3292 = vmatpush1.bf16.msra.mxu0 %v8266_v2  ;;  %2345 = vmatprep.subr.bf16.mxu1 %v8271_v3  ;;  %v8329_v3 = vld [vmem:[%s11628_s1 + $0x860] ss:$8 sps:$4 sm:$0xff]  }
  0xf5   : > { %3293 = vmatprep.subr.bf16.mxu0 %v8274_v22  ;;  %v8332_v22 = vld [vmem:[%s11628_s1 + $0x960] ss:$8 sps:$4 sm:$0xff]  }
  0xf6   : > { %2301 = vmatmul.mubr.bf16.gmra.mrb[56].mxu1 %v9769_v13 }
  0xf7   : > { %3249 = vmatmul.mubr.bf16.gmra.mrb[56].mxu0 %v8720_v34  ;;  %2346 = vmatpush1.bf16.msra.mxu1 %v8269_v9  ;;  %v8337_v9 = vld [vmem:[%s11628_s1 + $0x874] ss:$8 sps:$4 sm:$0xff]   ;;  %v8335_v34 = vld [vmem:[%s11628_s1 + $0x870] ss:$8 sps:$4 sm:$0xff]  }
  0xf8   : > { %3294 = vmatpush1.bf16.msra.mxu0 %v8272_v28  ;;  %2347 = vmatprep.subr.bf16.mxu1 %v8277_v11 }
  0xf9   : > { %3295 = vmatprep.subr.bf16.mxu0 %v8280_v12  ;;  %2310 = vmatprep.mubr.bf16.mxu1 %v9786_v21  ;;  %v9947_v12 = vld [vmem:[%s8986_s13 + $0xa0] ss:$24 sps:$4 sm:$0xff]  }
  0xfa   : > { %3258 = vmatprep.mubr.bf16.mxu0 %v8722_v24  ;;  %v8341_v24 = vld [vmem:[%s11628_s1 + $0x880] ss:$8 sps:$4 sm:$0xff]  }
  0xfb   : > { %2348 = vmatpush1.bf16.msra.mxu1 %v8275_v17  ;;  %v8338_v17 = vld [vmem:[%s11628_s1 + $0x970] ss:$8 sps:$4 sm:$0xff]  }
  0xfc   : > { %3296 = vmatpush1.bf16.msra.mxu0 %v8278_v18  ;;  %2349 = vmatprep.subr.bf16.mxu1 %v8283_v19  ;;  %v8343_v18 = vld [vmem:[%s11628_s1 + $0x884] ss:$8 sps:$4 sm:$0xff]  }
  0xfd   : > { %3297 = vmatprep.subr.bf16.mxu0 %v8286_v20  ;;  %v9964_v19 = vld [vmem:[%s8986_s13 + $0xd4] ss:$24 sps:$4 sm:$0xff]  }
  0xfe   : > { %2311 = vmatmul.mubr.bf16.gmra.mrb[60].mxu1 %v9803_v31 }
  0xff   : > { %3259 = vmatmul.mubr.bf16.gmra.mrb[60].mxu0 %v8724_v32  ;;  %2350 = vmatpush1.bf16.msra.mxu1 %v8281_v25  ;;  %v8344_v25 = vld [vmem:[%s11628_s1 + $0x980] ss:$8 sps:$4 sm:$0xff]  }
 0x100   : > { %3298 = vmatpush1.bf16.msra.mxu0 %v8284_v26  ;;  %2351 = vmatprep.subr.bf16.mxu1 %v8289_v46  ;;  %v8349_v46 = vld [vmem:[%s11628_s1 + $0x894] ss:$8 sps:$4 sm:$0xff]  }
 0x101   : > { %3299 = vmatprep.subr.bf16.mxu0 %v8292_v29  ;;  %2353 = vmatprep.mubr.bf16.mxu1 %v9820_v59 }
 0x102   : > { %3301 = vmatprep.mubr.bf16.mxu0 %v9548_v58  ;;  %v8304_v58 = vld [vmem:[%s11628_s1 + $0x914] ss:$8 sps:$4 sm:$0xff]  }
 0x103   : > { %2352 = vmatpush1.bf16.msra.mxu1 %v8287_v53  ;;  %v9989_v53 = vld [vmem:[%s8986_s13 + $0xd0] ss:$24 sps:$4 sm:$0xff]  }
 0x104   : > { %3300 = vmatpush1.bf16.msra.mxu0 %v8290_v33  ;;  %4217 = vmatprep.subr.bf16.mxu1 %v8298_v37  ;;  %v8347_v33 = vld [vmem:[%s11628_s1 + $0x890] ss:$8 sps:$4 sm:$0xff]   ;;  %v8355_v37 = vld [vmem:[%s11628_s1 + $0x8a4] ss:$8 sps:$4 sm:$0xff]  }
 0x105   : > { %3382 = vmatprep.subr.bf16.mxu0 %v8295_v36  ;;  %v8350_v36 = vld [vmem:[%s11628_s1 + $0x990] ss:$8 sps:$4 sm:$0xff]  }
 0x106   : > { %2354 = vmatmul.mubr.bf16.vlgmr.msra.gmra.mrb[32].mxu1 %v9837_v1 }
 0x107   : > { %3302 = vmatmul.mubr.bf16.vlgmr.msra.gmra.mrb[32].mxu0 %v9565_v0  ;;  %4218 = vmatpush1.bf16.msra.mxu1 %v8296_v39  ;;  %v8310_v0 = vld [vmem:[%s11628_s1 + $0x924] ss:$8 sps:$4 sm:$0xff]  }
 0x108   : > { %3383 = vmatpush1.bf16.msra.mxu0 %v8293_v38  ;;  %4219 = vmatprep.subr.bf16.mxu1 %v8304_v58  ;;  %v10006_v38 = vld [vmem:[%s8986_s13 + $0x104] ss:$24 sps:$4 sm:$0xff]   ;;  %v8356_v58 = vld [vmem:[%s11628_s1 + $0x9a0] ss:$8 sps:$4 sm:$0xff]  }
 0x109   : > { %3384 = vmatprep.subr.bf16.mxu0 %v8301_v42  ;;  %2363 = vmatprep.mubr.bf16.mxu1 %v9854_v8  ;;  %v8353_v42 = vld [vmem:[%s11628_s1 + $0x8a0] ss:$8 sps:$4 sm:$0xff]  }
 0x10a   : > { %3311 = vmatprep.mubr.bf16.mxu0 %v9582_v7  ;;  %v8316_v7 = vld [vmem:[%s11628_s1 + $0x934] ss:$8 sps:$4 sm:$0xff]  }
 0x10b   : > { %4220 = vmatpush1.bf16.msra.mxu1 %v8302_v44  ;;  %v8361_v44 = vld [vmem:[%s11628_s1 + $0x8b4] ss:$8 sps:$4 sm:$0xff]  }
 0x10c   : > { %3385 = vmatpush1.bf16.msra.mxu0 %v8299_v43  ;;  %4221 = vmatprep.subr.bf16.mxu1 %v8310_v0 }
 0x10d   : > { %3386 = vmatprep.subr.bf16.mxu0 %v8307_v45 }
 0x10e   : > { %2364 = vmatmul.mubr.bf16.gmra.mrb[36].mxu1 %v9871_v51 }
 0x10f   : > { %3312 = vmatmul.mubr.bf16.gmra.mrb[36].mxu0 %v9599_v14  ;;  %4222 = vmatpush1.bf16.msra.mxu1 %v8308_v49  ;;  %v8322_v14 = vld [vmem:[%s11628_s1 + $0x944] ss:$8 sps:$4 sm:$0xff]   ;;  %v8359_v49 = vld [vmem:[%s11628_s1 + $0x8b0] ss:$8 sps:$4 sm:$0xff]  }
 0x110   : > { %3387 = vmatpush1.bf16.msra.mxu0 %v8305_v48  ;;  %4223 = vmatprep.subr.bf16.mxu1 %v8316_v7  ;;  %v10031_v48 = vld [vmem:[%s8986_s13 + $0x100] ss:$24 sps:$4 sm:$0xff]   ;;  %v8367_v7 = vld [vmem:[%s11628_s1 + $0x8c4] ss:$8 sps:$4 sm:$0xff]  }
 0x111   : > { %3388 = vmatprep.subr.bf16.mxu0 %v8313_v50  ;;  %2373 = vmatprep.mubr.bf16.mxu1 %v9888_v55  ;;  %v8362_v50 = vld [vmem:[%s11628_s1 + $0x9b0] ss:$8 sps:$4 sm:$0xff]  }
 0x112   : > { %3321 = vmatprep.mubr.bf16.mxu0 %v9616_v40  ;;  %v8328_v40 = vld [vmem:[%s11628_s1 + $0x954] ss:$8 sps:$4 sm:$0xff]  }
 0x113   : > { %4224 = vmatpush1.bf16.msra.mxu1 %v8314_v4 }
 0x114   : > { %3389 = vmatpush1.bf16.msra.mxu0 %v8311_v52  ;;  %4225 = vmatprep.subr.bf16.mxu1 %v8322_v14  ;;  %v10048_v52 = vld [vmem:[%s8986_s13 + $0x134] ss:$24 sps:$4 sm:$0xff]   ;;  %v8368_v14 = vld [vmem:[%s11628_s1 + $0x9c0] ss:$8 sps:$4 sm:$0xff]  }
 0x115   : > { %3390 = vmatprep.subr.bf16.mxu0 %v8319_v54  ;;  %v8365_v54 = vld [vmem:[%s11628_s1 + $0x8c0] ss:$8 sps:$4 sm:$0xff]  }
 0x116   : > { %2374 = vmatmul.mubr.bf16.gmra.mrb[40].mxu1 %v9905_v30 }
 0x117   : > { %3322 = vmatmul.mubr.bf16.gmra.mrb[40].mxu0 %v9633_v27  ;;  %4226 = vmatpush1.bf16.msra.mxu1 %v8320_v57  ;;  %v8334_v27 = vld [vmem:[%s11628_s1 + $0x964] ss:$8 sps:$4 sm:$0xff]   ;;  %v8373_v57 = vld [vmem:[%s11628_s1 + $0x8d4] ss:$8 sps:$4 sm:$0xff]  }
 0x118   : > { %3391 = vmatpush1.bf16.msra.mxu0 %v8317_v23  ;;  %4227 = vmatprep.subr.bf16.mxu1 %v8328_v40 }
 0x119   : > { %3392 = vmatprep.subr.bf16.mxu0 %v8325_v10  ;;  %2383 = vmatprep.mubr.bf16.mxu1 %v9922_v63  ;;  %v9926_v2 = vpop.f32.mrb[0].mxu1 }
 0x11a   : > { %3331 = vmatprep.mubr.bf16.mxu0 %v9650_v35  ;;  %v9934_v6 = vpop.f32.mrb[1].mxu1  ;;  %v8340_v35 = vld [vmem:[%s11628_s1 + $0x974] ss:$8 sps:$4 sm:$0xff]  }
 0x11b   : > { %4228 = vmatpush1.bf16.msra.mxu1 %v8326_v61  ;;  %v9939_v28 = vpop.f32.mrb[2].mxu1  ;;  %v8371_v61 = vld [vmem:[%s11628_s1 + $0x8d0] ss:$8 sps:$4 sm:$0xff]  }
 0x11c   : > { %3393 = vmatpush1.bf16.msra.mxu0 %v8323_v60  ;;  %4229 = vmatprep.subr.bf16.mxu1 %v8334_v27  ;;  %v9944_v11 = vpop.f32.mrb[3].mxu1  ;;  %v10073_v60 = vld [vmem:[%s8986_s13 + $0x130] ss:$24 sps:$4 sm:$0xff]   ;;  %v8379_v27 = vld [vmem:[%s11628_s1 + $0x8e4] ss:$8 sps:$4 sm:$0xff]  }
 0x11d   : > { %3394 = vmatprep.subr.bf16.mxu0 %v8331_v16  ;;  %v8374_v16 = vld [vmem:[%s11628_s1 + $0x9d0] ss:$8 sps:$4 sm:$0xff]  }
 0x11e   : > { %2384 = vmatmul.mubr.bf16.gmra.mrb[44].mxu1 %v9947_v12 }
 0x11f   : > { %3332 = vmatmul.mubr.bf16.gmra.mrb[44].mxu0 %v9667_v41  ;;  %4230 = vmatpush1.bf16.msra.mxu1 %v8332_v22  ;;  %v8346_v41 = vld [vmem:[%s11628_s1 + $0x984] ss:$8 sps:$4 sm:$0xff]  }
 0x120   : > { %3395 = vmatpush1.bf16.msra.mxu0 %v8329_v3  ;;  %4231 = vmatprep.subr.bf16.mxu1 %v8340_v35  ;;  %v10090_v3 = vld [vmem:[%s8986_s13 + $0x164] ss:$24 sps:$4 sm:$0xff]   ;;  %v8380_v35 = vld [vmem:[%s11628_s1 + $0x9e0] ss:$8 sps:$4 sm:$0xff]  }
 0x121   : > { %3396 = vmatprep.subr.bf16.mxu0 %v8337_v9  ;;  %2393 = vmatprep.mubr.bf16.mxu1 %v9964_v19  ;;  %v9968_v20 = vpop.f32.mrb[4].mxu1  ;;  %v8377_v9 = vld [vmem:[%s11628_s1 + $0x8e0] ss:$8 sps:$4 sm:$0xff]  }
 0x122   : > { %3341 = vmatprep.mubr.bf16.mxu0 %v9684_v47  ;;  %v9976_v26 = vpop.f32.mrb[5].mxu1  ;;  %v8352_v47 = vld [vmem:[%s11628_s1 + $0x994] ss:$8 sps:$4 sm:$0xff]  }
 0x123   : > { %4232 = vmatpush1.bf16.msra.mxu1 %v8338_v17  ;;  %v9981_v29 = vpop.f32.mrb[6].mxu1  ;;  %v8385_v17 = vld [vmem:[%s11628_s1 + $0x8f4] ss:$8 sps:$4 sm:$0xff]  }
 0x124   : > { %3397 = vmatpush1.bf16.msra.mxu0 %v8335_v34  ;;  %4233 = vmatprep.subr.bf16.mxu1 %v8346_v41  ;;  %v9986_v32 = vpop.f32.mrb[7].mxu1 }
 0x125   : > { %3398 = vmatprep.subr.bf16.mxu0 %v8343_v18 }
 0x126   : > { %2394 = vmatmul.mubr.bf16.gmra.mrb[48].mxu1 %v9989_v53 }
 0x127   : > { %3342 = vmatmul.mubr.bf16.gmra.mrb[48].mxu0 %v9701_v15  ;;  %4234 = vmatpush1.bf16.msra.mxu1 %v8344_v25  ;;  %v8358_v15 = vld [vmem:[%s11628_s1 + $0x9a4] ss:$8 sps:$4 sm:$0xff]   ;;  %v8383_v25 = vld [vmem:[%s11628_s1 + $0x8f0] ss:$8 sps:$4 sm:$0xff]  }
 0x128   : > { %3399 = vmatpush1.bf16.msra.mxu0 %v8341_v24  ;;  %4235 = vmatprep.subr.bf16.mxu1 %v8352_v47  ;;  %v10115_v24 = vld [vmem:[%s8986_s13 + $0x160] ss:$24 sps:$4 sm:$0xff]   ;;  %v8391_v47 = vld [vmem:[%s11628_s1 + $0xa04] ss:$8 sps:$4 sm:$0xff]  }
 0x129   : > { %3400 = vmatprep.subr.bf16.mxu0 %v8349_v46  ;;  %2403 = vmatprep.mubr.bf16.mxu1 %v10006_v38  ;;  %v10010_v39 = vpop.f32.mrb[8].mxu1  ;;  %v8386_v46 = vld [vmem:[%s11628_s1 + $0x9f0] ss:$8 sps:$4 sm:$0xff]  }
 0x12a   : > { %3351 = vmatprep.mubr.bf16.mxu0 %v9718_v56  ;;  %v10018_v43 = vpop.f32.mrb[9].mxu1  ;;  %v8364_v56 = vld [vmem:[%s11628_s1 + $0x9b4] ss:$8 sps:$4 sm:$0xff]  }
 0x12b   : > { %4236 = vmatpush1.bf16.msra.mxu1 %v8350_v36  ;;  %v10023_v45 = vpop.f32.mrb[10].mxu1 }
 0x12c   : > { %3401 = vmatpush1.bf16.msra.mxu0 %v8347_v33  ;;  %4237 = vmatprep.subr.bf16.mxu1 %v8358_v15  ;;  %v10028_v0 = vpop.f32.mrb[11].mxu1  ;;  %v10133_v33 = vld [vmem:[%s8986_s13 + $0x4] ss:$24 sps:$4 sm:$0xff]   ;;  %v8392_v15 = vld [vmem:[%s11628_s1 + $0xc00] ss:$8 sps:$4 sm:$0xff]  }
 0x12d   : > { %3402 = vmatprep.subr.bf16.mxu0 %v8355_v37  ;;  %v8389_v37 = vld [vmem:[%s11628_s1 + $0xa00] ss:$8 sps:$4 sm:$0xff]  }
 0x12e   : > { %2404 = vmatmul.mubr.bf16.gmra.mrb[52].mxu1 %v10031_v48 }
 0x12f   : > { %3352 = vmatmul.mubr.bf16.gmra.mrb[52].mxu0 %v9735_v62  ;;  %4238 = vmatpush1.bf16.msra.mxu1 %v8356_v58  ;;  %v8370_v62 = vld [vmem:[%s11628_s1 + $0x9c4] ss:$8 sps:$4 sm:$0xff]  }
 0x130   : > { %3403 = vmatpush1.bf16.msra.mxu0 %v8353_v42  ;;  %4239 = vmatprep.subr.bf16.mxu1 %v8364_v56 }
 0x131   : > { %3404 = vmatprep.subr.bf16.mxu0 %v8361_v44  ;;  %2413 = vmatprep.mubr.bf16.mxu1 %v10048_v52  ;;  %v10052_v4 = vpop.f32.mrb[12].mxu1  ;;  %v8400_v44 = vld [vmem:[%s11628_s1 + $0xc14] ss:$8 sps:$4 sm:$0xff]  }
 0x132   : > { %3361 = vmatprep.mubr.bf16.mxu0 %v9752_v5  ;;  %v10060_v23 = vpop.f32.mrb[13].mxu1  ;;  %v8376_v5 = vld [vmem:[%s11628_s1 + $0x9d4] ss:$8 sps:$4 sm:$0xff]  }
 0x133   : > { %4240 = vmatpush1.bf16.msra.mxu1 %v8362_v50  ;;  %v10065_v10 = vpop.f32.mrb[14].mxu1  ;;  %v8395_v50 = vld [vmem:[%s11628_s1 + $0xa10] ss:$8 sps:$4 sm:$0xff]  }
 0x134   : > { %3405 = vmatpush1.bf16.msra.mxu0 %v8359_v49  ;;  %4241 = vmatprep.subr.bf16.mxu1 %v8370_v62  ;;  %v10070_v40 = vpop.f32.mrb[15].mxu1  ;;  %v10158_v49 = vld [vmem:[%s8986_s13] ss:$24 sps:$4 sm:$0xff]   ;;  %v8403_v62 = vld [vmem:[%s11628_s1 + $0xa24] ss:$8 sps:$4 sm:$0xff]  }
 0x135   : > { %3406 = vmatprep.subr.bf16.mxu0 %v8367_v7  ;;  %v8398_v7 = vld [vmem:[%s11628_s1 + $0xc10] ss:$8 sps:$4 sm:$0xff]  }
 0x136   : > { %2414 = vmatmul.mubr.bf16.gmra.mrb[56].mxu1 %v10073_v60 }
 0x137   : > { %3362 = vmatmul.mubr.bf16.gmra.mrb[56].mxu0 %v9769_v13  ;;  %4242 = vmatpush1.bf16.msra.mxu1 %v8368_v14  ;;  %v8382_v13 = vld [vmem:[%s11628_s1 + $0x9e4] ss:$8 sps:$4 sm:$0xff]  }
 0x138   : > { %3407 = vmatpush1.bf16.msra.mxu0 %v8365_v54  ;;  %4243 = vmatprep.subr.bf16.mxu1 %v8376_v5  ;;  %v10175_v54 = vld [vmem:[%s8986_s13 + $0x34] ss:$24 sps:$4 sm:$0xff]   ;;  %v8404_v5 = vld [vmem:[%s11628_s1 + $0xc20] ss:$8 sps:$4 sm:$0xff]  }
 0x139   : > { %3408 = vmatprep.subr.bf16.mxu0 %v8373_v57  ;;  %2423 = vmatprep.mubr.bf16.mxu1 %v10090_v3  ;;  %v10094_v22 = vpop.f32.mrb[16].mxu1  ;;  %v8401_v57 = vld [vmem:[%s11628_s1 + $0xa20] ss:$8 sps:$4 sm:$0xff]  }
 0x13a   : > { %3371 = vmatprep.mubr.bf16.mxu0 %v9786_v21  ;;  %v10102_v34 = vpop.f32.mrb[17].mxu1  ;;  %v8388_v21 = vld [vmem:[%s11628_s1 + $0x9f4] ss:$8 sps:$4 sm:$0xff]  }
 0x13b   : > { %4244 = vmatpush1.bf16.msra.mxu1 %v8374_v16  ;;  %v10107_v18 = vpop.f32.mrb[18].mxu1 }
 0x13c   : > { %3409 = vmatpush1.bf16.msra.mxu0 %v8371_v61  ;;  %4245 = vmatprep.subr.bf16.mxu1 %v8382_v13  ;;  %v10112_v41 = vpop.f32.mrb[19].mxu1 }
 0x13d   : > { %3410 = vmatprep.subr.bf16.mxu0 %v8379_v27  ;;  %v8412_v27 = vld [vmem:[%s11628_s1 + $0xc34] ss:$8 sps:$4 sm:$0xff]  }
 0x13e   : > { %2424 = vmatmul.mubr.bf16.gmra.mrb[60].mxu1 %v10115_v24 }
 0x13f   : > { %3372 = vmatmul.mubr.bf16.gmra.mrb[60].mxu0 %v9803_v31  ;;  %4246 = vmatpush1.bf16.msra.mxu1 %v8380_v35  ;;  %v8394_v31 = vld [vmem:[%s11628_s1 + $0xc04] ss:$8 sps:$4 sm:$0xff]   ;;  %v8407_v35 = vld [vmem:[%s11628_s1 + $0xa30] ss:$8 sps:$4 sm:$0xff]  }
 0x140   : > { %3411 = vmatpush1.bf16.msra.mxu0 %v8377_v9  ;;  %4247 = vmatprep.subr.bf16.mxu1 %v8388_v21  ;;  %v10200_v9 = vld [vmem:[%s8986_s13 + $0x30] ss:$24 sps:$4 sm:$0xff]   ;;  %v8415_v21 = vld [vmem:[%s11628_s1 + $0xa44] ss:$8 sps:$4 sm:$0xff]  }
 0x141   : > { %3412 = vmatprep.subr.bf16.mxu0 %v8385_v17  ;;  %3414 = vmatprep.mubr.bf16.mxu0 %v9820_v59  ;;  %v10136_v36 = vpop.f32.mrb[20].mxu1  ;;  %v8397_v59 = vld [vmem:[%s11628_s1 + $0xa14] ss:$8 sps:$4 sm:$0xff]   ;;  %v8410_v17 = vld [vmem:[%s11628_s1 + $0xc30] ss:$8 sps:$4 sm:$0xff]  }
 0x142   : > { %4249 = vmatprep.mubr.bf16.mxu1 %v10133_v33  ;;  %v10144_v42 = vpop.f32.mrb[21].mxu1 }
 0x143   : > { %4248 = vmatpush1.bf16.msra.mxu1 %v8386_v46  ;;  %v10149_v58 = vpop.f32.mrb[22].mxu1  ;;  %v8413_v46 = vld [vmem:[%s11628_s1 + $0xa40] ss:$8 sps:$4 sm:$0xff]  }
 0x144   : > { %3413 = vmatpush1.bf16.msra.mxu0 %v8383_v25  ;;  %4330 = vmatprep.subr.bf16.mxu1 %v8391_v47  ;;  %v10154_v56 = vpop.f32.mrb[23].mxu1  ;;  %v10217_v25 = vld [vmem:[%s8986_s13 + $0x64] ss:$24 sps:$4 sm:$0xff]  }
 0x145   : > { %5278 = vmatprep.subr.bf16.mxu0 %v8394_v31  ;;  %v8416_v31 = vld [vmem:[%s11628_s1 + $0xc40] ss:$8 sps:$4 sm:$0xff]  }
 0x146   : > { %4250 = vmatmul.mubr.bf16.vlgmr.msra.gmra.mrb[64].mxu1 %v10158_v49 }
 0x147   : > { %3415 = vmatmul.mubr.bf16.vlgmr.msra.gmra.mrb[32].mxu0 %v9837_v1  ;;  %4331 = vmatpush1.bf16.msra.mxu1 %v8389_v37  ;;  %v8406_v1 = vld [vmem:[%s11628_s1 + $0xc24] ss:$8 sps:$4 sm:$0xff]   ;;  %v8421_v37 = vld [vmem:[%s11628_s1 + $0xa54] ss:$8 sps:$4 sm:$0xff]  }
 0x148   : > { %5279 = vmatpush1.bf16.msra.mxu0 %v8392_v15  ;;  %4332 = vmatprep.subr.bf16.mxu1 %v8397_v59  ;;  %v8424_v59 = vld [vmem:[%s11628_s1 + $0xc54] ss:$8 sps:$4 sm:$0xff]  }
 0x149   : > { %5280 = vmatprep.subr.bf16.mxu0 %v8400_v44  ;;  %3424 = vmatprep.mubr.bf16.mxu0 %v9854_v8  ;;  %v10178_v14 = vpop.f32.mrb[24].mxu1  ;;  %v8409_v8 = vld [vmem:[%s11628_s1 + $0xa34] ss:$8 sps:$4 sm:$0xff]  }
 0x14a   : > { %4259 = vmatprep.mubr.bf16.mxu1 %v10175_v54  ;;  %v10186_v61 = vpop.f32.mrb[25].mxu1 }
 0x14b   : > { %4333 = vmatpush1.bf16.msra.mxu1 %v8395_v50  ;;  %v10191_v16 = vpop.f32.mrb[26].mxu1  ;;  %v8419_v50 = vld [vmem:[%s11628_s1 + $0xa50] ss:$8 sps:$4 sm:$0xff]  }
 0x14c   : > { %5281 = vmatpush1.bf16.msra.mxu0 %v8398_v7  ;;  %4334 = vmatprep.subr.bf16.mxu1 %v8403_v62  ;;  %v10196_v13 = vpop.f32.mrb[27].mxu1  ;;  %v8422_v7 = vld [vmem:[%s11628_s1 + $0xc50] ss:$8 sps:$4 sm:$0xff]  }
 0x14d   : > { %5282 = vmatprep.subr.bf16.mxu0 %v8406_v1  ;;  %v10248_v62 = vld [vmem:[%s8986_s13 + $0x60] ss:$24 sps:$4 sm:$0xff]   ;;  %v8427_v1 = vld [vmem:[%s11628_s1 + $0xa64] ss:$8 sps:$4 sm:$0xff]  }
 0x14e   : > { %4260 = vmatmul.mubr.bf16.gmra.mrb[68].mxu1 %v10200_v9 }
 0x14f   : > { %3425 = vmatmul.mubr.bf16.gmra.mrb[36].mxu0 %v9871_v51  ;;  %4335 = vmatpush1.bf16.msra.mxu1 %v8401_v57  ;;  %v8418_v51 = vld [vmem:[%s11628_s1 + $0xc44] ss:$8 sps:$4 sm:$0xff]  }
 0x150   : > { %5283 = vmatpush1.bf16.msra.mxu0 %v8404_v5  ;;  %4336 = vmatprep.subr.bf16.mxu1 %v8409_v8  ;;  %v8430_v57 = vld [vmem:[%s11628_s1 + $0xc64] ss:$8 sps:$4 sm:$0xff]   ;;  %v8425_v8 = vld [vmem:[%s11628_s1 + $0xa60] ss:$8 sps:$4 sm:$0xff]  }
 0x151   : > { %5284 = vmatprep.subr.bf16.mxu0 %v8412_v27  ;;  %3434 = vmatprep.mubr.bf16.mxu0 %v9888_v55  ;;  %v10223_v47 = vpop.f32.mrb[28].mxu1  ;;  %v8428_v27 = vld [vmem:[%s11628_s1 + $0xc60] ss:$8 sps:$4 sm:$0xff]  }
 0x152   : > { %4269 = vmatprep.mubr.bf16.mxu1 %v10217_v25  ;;  %v10231_v55 = vpop.f32.mrb[29].mxu1 }
 0x153   : > { %4337 = vmatpush1.bf16.msra.mxu1 %v8407_v35  ;;  %v10233_v15 = vpop.f32.mrb[30].mxu1 }
 0x154   : > { %5285 = vmatpush1.bf16.msra.mxu0 %v8410_v17  ;;  %4338 = vmatprep.subr.bf16.mxu1 %v8415_v21  ;;  %v10238_v44 = vpop.f32.mrb[31].mxu1 }
 0x155   : > { %5286 = vmatprep.subr.bf16.mxu0 %v8418_v51 }
 0x156   : > { %4270 = vmatmul.mubr.bf16.gmra.mrb[72].mxu1 %v10248_v62 }
 0x157   : > { %3435 = vmatmul.mubr.bf16.gmra.mrb[40].mxu0 %v9905_v30  ;;  %4339 = vmatpush1.bf16.msra.mxu1 %v8413_v46  ;;  %v10259_v30 = vld [vmem:[%s8986_s13 + $0x94] ss:$24 sps:$4 sm:$0xff]  }
 0x158   : > { %5287 = vmatpush1.bf16.msra.mxu0 %v8416_v31  ;;  %4340 = vmatprep.subr.bf16.mxu1 %v8421_v37 }
 0x159   : > { %5288 = vmatprep.subr.bf16.mxu0 %v8424_v59  ;;  %3444 = vmatprep.mubr.bf16.mxu0 %v9922_v63  ;;  %v8433_v63 = vld [vmem:[%s11628_s1 + $0xa74] ss:$8 sps:$4 sm:$0xff]   ;;  %v10294_v59 = vld [vmem:[%s8986_s13 + $0x90] ss:$24 sps:$4 sm:$0xff]  }
 0x15a   : > { %v1407_v5 = vpop.f32.mrb[0].mxu0  ;;  %4279 = vmatprep.mubr.bf16.mxu1 %v10259_v30 }
 0x15b   : > { %v10269_v35 = vadd.f32 %v1407_v5, %v9926_v2  ;;  %v1409_v17 = vpop.f32.mrb[1].mxu0  ;;  %4341 = vmatpush1.bf16.msra.mxu1 %v8419_v50  ;;  %v8436_v2 = vld [vmem:[%s11628_s1 + $0xc74] ss:$8 sps:$4 sm:$0xff]   ;;  %v8439_v50 = vld [vmem:[%s11628_s1 + $0xa84] ss:$8 sps:$4 sm:$0xff]  }
 0x15c   : > { %v10275_v21 = vadd.f32 %v1409_v17, %v9934_v6  ;;  %v1411_v51 = vpop.f32.mrb[2].mxu0  ;;  %5289 = vmatpush1.bf16.msra.mxu0 %v8422_v7  ;;  %4342 = vmatprep.subr.bf16.mxu1 %v8427_v1  ;;  %v8431_v6 = vld [vmem:[%s11628_s1 + $0xa70] ss:$8 sps:$4 sm:$0xff]   ;;  %v8437_v1 = vld [vmem:[%s11628_s1 + $0xa80] ss:$8 sps:$4 sm:$0xff]  }
 0x15d   : > { %v10278_v46 = vadd.f32 %v1411_v51, %v9939_v28  ;;  %v1413_v31 = vpop.f32.mrb[3].mxu0  ;;  %5290 = vmatprep.subr.bf16.mxu0 %v8430_v57  ;;  %v8434_v28 = vld [vmem:[%s11628_s1 + $0xc70] ss:$8 sps:$4 sm:$0xff]   ;;  %v8440_v57 = vld [vmem:[%s11628_s1 + $0xc80] ss:$8 sps:$4 sm:$0xff]  }
 0x15e   : > { %v10284_v37 = vadd.f32 %v1413_v31, %v9944_v11  ;;  %4280 = vmatmul.mubr.bf16.gmra.mrb[76].mxu1 %v10294_v59  ;;  %v8442_v11 = vld [vmem:[%s11628_s1 + $0xc84] ss:$8 sps:$4 sm:$0xff]  }
 0x15f   : > { %3445 = vmatmul.mubr.bf16.gmra.mrb[44].mxu0 %v9947_v12  ;;  %4343 = vmatpush1.bf16.msra.mxu1 %v8425_v8  ;;  %v10305_v12 = vld [vmem:[%s8986_s13 + $0xc4] ss:$24 sps:$4 sm:$0xff]  }
 0x160   : > { %5291 = vmatpush1.bf16.msra.mxu0 %v8428_v27  ;;  %4344 = vmatprep.subr.bf16.mxu1 %v8433_v63 }
 0x161   : > { %5292 = vmatprep.subr.bf16.mxu0 %v8436_v2  ;;  %3454 = vmatprep.mubr.bf16.mxu0 %v9964_v19  ;;  %v8445_v19 = vld [vmem:[%s11628_s1 + $0xa94] ss:$8 sps:$4 sm:$0xff]   ;;  %v10340_v2 = vld [vmem:[%s8986_s13 + $0xc0] ss:$24 sps:$4 sm:$0xff]  }
 0x162   : > { %v1417_v7 = vpop.f32.mrb[4].mxu0  ;;  %4289 = vmatprep.mubr.bf16.mxu1 %v10305_v12 }
 0x163   : > { %v10315_v5 = vadd.f32 %v1417_v7, %v9968_v20  ;;  %v1419_v8 = vpop.f32.mrb[5].mxu0  ;;  %4345 = vmatpush1.bf16.msra.mxu1 %v8431_v6  ;;  %v8448_v20 = vld [vmem:[%s11628_s1 + $0xc94] ss:$8 sps:$4 sm:$0xff]   ;;  %v8451_v6 = vld [vmem:[%s11628_s1 + $0xaa4] ss:$8 sps:$4 sm:$0xff]  }
 0x164   : > { %v10321_v27 = vadd.f32 %v1419_v8, %v9976_v26  ;;  %v1421_v17 = vpop.f32.mrb[6].mxu0  ;;  %5293 = vmatpush1.bf16.msra.mxu0 %v8434_v28  ;;  %4346 = vmatprep.subr.bf16.mxu1 %v8439_v50  ;;  %v8443_v26 = vld [vmem:[%s11628_s1 + $0xa90] ss:$8 sps:$4 sm:$0xff]   ;;  %v8449_v50 = vld [vmem:[%s11628_s1 + $0xaa0] ss:$8 sps:$4 sm:$0xff]  }
 0x165   : > { %v10324_v63 = vadd.f32 %v1421_v17, %v9981_v29  ;;  %v1423_v51 = vpop.f32.mrb[7].mxu0  ;;  %5294 = vmatprep.subr.bf16.mxu0 %v8442_v11  ;;  %v8446_v29 = vld [vmem:[%s11628_s1 + $0xc90] ss:$8 sps:$4 sm:$0xff]   ;;  %v8452_v11 = vld [vmem:[%s11628_s1 + $0xca0] ss:$8 sps:$4 sm:$0xff]  }
 0x166   : > { %v10330_v31 = vadd.f32 %v1423_v51, %v9986_v32  ;;  %4290 = vmatmul.mubr.bf16.gmra.mrb[80].mxu1 %v10340_v2  ;;  %v8454_v32 = vld [vmem:[%s11628_s1 + $0xca4] ss:$8 sps:$4 sm:$0xff]  }
 0x167   : > { %3455 = vmatmul.mubr.bf16.gmra.mrb[48].mxu0 %v9989_v53  ;;  %4347 = vmatpush1.bf16.msra.mxu1 %v8437_v1  ;;  %v10351_v53 = vld [vmem:[%s8986_s13 + $0xf4] ss:$24 sps:$4 sm:$0xff]  }
 0x168   : > { %5295 = vmatpush1.bf16.msra.mxu0 %v8440_v57  ;;  %4348 = vmatprep.subr.bf16.mxu1 %v8445_v19 }
 0x169   : > { %5296 = vmatprep.subr.bf16.mxu0 %v8448_v20  ;;  %3464 = vmatprep.mubr.bf16.mxu0 %v10006_v38  ;;  %v8457_v38 = vld [vmem:[%s11628_s1 + $0xab4] ss:$8 sps:$4 sm:$0xff]   ;;  %v10386_v20 = vld [vmem:[%s8986_s13 + $0xf0] ss:$24 sps:$4 sm:$0xff]  }
 0x16a   : > { %v1427_v28 = vpop.f32.mrb[8].mxu0  ;;  %4299 = vmatprep.mubr.bf16.mxu1 %v10351_v53 }
 0x16b   : > { %v10361_v7 = vadd.f32 %v1427_v28, %v10010_v39  ;;  %v1429_v1 = vpop.f32.mrb[9].mxu0  ;;  %4349 = vmatpush1.bf16.msra.mxu1 %v8443_v26  ;;  %v8460_v39 = vld [vmem:[%s11628_s1 + $0xcb4] ss:$8 sps:$4 sm:$0xff]   ;;  %v8463_v26 = vld [vmem:[%s11628_s1 + $0xac4] ss:$8 sps:$4 sm:$0xff]  }
 0x16c   : > { %v10367_v57 = vadd.f32 %v1429_v1, %v10018_v43  ;;  %v1431_v8 = vpop.f32.mrb[10].mxu0  ;;  %5297 = vmatpush1.bf16.msra.mxu0 %v8446_v29  ;;  %4350 = vmatprep.subr.bf16.mxu1 %v8451_v6  ;;  %v8455_v43 = vld [vmem:[%s11628_s1 + $0xab0] ss:$8 sps:$4 sm:$0xff]   ;;  %v8461_v6 = vld [vmem:[%s11628_s1 + $0xac0] ss:$8 sps:$4 sm:$0xff]  }
 0x16d   : > { %v10370_v19 = vadd.f32 %v1431_v8, %v10023_v45  ;;  %v1433_v17 = vpop.f32.mrb[11].mxu0  ;;  %5298 = vmatprep.subr.bf16.mxu0 %v8454_v32  ;;  %v8458_v45 = vld [vmem:[%s11628_s1 + $0xcb0] ss:$8 sps:$4 sm:$0xff]   ;;  %v8464_v32 = vld [vmem:[%s11628_s1 + $0xcc0] ss:$8 sps:$4 sm:$0xff]  }
 0x16e   : > { %v10376_v51 = vadd.f32 %v1433_v17, %v10028_v0  ;;  %4300 = vmatmul.mubr.bf16.gmra.mrb[84].mxu1 %v10386_v20  ;;  %v8466_v0 = vld [vmem:[%s11628_s1 + $0xcc4] ss:$8 sps:$4 sm:$0xff]  }
 0x16f   : > { %3465 = vmatmul.mubr.bf16.gmra.mrb[52].mxu0 %v10031_v48  ;;  %4351 = vmatpush1.bf16.msra.mxu1 %v8449_v50  ;;  %v10397_v48 = vld [vmem:[%s8986_s13 + $0x124] ss:$24 sps:$4 sm:$0xff]  }
 0x170   : > { %5299 = vmatpush1.bf16.msra.mxu0 %v8452_v11  ;;  %4352 = vmatprep.subr.bf16.mxu1 %v8457_v38 }
 0x171   : > { %5300 = vmatprep.subr.bf16.mxu0 %v8460_v39  ;;  %3474 = vmatprep.mubr.bf16.mxu0 %v10048_v52  ;;  %v8469_v52 = vld [vmem:[%s11628_s1 + $0xad4] ss:$8 sps:$4 sm:$0xff]   ;;  %v10432_v39 = vld [vmem:[%s8986_s13 + $0x120] ss:$24 sps:$4 sm:$0xff]  }
 0x172   : > { %v1437_v29 = vpop.f32.mrb[12].mxu0  ;;  %4309 = vmatprep.mubr.bf16.mxu1 %v10397_v48 }
 0x173   : > { %v10407_v28 = vadd.f32 %v1437_v29, %v10052_v4  ;;  %v1439_v50 = vpop.f32.mrb[13].mxu0  ;;  %4353 = vmatpush1.bf16.msra.mxu1 %v8455_v43  ;;  %v8472_v4 = vld [vmem:[%s11628_s1 + $0xcd4] ss:$8 sps:$4 sm:$0xff]   ;;  %v8475_v43 = vld [vmem:[%s11628_s1 + $0xae4] ss:$8 sps:$4 sm:$0xff]  }
 0x174   : > { %v10413_v11 = vadd.f32 %v1439_v50, %v10060_v23  ;;  %v1441_v1 = vpop.f32.mrb[14].mxu0  ;;  %5301 = vmatpush1.bf16.msra.mxu0 %v8458_v45  ;;  %4354 = vmatprep.subr.bf16.mxu1 %v8463_v26  ;;  %v8467_v23 = vld [vmem:[%s11628_s1 + $0xad0] ss:$8 sps:$4 sm:$0xff]  }
 0x175   : > { %v10416_v38 = vadd.f32 %v1441_v1, %v10065_v10  ;;  %v1443_v8 = vpop.f32.mrb[15].mxu0  ;;  %5302 = vmatprep.subr.bf16.mxu0 %v8466_v0  ;;  %v8470_v10 = vld [vmem:[%s11628_s1 + $0xcd0] ss:$8 sps:$4 sm:$0xff]  }
 0x176   : > { %v10422_v17 = vadd.f32 %v1443_v8, %v10070_v40  ;;  %4310 = vmatmul.mubr.bf16.gmra.mrb[88].mxu1 %v10432_v39  ;;  %v8478_v40 = vld [vmem:[%s11628_s1 + $0xce4] ss:$8 sps:$4 sm:$0xff]   ;;  %v10472_v8 = vld [vmem:[%s8986_s13 + $0x150] ss:$24 sps:$4 sm:$0xff]  }
 0x177   : > { %3475 = vmatmul.mubr.bf16.gmra.mrb[56].mxu0 %v10073_v60  ;;  %4355 = vmatpush1.bf16.msra.mxu1 %v8461_v6  ;;  %v10443_v60 = vld [vmem:[%s8986_s13 + $0x154] ss:$24 sps:$4 sm:$0xff]  }
 0x178   : > { %5303 = vmatpush1.bf16.msra.mxu0 %v8464_v32  ;;  %4356 = vmatprep.subr.bf16.mxu1 %v8469_v52  ;;  %v8473_v32 = vld [vmem:[%s11628_s1 + $0xae0] ss:$8 sps:$4 sm:$0xff]   ;;  %v8484_v52 = vld [vmem:[%s11628_s1 + $0xcf4] ss:$8 sps:$4 sm:$0xff]  }
 0x179   : > { %5304 = vmatprep.subr.bf16.mxu0 %v8472_v4  ;;  %3484 = vmatprep.mubr.bf16.mxu0 %v10090_v3  ;;  %v8476_v3 = vld [vmem:[%s11628_s1 + $0xce0] ss:$8 sps:$4 sm:$0xff]   ;;  %v8482_v4 = vld [vmem:[%s11628_s1 + $0xcf0] ss:$8 sps:$4 sm:$0xff]  }
 0x17a   : > { %v1447_v45 = vpop.f32.mrb[16].mxu0  ;;  %4319 = vmatprep.mubr.bf16.mxu1 %v10443_v60 }
 0x17b   : > { %v10447_v26 = vadd.f32 %v1447_v45, %v10094_v22  ;;  %v1449_v0 = vpop.f32.mrb[17].mxu0  ;;  %4357 = vmatpush1.bf16.msra.mxu1 %v8467_v23 }
 0x17c   : > { %v10450_v29 = vadd.f32 %v1449_v0, %v10102_v34  ;;  %v1451_v6 = vpop.f32.mrb[18].mxu0  ;;  %5305 = vmatpush1.bf16.msra.mxu0 %v8470_v10  ;;  %4358 = vmatprep.subr.bf16.mxu1 %v8475_v43  ;;  %v8481_v34 = vld [vmem:[%s11628_s1 + $0xaf4] ss:$8 sps:$4 sm:$0xff]   ;;  %v10488_v10 = vld [vmem:[%s8986_s13 + $0xc] ss:$24 sps:$4 sm:$0xff]  }
 0x17d   : > { %v10459_v50 = vadd.f32 %v1451_v6, %v10107_v18  ;;  %v1453_v22 = vpop.f32.mrb[19].mxu0  ;;  %5306 = vmatprep.subr.bf16.mxu0 %v8478_v40  ;;  %v8479_v18 = vld [vmem:[%s11628_s1 + $0xaf0] ss:$8 sps:$4 sm:$0xff]   ;;  %v8485_v6 = vld [vmem:[%s11628_s1 + $0xb00] ss:$8 sps:$4 sm:$0xff]  }
 0x17e   : > { %v10468_v1 = vadd.f32 %v1453_v22, %v10112_v41  ;;  %4320 = vmatmul.mubr.bf16.gmra.mrb[92].mxu1 %v10472_v8  ;;  %v8487_v41 = vld [vmem:[%s11628_s1 + $0xb04] ss:$8 sps:$4 sm:$0xff]  }
 0x17f   : > { %3485 = vmatmul.mubr.bf16.gmra.mrb[60].mxu0 %v10115_v24  ;;  %4359 = vmatpush1.bf16.msra.mxu1 %v8473_v32  ;;  %v8490_v24 = vld [vmem:[%s11628_s1 + $0xd04] ss:$8 sps:$4 sm:$0xff]   ;;  %v8488_v32 = vld [vmem:[%s11628_s1 + $0xd00] ss:$8 sps:$4 sm:$0xff]  }
 0x180   : > { %5307 = vmatpush1.bf16.msra.mxu0 %v8476_v3  ;;  %4360 = vmatprep.subr.bf16.mxu1 %v8481_v34  ;;  %v8496_v3 = vld [vmem:[%s11628_s1 + $0xd14] ss:$8 sps:$4 sm:$0xff]   ;;  %v10517_v34 = vld [vmem:[%s8986_s13 + $0x8] ss:$24 sps:$4 sm:$0xff]  }
 0x181   : > { %5308 = vmatprep.subr.bf16.mxu0 %v8484_v52  ;;  %4362 = vmatprep.mubr.bf16.mxu1 %v10488_v10  ;;  %v8494_v52 = vld [vmem:[%s11628_s1 + $0xd10] ss:$8 sps:$4 sm:$0xff]  }
 0x182   : > { %v1457_v23 = vpop.f32.mrb[20].mxu0  ;;  %5310 = vmatprep.mubr.bf16.mxu0 %v10133_v33 }
 0x183   : > { %v10493_v43 = vadd.f32 %v1457_v23, %v10136_v36  ;;  %v1459_v40 = vpop.f32.mrb[21].mxu0  ;;  %4361 = vmatpush1.bf16.msra.mxu1 %v8479_v18 }
 0x184   : > { %v10496_v45 = vadd.f32 %v1459_v40, %v10144_v42  ;;  %v1461_v0 = vpop.f32.mrb[22].mxu0  ;;  %5309 = vmatpush1.bf16.msra.mxu0 %v8482_v4  ;;  %4443 = vmatprep.subr.bf16.mxu1 %v8487_v41  ;;  %v8493_v42 = vld [vmem:[%s11628_s1 + $0xb14] ss:$8 sps:$4 sm:$0xff]  }
 0x185   : > { %v10505_v33 = vadd.f32 %v1461_v0, %v10149_v58  ;;  %v1463_v36 = vpop.f32.mrb[23].mxu0  ;;  %5391 = vmatprep.subr.bf16.mxu0 %v8490_v24  ;;  %v8491_v58 = vld [vmem:[%s11628_s1 + $0xb10] ss:$8 sps:$4 sm:$0xff]   ;;  %v10534_v4 = vld [vmem:[%s8986_s13 + $0x3c] ss:$24 sps:$4 sm:$0xff]  }
 0x186   : > { %v10514_v22 = vadd.f32 %v1463_v36, %v10154_v56  ;;  %4363 = vmatmul.mubr.bf16.vlgmr.msra.gmra.mrb[64].mxu1 %v10517_v34  ;;  %v8499_v56 = vld [vmem:[%s11628_s1 + $0xb24] ss:$8 sps:$4 sm:$0xff]   ;;  %v8497_v0 = vld [vmem:[%s11628_s1 + $0xb20] ss:$8 sps:$4 sm:$0xff]  }
 0x187   : > { %5311 = vmatmul.mubr.bf16.vlgmr.msra.gmra.mrb[64].mxu0 %v10158_v49  ;;  %4444 = vmatpush1.bf16.msra.mxu1 %v8485_v6  ;;  %v8502_v49 = vld [vmem:[%s11628_s1 + $0xd24] ss:$8 sps:$4 sm:$0xff]   ;;  %v8500_v6 = vld [vmem:[%s11628_s1 + $0xd20] ss:$8 sps:$4 sm:$0xff]  }
 0x188   : > { %5392 = vmatpush1.bf16.msra.mxu0 %v8488_v32  ;;  %4445 = vmatprep.subr.bf16.mxu1 %v8493_v42  ;;  %v8508_v32 = vld [vmem:[%s11628_s1 + $0xd34] ss:$8 sps:$4 sm:$0xff]   ;;  %v10563_v42 = vld [vmem:[%s8986_s13 + $0x38] ss:$24 sps:$4 sm:$0xff]  }
 0x189   : > { %5393 = vmatprep.subr.bf16.mxu0 %v8496_v3  ;;  %4372 = vmatprep.mubr.bf16.mxu1 %v10534_v4  ;;  %v8506_v3 = vld [vmem:[%s11628_s1 + $0xd30] ss:$8 sps:$4 sm:$0xff]  }
 0x18a   : > { %v1467_v18 = vpop.f32.mrb[24].mxu0  ;;  %5320 = vmatprep.mubr.bf16.mxu0 %v10175_v54 }
 0x18b   : > { %v10539_v41 = vadd.f32 %v1467_v18, %v10178_v14  ;;  %v1469_v24 = vpop.f32.mrb[25].mxu0  ;;  %4446 = vmatpush1.bf16.msra.mxu1 %v8491_v58 }
 0x18c   : > { %v10542_v23 = vadd.f32 %v1469_v24, %v10186_v61  ;;  %v1471_v40 = vpop.f32.mrb[26].mxu0  ;;  %5394 = vmatpush1.bf16.msra.mxu0 %v8494_v52  ;;  %4447 = vmatprep.subr.bf16.mxu1 %v8499_v56  ;;  %v8505_v61 = vld [vmem:[%s11628_s1 + $0xb34] ss:$8 sps:$4 sm:$0xff]   ;;  %v10580_v52 = vld [vmem:[%s8986_s13 + $0x6c] ss:$24 sps:$4 sm:$0xff]  }
 0x18d   : > { %v10551_v54 = vadd.f32 %v1471_v40, %v10191_v16  ;;  %v1473_v14 = vpop.f32.mrb[27].mxu0  ;;  %5395 = vmatprep.subr.bf16.mxu0 %v8502_v49  ;;  %v8503_v16 = vld [vmem:[%s11628_s1 + $0xb30] ss:$8 sps:$4 sm:$0xff]   ;;  %v8509_v40 = vld [vmem:[%s11628_s1 + $0xb40] ss:$8 sps:$4 sm:$0xff]  }
 0x18e   : > { %v10560_v36 = vadd.f32 %v1473_v14, %v10196_v13  ;;  %4373 = vmatmul.mubr.bf16.gmra.mrb[68].mxu1 %v10563_v42  ;;  %v8511_v13 = vld [vmem:[%s11628_s1 + $0xb44] ss:$8 sps:$4 sm:$0xff]  }
 0x18f   : > { %5321 = vmatmul.mubr.bf16.gmra.mrb[68].mxu0 %v10200_v9  ;;  %4448 = vmatpush1.bf16.msra.mxu1 %v8497_v0  ;;  %v8514_v9 = vld [vmem:[%s11628_s1 + $0xd44] ss:$8 sps:$4 sm:$0xff]   ;;  %v8512_v0 = vld [vmem:[%s11628_s1 + $0xd40] ss:$8 sps:$4 sm:$0xff]  }
 0x190   : > { %5396 = vmatpush1.bf16.msra.mxu0 %v8500_v6  ;;  %4449 = vmatprep.subr.bf16.mxu1 %v8505_v61  ;;  %v8520_v6 = vld [vmem:[%s11628_s1 + $0xd54] ss:$8 sps:$4 sm:$0xff]   ;;  %v10609_v61 = vld [vmem:[%s8986_s13 + $0x68] ss:$24 sps:$4 sm:$0xff]  }
 0x191   : > { %5397 = vmatprep.subr.bf16.mxu0 %v8508_v32  ;;  %4382 = vmatprep.mubr.bf16.mxu1 %v10580_v52  ;;  %v8518_v32 = vld [vmem:[%s11628_s1 + $0xd50] ss:$8 sps:$4 sm:$0xff]  }
 0x192   : > { %v1477_v58 = vpop.f32.mrb[28].mxu0  ;;  %5330 = vmatprep.mubr.bf16.mxu0 %v10217_v25 }
 0x193   : > { %v10585_v56 = vadd.f32 %v1477_v58, %v10223_v47  ;;  %v1479_v49 = vpop.f32.mrb[29].mxu0  ;;  %4450 = vmatpush1.bf16.msra.mxu1 %v8503_v16  ;;  %v10626_v16 = vld [vmem:[%s8986_s13 + $0x9c] ss:$24 sps:$4 sm:$0xff]   ;;  %v10643_v58 = vld [vmem:[%s8986_s13 + $0x98] ss:$24 sps:$4 sm:$0xff]  }
 0x194   : > { %v10588_v18 = vadd.f32 %v1479_v49, %v10231_v55  ;;  %v1481_v24 = vpop.f32.mrb[30].mxu0  ;;  %5398 = vmatpush1.bf16.msra.mxu0 %v8506_v3  ;;  %4451 = vmatprep.subr.bf16.mxu1 %v8511_v13  ;;  %v8517_v55 = vld [vmem:[%s11628_s1 + $0xb54] ss:$8 sps:$4 sm:$0xff]   ;;  %v8521_v3 = vld [vmem:[%s11628_s1 + $0xb60] ss:$8 sps:$4 sm:$0xff]  }
 0x195   : > { %v10597_v25 = vadd.f32 %v1481_v24, %v10233_v15  ;;  %v1483_v47 = vpop.f32.mrb[31].mxu0  ;;  %5399 = vmatprep.subr.bf16.mxu0 %v8514_v9  ;;  %v8515_v15 = vld [vmem:[%s11628_s1 + $0xb50] ss:$8 sps:$4 sm:$0xff]   ;;  %v8524_v13 = vld [vmem:[%s11628_s1 + $0xd60] ss:$8 sps:$4 sm:$0xff]  }
 0x196   : > { %v10606_v14 = vadd.f32 %v1483_v47, %v10238_v44  ;;  %4383 = vmatmul.mubr.bf16.gmra.mrb[72].mxu1 %v10609_v61  ;;  %v8523_v44 = vld [vmem:[%s11628_s1 + $0xb64] ss:$8 sps:$4 sm:$0xff]   ;;  %v8529_v9 = vld [vmem:[%s11628_s1 + $0xb74] ss:$8 sps:$4 sm:$0xff]   ;;  %v8527_v49 = vld [vmem:[%s11628_s1 + $0xb70] ss:$8 sps:$4 sm:$0xff]  }
 0x197   : > { %5331 = vmatmul.mubr.bf16.gmra.mrb[72].mxu0 %v10248_v62  ;;  %4452 = vmatpush1.bf16.msra.mxu1 %v8509_v40  ;;  %v8526_v62 = vld [vmem:[%s11628_s1 + $0xd64] ss:$8 sps:$4 sm:$0xff]   ;;  %v8530_v24 = vld [vmem:[%s11628_s1 + $0xd70] ss:$8 sps:$4 sm:$0xff]   ;;  %v8533_v47 = vld [vmem:[%s11628_s1 + $0xb80] ss:$8 sps:$4 sm:$0xff]  }
 0x198   : > { %5400 = vmatpush1.bf16.msra.mxu0 %v8512_v0  ;;  %4453 = vmatprep.subr.bf16.mxu1 %v8517_v55  ;;  %v8535_v40 = vld [vmem:[%s11628_s1 + $0xb84] ss:$8 sps:$4 sm:$0xff]   ;;  %v8536_v55 = vld [vmem:[%s11628_s1 + $0xd80] ss:$8 sps:$4 sm:$0xff]  }
 0x199   : > { %5401 = vmatprep.subr.bf16.mxu0 %v8520_v6  ;;  %4392 = vmatprep.mubr.bf16.mxu1 %v10626_v16  ;;  %v10660_v0 = vld [vmem:[%s8986_s13 + $0xcc] ss:$24 sps:$4 sm:$0xff]   ;;  %v8541_v6 = vld [vmem:[%s11628_s1 + $0xb94] ss:$8 sps:$4 sm:$0xff]  }
 0x19a   : > { %5340 = vmatprep.mubr.bf16.mxu0 %v10259_v30  ;;  %v8532_v30 = vld [vmem:[%s11628_s1 + $0xd74] ss:$8 sps:$4 sm:$0xff]  }
 0x19b   : > { %4454 = vmatpush1.bf16.msra.mxu1 %v8515_v15  ;;  %v10677_v15 = vld [vmem:[%s8986_s13 + $0xc8] ss:$24 sps:$4 sm:$0xff]  }
 0x19c   : > { %5402 = vmatpush1.bf16.msra.mxu0 %v8518_v32  ;;  %4455 = vmatprep.subr.bf16.mxu1 %v8523_v44  ;;  %v8539_v32 = vld [vmem:[%s11628_s1 + $0xb90] ss:$8 sps:$4 sm:$0xff]  }
 0x19d   : > { %5403 = vmatprep.subr.bf16.mxu0 %v8526_v62  ;;  %v8542_v44 = vld [vmem:[%s11628_s1 + $0xd90] ss:$8 sps:$4 sm:$0xff]   ;;  %v8547_v62 = vld [vmem:[%s11628_s1 + $0xba4] ss:$8 sps:$4 sm:$0xff]  }
 0x19e   : > { %4393 = vmatmul.mubr.bf16.gmra.mrb[76].mxu1 %v10643_v58 }
 0x19f   : > { %5341 = vmatmul.mubr.bf16.gmra.mrb[76].mxu0 %v10294_v59  ;;  %4456 = vmatpush1.bf16.msra.mxu1 %v8521_v3  ;;  %v8538_v59 = vld [vmem:[%s11628_s1 + $0xd84] ss:$8 sps:$4 sm:$0xff]   ;;  %v10694_v3 = vld [vmem:[%s8986_s13 + $0xfc] ss:$24 sps:$4 sm:$0xff]  }
 0x1a0   : > { %5404 = vmatpush1.bf16.msra.mxu0 %v8524_v13  ;;  %4457 = vmatprep.subr.bf16.mxu1 %v8529_v9  ;;  %v8545_v13 = vld [vmem:[%s11628_s1 + $0xba0] ss:$8 sps:$4 sm:$0xff]  }
 0x1a1   : > { %5405 = vmatprep.subr.bf16.mxu0 %v8532_v30  ;;  %4402 = vmatprep.mubr.bf16.mxu1 %v10660_v0  ;;  %v8548_v9 = vld [vmem:[%s11628_s1 + $0xda0] ss:$8 sps:$4 sm:$0xff]   ;;  %v8553_v30 = vld [vmem:[%s11628_s1 + $0xbb4] ss:$8 sps:$4 sm:$0xff]  }
 0x1a2   : > { %5350 = vmatprep.mubr.bf16.mxu0 %v10305_v12  ;;  %v8544_v12 = vld [vmem:[%s11628_s1 + $0xd94] ss:$8 sps:$4 sm:$0xff]  }
 0x1a3   : > { %4458 = vmatpush1.bf16.msra.mxu1 %v8527_v49  ;;  %v10711_v49 = vld [vmem:[%s8986_s13 + $0xf8] ss:$24 sps:$4 sm:$0xff]  }
 0x1a4   : > { %5406 = vmatpush1.bf16.msra.mxu0 %v8530_v24  ;;  %4459 = vmatprep.subr.bf16.mxu1 %v8535_v40  ;;  %v8551_v24 = vld [vmem:[%s11628_s1 + $0xbb0] ss:$8 sps:$4 sm:$0xff]  }
 0x1a5   : > { %5407 = vmatprep.subr.bf16.mxu0 %v8538_v59  ;;  %v8554_v40 = vld [vmem:[%s11628_s1 + $0xdb0] ss:$8 sps:$4 sm:$0xff]   ;;  %v8559_v59 = vld [vmem:[%s11628_s1 + $0xbc4] ss:$8 sps:$4 sm:$0xff]  }
 0x1a6   : > { %4403 = vmatmul.mubr.bf16.gmra.mrb[80].mxu1 %v10677_v15 }
 0x1a7   : > { %5351 = vmatmul.mubr.bf16.gmra.mrb[80].mxu0 %v10340_v2  ;;  %4460 = vmatpush1.bf16.msra.mxu1 %v8533_v47  ;;  %v8550_v2 = vld [vmem:[%s11628_s1 + $0xda4] ss:$8 sps:$4 sm:$0xff]  }
 0x1a8   : > { %5408 = vmatpush1.bf16.msra.mxu0 %v8536_v55  ;;  %4461 = vmatprep.subr.bf16.mxu1 %v8541_v6  ;;  %v10728_v47 = vld [vmem:[%s8986_s13 + $0x12c] ss:$24 sps:$4 sm:$0xff]   ;;  %v8557_v55 = vld [vmem:[%s11628_s1 + $0xbc0] ss:$8 sps:$4 sm:$0xff]  }
 0x1a9   : > { %5409 = vmatprep.subr.bf16.mxu0 %v8544_v12  ;;  %4412 = vmatprep.mubr.bf16.mxu1 %v10694_v3  ;;  %v8560_v6 = vld [vmem:[%s11628_s1 + $0xdc0] ss:$8 sps:$4 sm:$0xff]   ;;  %v8565_v12 = vld [vmem:[%s11628_s1 + $0xbd4] ss:$8 sps:$4 sm:$0xff]  }
 0x1aa   : > { %5360 = vmatprep.mubr.bf16.mxu0 %v10351_v53  ;;  %v8556_v53 = vld [vmem:[%s11628_s1 + $0xdb4] ss:$8 sps:$4 sm:$0xff]  }
 0x1ab   : > { %4462 = vmatpush1.bf16.msra.mxu1 %v8539_v32  ;;  %v10745_v32 = vld [vmem:[%s8986_s13 + $0x128] ss:$24 sps:$4 sm:$0xff]  }
 0x1ac   : > { %5410 = vmatpush1.bf16.msra.mxu0 %v8542_v44  ;;  %4463 = vmatprep.subr.bf16.mxu1 %v8547_v62  ;;  %v8563_v44 = vld [vmem:[%s11628_s1 + $0xbd0] ss:$8 sps:$4 sm:$0xff]  }
 0x1ad   : > { %5411 = vmatprep.subr.bf16.mxu0 %v8550_v2  ;;  %v8566_v62 = vld [vmem:[%s11628_s1 + $0xdd0] ss:$8 sps:$4 sm:$0xff]   ;;  %v8571_v2 = vld [vmem:[%s11628_s1 + $0xbe4] ss:$8 sps:$4 sm:$0xff]  }
 0x1ae   : > { %4413 = vmatmul.mubr.bf16.gmra.mrb[84].mxu1 %v10711_v49 }
 0x1af   : > { %5361 = vmatmul.mubr.bf16.gmra.mrb[84].mxu0 %v10386_v20  ;;  %4464 = vmatpush1.bf16.msra.mxu1 %v8545_v13  ;;  %v8562_v20 = vld [vmem:[%s11628_s1 + $0xdc4] ss:$8 sps:$4 sm:$0xff]   ;;  %v10762_v13 = vld [vmem:[%s8986_s13 + $0x15c] ss:$24 sps:$4 sm:$0xff]  }
 0x1b0   : > { %5412 = vmatpush1.bf16.msra.mxu0 %v8548_v9  ;;  %4465 = vmatprep.subr.bf16.mxu1 %v8553_v30  ;;  %v8569_v9 = vld [vmem:[%s11628_s1 + $0xbe0] ss:$8 sps:$4 sm:$0xff]  }
 0x1b1   : > { %5413 = vmatprep.subr.bf16.mxu0 %v8556_v53  ;;  %4422 = vmatprep.mubr.bf16.mxu1 %v10728_v47  ;;  %v8572_v30 = vld [vmem:[%s11628_s1 + $0xde0] ss:$8 sps:$4 sm:$0xff]   ;;  %v8577_v53 = vld [vmem:[%s11628_s1 + $0xbf4] ss:$8 sps:$4 sm:$0xff]  }
 0x1b2   : > { %5370 = vmatprep.mubr.bf16.mxu0 %v10397_v48  ;;  %v8568_v48 = vld [vmem:[%s11628_s1 + $0xdd4] ss:$8 sps:$4 sm:$0xff]  }
 0x1b3   : > { %4466 = vmatpush1.bf16.msra.mxu1 %v8551_v24  ;;  %v10779_v24 = vld [vmem:[%s8986_s13 + $0x158] ss:$24 sps:$4 sm:$0xff]  }
 0x1b4   : > { %5414 = vmatpush1.bf16.msra.mxu0 %v8554_v40  ;;  %4467 = vmatprep.subr.bf16.mxu1 %v8559_v59  ;;  %v8575_v40 = vld [vmem:[%s11628_s1 + $0xbf0] ss:$8 sps:$4 sm:$0xff]  }
 0x1b5   : > { %5415 = vmatprep.subr.bf16.mxu0 %v8562_v20  ;;  %v8578_v59 = vld [vmem:[%s11628_s1 + $0xdf0] ss:$8 sps:$4 sm:$0xff]   ;;  %v8583_v20 = vld [vmem:[%s11628_s1 + $0xe04] ss:$8 sps:$4 sm:$0xff]  }
 0x1b6   : > { %4423 = vmatmul.mubr.bf16.gmra.mrb[88].mxu1 %v10745_v32 }
 0x1b7   : > { %5371 = vmatmul.mubr.bf16.gmra.mrb[88].mxu0 %v10432_v39  ;;  %4468 = vmatpush1.bf16.msra.mxu1 %v8557_v55  ;;  %v8574_v39 = vld [vmem:[%s11628_s1 + $0xde4] ss:$8 sps:$4 sm:$0xff]  }
 0x1b8   : > { %5416 = vmatpush1.bf16.msra.mxu0 %v8560_v6  ;;  %4469 = vmatprep.subr.bf16.mxu1 %v8565_v12  ;;  %v10793_v55 = vld [vmem:[%s8986_s13 + $0x14] ss:$24 sps:$4 sm:$0xff]   ;;  %v10804_v12 = vld [vmem:[%s8986_s13 + $0x10] ss:$24 sps:$4 sm:$0xff]  }
 0x1b9   : > { %5417 = vmatprep.subr.bf16.mxu0 %v8568_v48  ;;  %4432 = vmatprep.mubr.bf16.mxu1 %v10762_v13  ;;  %v8586_v6 = vld [vmem:[%s11628_s1 + $0xe14] ss:$8 sps:$4 sm:$0xff]  }
 0x1ba   : > { %5380 = vmatprep.mubr.bf16.mxu0 %v10443_v60  ;;  %v8580_v60 = vld [vmem:[%s11628_s1 + $0xdf4] ss:$8 sps:$4 sm:$0xff]  }
 0x1bb   : > { %4470 = vmatpush1.bf16.msra.mxu1 %v8563_v44  ;;  %v10812_v48 = vld [vmem:[%s8986_s13 + $0x44] ss:$24 sps:$4 sm:$0xff]  }
 0x1bc   : > { %5418 = vmatpush1.bf16.msra.mxu0 %v8566_v62  ;;  %4471 = vmatprep.subr.bf16.mxu1 %v8571_v2  ;;  %v8589_v44 = vld [vmem:[%s11628_s1 + $0xe24] ss:$8 sps:$4 sm:$0xff]   ;;  %v8592_v62 = vld [vmem:[%s11628_s1 + $0xe34] ss:$8 sps:$4 sm:$0xff]   ;;  %v10826_v2 = vld [vmem:[%s8986_s13 + $0x40] ss:$24 sps:$4 sm:$0xff]  }
 0x1bd   : > { %5419 = vmatprep.subr.bf16.mxu0 %v8574_v39  ;;  %v10834_v39 = vld [vmem:[%s8986_s13 + $0x74] ss:$24 sps:$4 sm:$0xff]  }
 0x1be   : > { %4433 = vmatmul.mubr.bf16.gmra.mrb[92].mxu1 %v10779_v24 }
 0x1bf   : > { %5381 = vmatmul.mubr.bf16.gmra.mrb[92].mxu0 %v10472_v8  ;;  %4472 = vmatpush1.bf16.msra.mxu1 %v8569_v9  ;;  %v8581_v8 = vld [vmem:[%s11628_s1 + $0xe00] ss:$8 sps:$4 sm:$0xff]   ;;  %v8595_v9 = vld [vmem:[%s11628_s1 + $0xe44] ss:$8 sps:$4 sm:$0xff]  }
 0x1c0   : > { %5420 = vmatpush1.bf16.msra.mxu0 %v8572_v30  ;;  %4473 = vmatprep.subr.bf16.mxu1 %v8577_v53  ;;  %v8598_v30 = vld [vmem:[%s11628_s1 + $0xe54] ss:$8 sps:$4 sm:$0xff]   ;;  %v10848_v53 = vld [vmem:[%s8986_s13 + $0x70] ss:$24 sps:$4 sm:$0xff]  }
 0x1c1   : > { %5421 = vmatprep.subr.bf16.mxu0 %v8580_v60  ;;  %4475 = vmatprep.mubr.bf16.mxu1 %v10793_v55  ;;  %v10856_v60 = vld [vmem:[%s8986_s13 + $0xa4] ss:$24 sps:$4 sm:$0xff]  }
 0x1c2   : > { %5423 = vmatprep.mubr.bf16.mxu0 %v10488_v10  ;;  %v8584_v10 = vld [vmem:[%s11628_s1 + $0xe10] ss:$8 sps:$4 sm:$0xff]  }
 0x1c3   : > { %4474 = vmatpush1.bf16.msra.mxu1 %v8575_v40  ;;  %v8601_v40 = vld [vmem:[%s11628_s1 + $0xe64] ss:$8 sps:$4 sm:$0xff]  }
 0x1c4   : > { %5422 = vmatpush1.bf16.msra.mxu0 %v8578_v59 }
 0x1c5   : > { %5504 = vmatprep.subr.bf16.mxu0 %v8583_v20 }
 0x1c6   : > { %4476 = vmatmul.mubr.bf16.vlgmr.msra.gmra.mrb[64].mxu1 %v10804_v12 }
 0x1c7   : > { %5424 = vmatmul.mubr.bf16.vlgmr.msra.gmra.mrb[64].mxu0 %v10517_v34  ;;  %4485 = vmatprep.mubr.bf16.mxu1 %v10812_v48  ;;  %v8587_v34 = vld [vmem:[%s11628_s1 + $0xe20] ss:$8 sps:$4 sm:$0xff]  }
 0x1c8   : > { %5505 = vmatpush1.bf16.msra.mxu0 %v8581_v8  ;;  %5433 = vmatprep.mubr.bf16.mxu0 %v10534_v4  ;;  %v8590_v4 = vld [vmem:[%s11628_s1 + $0xe30] ss:$8 sps:$4 sm:$0xff]   ;;  %v8599_v8 = vld [vmem:[%s11628_s1 + $0xe60] ss:$8 sps:$4 sm:$0xff]  }
 0x1c9   : > { %5506 = vmatprep.subr.bf16.mxu0 %v8586_v6 }
 0x1cc   : > { %5507 = vmatpush1.bf16.msra.mxu0 %v8584_v10 }
 0x1cd   : > { %5508 = vmatprep.subr.bf16.mxu0 %v8589_v44 }
 0x1ce   : > { %4486 = vmatmul.mubr.bf16.gmra.mrb[68].mxu1 %v10826_v2 }
 0x1cf   : > { %5434 = vmatmul.mubr.bf16.gmra.mrb[68].mxu0 %v10563_v42  ;;  %4495 = vmatprep.mubr.bf16.mxu1 %v10834_v39  ;;  %v8593_v42 = vld [vmem:[%s11628_s1 + $0xe40] ss:$8 sps:$4 sm:$0xff]  }
 0x1d0   : > { %5509 = vmatpush1.bf16.msra.mxu0 %v8587_v34  ;;  %5443 = vmatprep.mubr.bf16.mxu0 %v10580_v52  ;;  %v8596_v52 = vld [vmem:[%s11628_s1 + $0xe50] ss:$8 sps:$4 sm:$0xff]  }
 0x1d1   : > { %5510 = vmatprep.subr.bf16.mxu0 %v8592_v62 }
 0x1d4   : > { %5511 = vmatpush1.bf16.msra.mxu0 %v8590_v4 }
 0x1d5   : > { %5512 = vmatprep.subr.bf16.mxu0 %v8595_v9 }
 0x1d6   : > { %4496 = vmatmul.mubr.bf16.gmra.mrb[72].mxu1 %v10848_v53 }
 0x1d7   : > { %5444 = vmatmul.mubr.bf16.gmra.mrb[72].mxu0 %v10609_v61  ;;  %4505 = vmatprep.mubr.bf16.mxu1 %v10856_v60 }
 0x1d8   : > { %5513 = vmatpush1.bf16.msra.mxu0 %v8593_v42  ;;  %5453 = vmatprep.mubr.bf16.mxu0 %v10626_v16  ;;  %v8604_v16 = vld [vmem:[%s11628_s1 + $0xe74] ss:$8 sps:$4 sm:$0xff]   ;;  %v10874_v42 = vld [vmem:[%s8986_s13 + $0xa0] ss:$24 sps:$4 sm:$0xff]  }
 0x1d9   : > { %5514 = vmatprep.subr.bf16.mxu0 %v8598_v30  ;;  %v2355_v59 = vpop.f32.mrb[32].mxu1 }
 0x1da   : > { %v2357_v20 = vpop.f32.mrb[33].mxu1  ;;  %v2467_v6 = vrot.slane %v2355_v59, 1  ;;  %v10889_v59 = vld [vmem:[%s8986_s13 + $0xd4] ss:$24 sps:$4 sm:$0xff]  }
 0x1db   : > { %v2359_v61 = vpop.f32.mrb[34].mxu1  ;;  %v2470_v34 = vrot.slane %v2357_v20, 1 }
 0x1dc   : > { %5515 = vmatpush1.bf16.msra.mxu0 %v8596_v52  ;;  %v2468_v10 = vrot.slane %v2359_v61, 1  ;;  %v2361_v44 = vpop.f32.mrb[35].mxu1 }
 0x1dd   : > { %5516 = vmatprep.subr.bf16.mxu0 %v8601_v40  ;;  %v2471_v62 = vrot.slane %v2361_v44, 1 }
 0x1de   : > { %v2469_v4 = vsel %vm2466_vm0, %v2467_v6, %v2468_v10  ;;  %v10871_v9 = vadd.f32 %v10278_v46, %v2468_v10  ;;  %4506 = vmatmul.mubr.bf16.gmra.mrb[76].mxu1 %v10874_v42  ;;  %v8602_v46 = vld [vmem:[%s11628_s1 + $0xe70] ss:$8 sps:$4 sm:$0xff]  }
 0x1df   : > { %5454 = vmatmul.mubr.bf16.gmra.mrb[76].mxu0 %v10643_v58  ;;  %v10879_v30 = vadd.f32 %v10269_v35, %v2469_v4  ;;  %v2472_v52 = vsel %vm2466_vm0, %v2470_v34, %v2471_v62  ;;  %v10883_v40 = vadd.f32 %v10284_v37, %v2471_v62  ;;  %4515 = vmatprep.mubr.bf16.mxu1 %v10889_v59  ;;  %v8607_v35 = vld [vmem:[%s11628_s1 + $0xe84] ss:$8 sps:$4 sm:$0xff]   ;;  %v10910_v4 = vld [vmem:[%s8986_s13 + $0xd0] ss:$24 sps:$4 sm:$0xff]  }
 0x1e0   : > { %5517 = vmatpush1.bf16.msra.mxu0 %v8599_v8  ;;  %v10893_v20 = vadd.f32 %v10275_v21, %v2472_v52  ;;  %5463 = vmatprep.mubr.bf16.mxu0 %v10660_v0  ;;  %v8605_v8 = vld [vmem:[%s11628_s1 + $0xe80] ss:$8 sps:$4 sm:$0xff]   ;;  %v8610_v0 = vld [vmem:[%s11628_s1 + $0xe94] ss:$8 sps:$4 sm:$0xff]  }
 0x1e1   : > { %5518 = vmatprep.subr.bf16.mxu0 %v8604_v16  ;;  %v2365_v37 = vpop.f32.mrb[36].mxu1 }
 0x1e2   : > { %v2367_v58 = vpop.f32.mrb[37].mxu1  ;;  %v2473_v6 = vrot.slane %v2365_v37, 1  ;;  %v10925_v37 = vld [vmem:[%s8986_s13 + $0x104] ss:$24 sps:$4 sm:$0xff]  }
 0x1e3   : > { %v2369_v61 = vpop.f32.mrb[38].mxu1  ;;  %v2476_v44 = vrot.slane %v2367_v58, 1 }
 0x1e4   : > { %5519 = vmatpush1.bf16.msra.mxu0 %v8602_v46  ;;  %v2474_v10 = vrot.slane %v2369_v61, 1  ;;  %v2371_v21 = vpop.f32.mrb[39].mxu1 }
 0x1e5   : > { %5520 = vmatprep.subr.bf16.mxu0 %v8607_v35  ;;  %v2477_v16 = vrot.slane %v2371_v21, 1 }
 0x1e6   : > { %v2475_v34 = vsel %vm2466_vm0, %v2473_v6, %v2474_v10  ;;  %v10907_v62 = vadd.f32 %v10324_v63, %v2474_v10  ;;  %4516 = vmatmul.mubr.bf16.gmra.mrb[80].mxu1 %v10910_v4  ;;  %v8608_v63 = vld [vmem:[%s11628_s1 + $0xe90] ss:$8 sps:$4 sm:$0xff]  }
 0x1e7   : > { %5464 = vmatmul.mubr.bf16.gmra.mrb[80].mxu0 %v10677_v15  ;;  %v10915_v52 = vadd.f32 %v10315_v5, %v2475_v34  ;;  %v2478_v46 = vsel %vm2466_vm0, %v2476_v44, %v2477_v16  ;;  %v10919_v35 = vadd.f32 %v10330_v31, %v2477_v16  ;;  %4525 = vmatprep.mubr.bf16.mxu1 %v10925_v37  ;;  %v8613_v5 = vld [vmem:[%s11628_s1 + $0xea4] ss:$8 sps:$4 sm:$0xff]   ;;  %v10946_v34 = vld [vmem:[%s8986_s13 + $0x100] ss:$24 sps:$4 sm:$0xff]  }
 0x1e8   : > { %5521 = vmatpush1.bf16.msra.mxu0 %v8605_v8  ;;  %v10929_v58 = vadd.f32 %v10321_v27, %v2478_v46  ;;  %5473 = vmatprep.mubr.bf16.mxu0 %v10694_v3  ;;  %v8611_v8 = vld [vmem:[%s11628_s1 + $0xea0] ss:$8 sps:$4 sm:$0xff]   ;;  %v8616_v3 = vld [vmem:[%s11628_s1 + $0xeb4] ss:$8 sps:$4 sm:$0xff]  }
 0x1e9   : > { %5522 = vmatprep.subr.bf16.mxu0 %v8610_v0  ;;  %v2375_v31 = vpop.f32.mrb[40].mxu1 }
 0x1ea   : > { %v2377_v15 = vpop.f32.mrb[41].mxu1  ;;  %v2479_v6 = vrot.slane %v2375_v31, 1  ;;  %v10961_v31 = vld [vmem:[%s8986_s13 + $0x134] ss:$24 sps:$4 sm:$0xff]  }
 0x1eb   : > { %v2379_v61 = vpop.f32.mrb[42].mxu1  ;;  %v2482_v21 = vrot.slane %v2377_v15, 1 }
 0x1ec   : > { %5523 = vmatpush1.bf16.msra.mxu0 %v8608_v63  ;;  %v2480_v10 = vrot.slane %v2379_v61, 1  ;;  %v2381_v27 = vpop.f32.mrb[43].mxu1 }
 0x1ed   : > { %5524 = vmatprep.subr.bf16.mxu0 %v8613_v5  ;;  %v2483_v0 = vrot.slane %v2381_v27, 1 }
 0x1ee   : > { %v2481_v44 = vsel %vm2466_vm0, %v2479_v6, %v2480_v10  ;;  %v10943_v16 = vadd.f32 %v10370_v19, %v2480_v10  ;;  %4526 = vmatmul.mubr.bf16.gmra.mrb[84].mxu1 %v10946_v34  ;;  %v8614_v19 = vld [vmem:[%s11628_s1 + $0xeb0] ss:$8 sps:$4 sm:$0xff]  }
 0x1ef   : > { %5474 = vmatmul.mubr.bf16.gmra.mrb[84].mxu0 %v10711_v49  ;;  %v10951_v46 = vadd.f32 %v10361_v7, %v2481_v44  ;;  %v2484_v63 = vsel %vm2466_vm0, %v2482_v21, %v2483_v0  ;;  %v10955_v5 = vadd.f32 %v10376_v51, %v2483_v0  ;;  %4535 = vmatprep.mubr.bf16.mxu1 %v10961_v31  ;;  %v8619_v7 = vld [vmem:[%s11628_s1 + $0xec4] ss:$8 sps:$4 sm:$0xff]   ;;  %v10982_v44 = vld [vmem:[%s8986_s13 + $0x130] ss:$24 sps:$4 sm:$0xff]  }
 0x1f0   : > { %5525 = vmatpush1.bf16.msra.mxu0 %v8611_v8  ;;  %v10965_v15 = vadd.f32 %v10367_v57, %v2484_v63  ;;  %5483 = vmatprep.mubr.bf16.mxu0 %v10728_v47  ;;  %v8617_v8 = vld [vmem:[%s11628_s1 + $0xec0] ss:$8 sps:$4 sm:$0xff]   ;;  %v8622_v47 = vld [vmem:[%s11628_s1 + $0xed4] ss:$8 sps:$4 sm:$0xff]  }
 0x1f1   : > { %5526 = vmatprep.subr.bf16.mxu0 %v8616_v3  ;;  %v2385_v51 = vpop.f32.mrb[44].mxu1 }
 0x1f2   : > { %v2387_v49 = vpop.f32.mrb[45].mxu1  ;;  %v2485_v6 = vrot.slane %v2385_v51, 1  ;;  %v10997_v51 = vld [vmem:[%s8986_s13 + $0x164] ss:$24 sps:$4 sm:$0xff]  }
 0x1f3   : > { %v2389_v61 = vpop.f32.mrb[46].mxu1  ;;  %v2488_v27 = vrot.slane %v2387_v49, 1 }
 0x1f4   : > { %5527 = vmatpush1.bf16.msra.mxu0 %v8614_v19  ;;  %v2486_v10 = vrot.slane %v2389_v61, 1  ;;  %v2391_v57 = vpop.f32.mrb[47].mxu1 }
 0x1f5   : > { %5528 = vmatprep.subr.bf16.mxu0 %v8619_v7  ;;  %v2489_v3 = vrot.slane %v2391_v57, 1 }
 0x1f6   : > { %v2487_v21 = vsel %vm2466_vm0, %v2485_v6, %v2486_v10  ;;  %v10979_v0 = vadd.f32 %v10416_v38, %v2486_v10  ;;  %4536 = vmatmul.mubr.bf16.gmra.mrb[88].mxu1 %v10982_v44  ;;  %v8620_v38 = vld [vmem:[%s11628_s1 + $0xed0] ss:$8 sps:$4 sm:$0xff]  }
 0x1f7   : > { %5484 = vmatmul.mubr.bf16.gmra.mrb[88].mxu0 %v10745_v32  ;;  %v10987_v63 = vadd.f32 %v10407_v28, %v2487_v21  ;;  %v2490_v19 = vsel %vm2466_vm0, %v2488_v27, %v2489_v3  ;;  %v10991_v7 = vadd.f32 %v10422_v17, %v2489_v3  ;;  %4545 = vmatprep.mubr.bf16.mxu1 %v10997_v51  ;;  %v8625_v28 = vld [vmem:[%s11628_s1 + $0xee4] ss:$8 sps:$4 sm:$0xff]   ;;  %v11018_v21 = vld [vmem:[%s8986_s13 + $0x160] ss:$24 sps:$4 sm:$0xff]   ;;  %s281_s13 = scalar_lea.vmem %s11634_s7, %s6522_s19 }
 0x1f8   : > { %5529 = vmatpush1.bf16.msra.mxu0 %v8617_v8  ;;  %v11001_v49 = vadd.f32 %v10413_v11, %v2490_v19  ;;  %5493 = vmatprep.mubr.bf16.mxu0 %v10762_v13  ;;  %v8623_v8 = vld [vmem:[%s11628_s1 + $0xee0] ss:$8 sps:$4 sm:$0xff]   ;;  %v8628_v13 = vld [vmem:[%s11628_s1 + $0xef4] ss:$8 sps:$4 sm:$0xff]  }
 0x1f9   : > { %5530 = vmatprep.subr.bf16.mxu0 %v8622_v47  ;;  %v2395_v17 = vpop.f32.mrb[48].mxu1 }
 0x1fa   : > { %v2397_v32 = vpop.f32.mrb[49].mxu1  ;;  %v2491_v6 = vrot.slane %v2395_v17, 1 }
 0x1fb   : > { %v2399_v61 = vpop.f32.mrb[50].mxu1  ;;  %v2494_v57 = vrot.slane %v2397_v32, 1 }
 0x1fc   : > { %5531 = vmatpush1.bf16.msra.mxu0 %v8620_v38  ;;  %v2492_v10 = vrot.slane %v2399_v61, 1  ;;  %v2401_v11 = vpop.f32.mrb[51].mxu1 }
 0x1fd   : > { %5532 = vmatprep.subr.bf16.mxu0 %v8625_v28  ;;  %v2495_v47 = vrot.slane %v2401_v11, 1 }
 0x1fe   : > { %v2493_v27 = vsel %vm2466_vm0, %v2491_v6, %v2492_v10  ;;  %v11015_v3 = vadd.f32 %v10459_v50, %v2492_v10  ;;  %4546 = vmatmul.mubr.bf16.gmra.mrb[92].mxu1 %v11018_v21  ;;  %v8626_v50 = vld [vmem:[%s11628_s1 + $0xef0] ss:$8 sps:$4 sm:$0xff]  }
 0x1ff   : > { %5494 = vmatmul.mubr.bf16.gmra.mrb[92].mxu0 %v10779_v24  ;;  %v11023_v19 = vadd.f32 %v10447_v26, %v2493_v27  ;;  %v2496_v38 = vsel %vm2466_vm0, %v2494_v57, %v2495_v47  ;;  %v11027_v28 = vadd.f32 %v10468_v1, %v2495_v47 }
 0x200   : > { %5533 = vmatpush1.bf16.msra.mxu0 %v8623_v8  ;;  %5536 = vmatprep.mubr.bf16.mxu0 %v10793_v55  ;;  %v11034_v17 = vadd.f32 %v10450_v29, %v2496_v38 }
 0x201   : > { %5534 = vmatprep.subr.bf16.mxu0 %v8628_v13  ;;  %v2405_v24 = vpop.f32.mrb[52].mxu1 }
 0x202   : > { %v2407_v32 = vpop.f32.mrb[53].mxu1  ;;  %v2497_v61 = vrot.slane %v2405_v24, 1 }
 0x203   : > { %v2409_v26 = vpop.f32.mrb[54].mxu1  ;;  %v2500_v1 = vrot.slane %v2407_v32, 1 }
 0x204   : > { %5535 = vmatpush1.bf16.msra.mxu0 %v8626_v50  ;;  %v2498_v6 = vrot.slane %v2409_v26, 1  ;;  %v2411_v10 = vpop.f32.mrb[55].mxu1 }
 0x205   : > { %v2501_v11 = vrot.slane %v2411_v10, 1 }
 0x206   : > { %v2499_v8 = vsel %vm2466_vm0, %v2497_v61, %v2498_v6  ;;  %v11038_v57 = vadd.f32 %v10505_v33, %v2498_v6 }
 0x207   : > { %5537 = vmatmul.mubr.bf16.vlgmr.msra.gmra.mrb[64].mxu0 %v10804_v12  ;;  %v11042_v29 = vadd.f32 %v10493_v43, %v2499_v8  ;;  %v2502_v55 = vsel %vm2466_vm0, %v2500_v1, %v2501_v11  ;;  %v11046_v13 = vadd.f32 %v10514_v22, %v2501_v11 }
 0x208   : > { %5546 = vmatprep.mubr.bf16.mxu0 %v10812_v48  ;;  %v11050_v47 = vadd.f32 %v10496_v45, %v2502_v55 }
 0x209   : > { %v2415_v27 = vpop.f32.mrb[56].mxu1 }
 0x20a   : > { %v2417_v38 = vpop.f32.mrb[57].mxu1  ;;  %v2503_v33 = vrot.slane %v2415_v27, 1 }
 0x20b   : > { %v2419_v50 = vpop.f32.mrb[58].mxu1  ;;  %v2506_v12 = vrot.slane %v2417_v38, 1 }
 0x20c   : > { %v2504_v24 = vrot.slane %v2419_v50, 1  ;;  %v2421_v32 = vpop.f32.mrb[59].mxu1 }
 0x20d   : > { %v2507_v26 = vrot.slane %v2421_v32, 1 }
 0x20e   : > { %v2505_v43 = vsel %vm2466_vm0, %v2503_v33, %v2504_v24  ;;  %v11054_v61 = vadd.f32 %v10551_v54, %v2504_v24 }
 0x20f   : > { %5547 = vmatmul.mubr.bf16.gmra.mrb[68].mxu0 %v10826_v2  ;;  %v11058_v22 = vadd.f32 %v10539_v41, %v2505_v43  ;;  %v2508_v45 = vsel %vm2466_vm0, %v2506_v12, %v2507_v26  ;;  %v11062_v48 = vadd.f32 %v10560_v36, %v2507_v26 }
 0x210   : > { %5556 = vmatprep.mubr.bf16.mxu0 %v10834_v39  ;;  %v11066_v6 = vadd.f32 %v10542_v23, %v2508_v45 }
 0x211   : > { %v2425_v10 = vpop.f32.mrb[60].mxu1 }
 0x212   : > { %v2427_v1 = vpop.f32.mrb[61].mxu1  ;;  %v2509_v54 = vrot.slane %v2425_v10, 1 }
 0x213   : > { %v2429_v11 = vpop.f32.mrb[62].mxu1  ;;  %v2512_v2 = vrot.slane %v2427_v1, 1 }
 0x214   : > { %v2510_v8 = vrot.slane %v2429_v11, 1  ;;  %v2431_v55 = vpop.f32.mrb[63].mxu1 }
 0x215   : > { %v2513_v27 = vrot.slane %v2431_v55, 1 }
 0x216   : > { %v2511_v41 = vsel %vm2466_vm0, %v2509_v54, %v2510_v8  ;;  %v11070_v38 = vadd.f32 %v10597_v25, %v2510_v8 }
 0x217   : > { %5557 = vmatmul.mubr.bf16.gmra.mrb[72].mxu0 %v10848_v53  ;;  %v11074_v36 = vadd.f32 %v10585_v56, %v2511_v41  ;;  %v2514_v23 = vsel %vm2466_vm0, %v2512_v2, %v2513_v27  ;;  %v11078_v39 = vadd.f32 %v10606_v14, %v2513_v27 }
 0x218   : > { %5566 = vmatprep.mubr.bf16.mxu0 %v10856_v60  ;;  %v11082_v50 = vadd.f32 %v10588_v18, %v2514_v23 }
 0x21a   : > { %v3416_v33 = vpop.f32.mrb[32].mxu0 }
 0x21b   : > { %v3418_v24 = vpop.f32.mrb[33].mxu0  ;;  %v3528_v25 = vrot.slane %v3416_v33, 2 }
 0x21c   : > { %v3420_v32 = vpop.f32.mrb[34].mxu0  ;;  %v3531_v26 = vrot.slane %v3418_v24, 2 }
 0x21d   : > { %v3529_v12 = vrot.slane %v3420_v32, 2  ;;  %v3422_v53 = vpop.f32.mrb[35].mxu0 }
 0x21e   : > { %v3532_v56 = vrot.slane %v3422_v53, 2 }
 0x21f   : > { %v3530_v43 = vsel %vm3527_vm1, %v3528_v25, %v3529_v12  ;;  %v11086_v45 = vadd.f32 %v3529_v12, %v10871_v9  ;;  %5567 = vmatmul.mubr.bf16.gmra.mrb[76].mxu0 %v10874_v42 }
 0x220   : > { %v11090_v14 = vadd.f32 %v3530_v43, %v10879_v30  ;;  %v3533_v18 = vsel %vm3527_vm1, %v3531_v26, %v3532_v56  ;;  %v11094_v60 = vadd.f32 %v3532_v56, %v10883_v40  ;;  %5576 = vmatprep.mubr.bf16.mxu0 %v10889_v59 }
 0x221   : > { %v11098_v10 = vadd.f32 %v3533_v18, %v10893_v20 }
 0x222   : > { %v3426_v1 = vpop.f32.mrb[36].mxu0 }
 0x223   : > { %v3428_v11 = vpop.f32.mrb[37].mxu0  ;;  %v3534_v9 = vrot.slane %v3426_v1, 2 }
 0x224   : > { %v3430_v54 = vpop.f32.mrb[38].mxu0  ;;  %v3537_v42 = vrot.slane %v3428_v11, 2 }
 0x225   : > { %v3535_v8 = vrot.slane %v3430_v54, 2  ;;  %v3432_v55 = vpop.f32.mrb[39].mxu0 }
 0x226   : > { %v3538_v2 = vrot.slane %v3432_v55, 2 }
 0x227   : > { %v3536_v30 = vsel %vm3527_vm1, %v3534_v9, %v3535_v8  ;;  %v11102_v27 = vadd.f32 %v3535_v8, %v10907_v62  ;;  %5577 = vmatmul.mubr.bf16.gmra.mrb[80].mxu0 %v10910_v4 }
 0x228   : > { %v11106_v40 = vadd.f32 %v3536_v30, %v10915_v52  ;;  %v3539_v59 = vsel %vm3527_vm1, %v3537_v42, %v3538_v2  ;;  %v11110_v20 = vadd.f32 %v3538_v2, %v10919_v35  ;;  %5586 = vmatprep.mubr.bf16.mxu0 %v10925_v37 }
 0x229   : > { %v11114_v41 = vadd.f32 %v3539_v59, %v10929_v58 }
 0x22a   : > { %v3436_v23 = vpop.f32.mrb[40].mxu0 }
 0x22b   : > { %v3438_v33 = vpop.f32.mrb[41].mxu0  ;;  %v3540_v62 = vrot.slane %v3436_v23, 2 }
 0x22c   : > { %v3440_v24 = vpop.f32.mrb[42].mxu0  ;;  %v3543_v4 = vrot.slane %v3438_v33, 2 }
 0x22d   : > { %v3541_v32 = vrot.slane %v3440_v24, 2  ;;  %v3442_v25 = vpop.f32.mrb[43].mxu0 }
 0x22e   : > { %v3544_v12 = vrot.slane %v3442_v25, 2 }
 0x22f   : > { %v3542_v52 = vsel %vm3527_vm1, %v3540_v62, %v3541_v32  ;;  %v11118_v53 = vadd.f32 %v3541_v32, %v10943_v16  ;;  %5587 = vmatmul.mubr.bf16.gmra.mrb[84].mxu0 %v10946_v34 }
 0x230   : > { %v11122_v35 = vadd.f32 %v3542_v52, %v10951_v46  ;;  %v3545_v37 = vsel %vm3527_vm1, %v3543_v4, %v3544_v12  ;;  %v11126_v58 = vadd.f32 %v3544_v12, %v10955_v5  ;;  %5596 = vmatprep.mubr.bf16.mxu0 %v10961_v31 }
 0x231   : > { %v11130_v26 = vadd.f32 %v3545_v37, %v10965_v15 }
 0x232   : > { %v3446_v56 = vpop.f32.mrb[44].mxu0 }
 0x233   : > { %v3448_v43 = vpop.f32.mrb[45].mxu0  ;;  %v3546_v16 = vrot.slane %v3446_v56, 2 }
 0x234   : > { %v3450_v18 = vpop.f32.mrb[46].mxu0  ;;  %v3549_v34 = vrot.slane %v3448_v43, 2 }
 0x235   : > { %v3547_v1 = vrot.slane %v3450_v18, 2  ;;  %v3452_v11 = vpop.f32.mrb[47].mxu0 }
 0x236   : > { %v3550_v54 = vrot.slane %v3452_v11, 2 }
 0x237   : > { %v3548_v46 = vsel %vm3527_vm1, %v3546_v16, %v3547_v1  ;;  %v11134_v9 = vadd.f32 %v3547_v1, %v10979_v0  ;;  %5597 = vmatmul.mubr.bf16.gmra.mrb[88].mxu0 %v10982_v44 }
 0x238   : > { %v11138_v5 = vadd.f32 %v3548_v46, %v10987_v63  ;;  %v3551_v31 = vsel %vm3527_vm1, %v3549_v34, %v3550_v54  ;;  %v11142_v15 = vadd.f32 %v3550_v54, %v10991_v7  ;;  %5606 = vmatprep.mubr.bf16.mxu0 %v10997_v51 }
 0x239   : > { %v11146_v8 = vadd.f32 %v3551_v31, %v11001_v49 }
 0x23a   : > { %v3456_v55 = vpop.f32.mrb[48].mxu0 }
 0x23b   : > { %v3458_v42 = vpop.f32.mrb[49].mxu0  ;;  %v3552_v0 = vrot.slane %v3456_v55, 2 }
 0x23c   : > { %v3460_v2 = vpop.f32.mrb[50].mxu0  ;;  %v3555_v44 = vrot.slane %v3458_v42, 2 }
 0x23d   : > { %v3553_v30 = vrot.slane %v3460_v2, 2  ;;  %v3462_v59 = vpop.f32.mrb[51].mxu0 }
 0x23e   : > { %v3556_v23 = vrot.slane %v3462_v59, 2 }
 0x23f   : > { %v3554_v63 = vsel %vm3527_vm1, %v3552_v0, %v3553_v30  ;;  %v11150_v33 = vadd.f32 %v3553_v30, %v11015_v3  ;;  %5607 = vmatmul.mubr.bf16.gmra.mrb[92].mxu0 %v11018_v21 }
 0x240   : > { %v11154_v7 = vadd.f32 %v3554_v63, %v11023_v19  ;;  %v3557_v51 = vsel %vm3527_vm1, %v3555_v44, %v3556_v23  ;;  %v11158_v49 = vadd.f32 %v3556_v23, %v11027_v28 }
 0x241   : > { %v11161_v24 = vadd.f32 %v3557_v51, %v11034_v17 }
 0x242   : > { %v3466_v62 = vpop.f32.mrb[52].mxu0 }
 0x243   : > { %v3468_v32 = vpop.f32.mrb[53].mxu0  ;;  %v3558_v4 = vrot.slane %v3466_v62, 2 }
 0x244   : > { %v3470_v25 = vpop.f32.mrb[54].mxu0  ;;  %v3561_v52 = vrot.slane %v3468_v32, 2 }
 0x245   : > { %v3559_v12 = vrot.slane %v3470_v25, 2  ;;  %v3472_v3 = vpop.f32.mrb[55].mxu0  ;;  %v8631_v25 = vld [vmem:[%s11630_s3 + $0x4] ss:$8 sps:$4 sm:$0xff]  }
 0x246   : > { %v3562_v37 = vrot.slane %v3472_v3, 2  ;;  %6243 = vmatprep.subr.bf16.mxu1 %v8631_v25  ;;  %v8638_v3 = vld [vmem:[%s11630_s3 + $0x30] ss:$8 sps:$4 sm:$0xff]  }
 0x247   : > { %v3560_v21 = vsel %vm3527_vm1, %v3558_v4, %v3559_v12  ;;  %v11165_v19 = vadd.f32 %v3559_v12, %v11038_v57  ;;  %v8635_v4 = vld [vmem:[%s11630_s3 + $0x20] ss:$8 sps:$4 sm:$0xff]   ;;  %v8640_v12 = vld [vmem:[%s11630_s3 + $0x34] ss:$8 sps:$4 sm:$0xff]  }
 0x248   : > { %v11168_v56 = vadd.f32 %v3560_v21, %v11042_v29  ;;  %v3563_v28 = vsel %vm3527_vm1, %v3561_v52, %v3562_v37  ;;  %v11172_v17 = vadd.f32 %v3562_v37, %v11046_v13  ;;  %v8643_v52 = vld [vmem:[%s11630_s3 + $0x44] ss:$8 sps:$4 sm:$0xff]   ;;  %v8641_v37 = vld [vmem:[%s11630_s3 + $0x40] ss:$8 sps:$4 sm:$0xff]   ;;  %v8646_v21 = vld [vmem:[%s11630_s3 + $0x54] ss:$8 sps:$4 sm:$0xff]  }
 0x249   : > { %v11175_v43 = vadd.f32 %v3563_v28, %v11050_v47  ;;  %v8644_v28 = vld [vmem:[%s11630_s3 + $0x50] ss:$8 sps:$4 sm:$0xff]  }
 0x24a   : > { %v3476_v18 = vpop.f32.mrb[56].mxu0 }
 0x24b   : > { %v3478_v16 = vpop.f32.mrb[57].mxu0  ;;  %v3564_v11 = vrot.slane %v3476_v18, 2  ;;  %v8649_v18 = vld [vmem:[%s11630_s3 + $0x64] ss:$8 sps:$4 sm:$0xff]  }
 0x24c   : > { %v3480_v1 = vpop.f32.mrb[58].mxu0  ;;  %v3567_v46 = vrot.slane %v3478_v16, 2  ;;  %v8647_v16 = vld [vmem:[%s11630_s3 + $0x60] ss:$8 sps:$4 sm:$0xff]  }
 0x24d   : > { %v3565_v34 = vrot.slane %v3480_v1, 2  ;;  %v3482_v54 = vpop.f32.mrb[59].mxu0  ;;  %v8652_v1 = vld [vmem:[%s11630_s3 + $0x74] ss:$8 sps:$4 sm:$0xff]  }
 0x24e   : > { %v3568_v57 = vrot.slane %v3482_v54, 2 }
 0x24f   : > { %v3566_v31 = vsel %vm3527_vm1, %v3564_v11, %v3565_v34  ;;  %v11179_v29 = vadd.f32 %v3565_v34, %v11054_v61  ;;  %v8650_v11 = vld [vmem:[%s11630_s3 + $0x70] ss:$8 sps:$4 sm:$0xff]  }
 0x250   : > { %v11182_v55 = vadd.f32 %v3566_v31, %v11058_v22  ;;  %v3569_v13 = vsel %vm3527_vm1, %v3567_v46, %v3568_v57  ;;  %v11186_v47 = vadd.f32 %v3568_v57, %v11062_v48 }
 0x251   : > { %v11189_v42 = vadd.f32 %v3569_v13, %v11066_v6 }
 0x252   : > { %v3486_v2 = vpop.f32.mrb[60].mxu0 }
 0x253   : > { %v3488_v0 = vpop.f32.mrb[61].mxu0  ;;  %v3570_v59 = vrot.slane %v3486_v2, 2 }
 0x254   : > { %v3490_v30 = vpop.f32.mrb[62].mxu0  ;;  %v3573_v63 = vrot.slane %v3488_v0, 2 }
 0x255   : > { %v3571_v44 = vrot.slane %v3490_v30, 2  ;;  %v3492_v23 = vpop.f32.mrb[63].mxu0  ;;  %v8655_v30 = vld [vmem:[%s11630_s3 + $0x84] ss:$8 sps:$4 sm:$0xff]  }
 0x256   : > { %v3574_v61 = vrot.slane %v3492_v23, 2  ;;  %v8653_v23 = vld [vmem:[%s11630_s3 + $0x80] ss:$8 sps:$4 sm:$0xff]  }
 0x257   : > { %v3572_v51 = vsel %vm3527_vm1, %v3570_v59, %v3571_v44  ;;  %v11193_v22 = vadd.f32 %v3571_v44, %v11070_v38  ;;  %v8629_v38 = vld [vmem:[%s11630_s3] ss:$8 sps:$4 sm:$0xff]  }
 0x258   : > { %v11196_v62 = vadd.f32 %v3572_v51, %v11074_v36  ;;  %v3575_v48 = vsel %vm3527_vm1, %v3573_v63, %v3574_v61  ;;  %v11200_v6 = vadd.f32 %v3574_v61, %v11078_v39  ;;  %6244 = vmatpush1.bf16.msra.mxu1 %v8629_v38  ;;  %v8634_v36 = vld [vmem:[%s11630_s3 + $0x14] ss:$8 sps:$4 sm:$0xff]   ;;  %v8632_v39 = vld [vmem:[%s11630_s3 + $0x10] ss:$8 sps:$4 sm:$0xff]  }
 0x259   : > { %v11203_v32 = vadd.f32 %v3575_v48, %v11082_v50  ;;  %6245 = vmatprep.subr.bf16.mxu1 %v8634_v36  ;;  %v8637_v50 = vld [vmem:[%s11630_s3 + $0x24] ss:$8 sps:$4 sm:$0xff]  }
 0x25c   : > { %6246 = vmatpush1.bf16.msra.mxu1 %v8632_v39 }
 0x25d   : > { %6247 = vmatprep.subr.bf16.mxu1 %v8637_v50 }
 0x260   : > { %6248 = vmatpush1.bf16.msra.mxu1 %v8635_v4 }
 0x261   : > { %6249 = vmatprep.subr.bf16.mxu1 %v8640_v12  ;;  %v8661_v12 = vld [vmem:[%s11630_s3 + $0xa4] ss:$8 sps:$4 sm:$0xff]  }
 0x264   : > { %6250 = vmatpush1.bf16.msra.mxu1 %v8638_v3 }
 0x265   : > { %6251 = vmatprep.subr.bf16.mxu1 %v8643_v52 }
 0x268   : > { %6252 = vmatpush1.bf16.msra.mxu1 %v8641_v37  ;;  %v8659_v37 = vld [vmem:[%s11630_s3 + $0xa0] ss:$8 sps:$4 sm:$0xff]  }
 0x269   : > { %6253 = vmatprep.subr.bf16.mxu1 %v8646_v21 }
 0x26c   : > { %6254 = vmatpush1.bf16.msra.mxu1 %v8644_v28 }
 0x26d   : > { %6255 = vmatprep.subr.bf16.mxu1 %v8649_v18 }
 0x270   : > { %6256 = vmatpush1.bf16.msra.mxu1 %v8647_v16 }
 0x271   : > { %6257 = vmatprep.subr.bf16.mxu1 %v8652_v1 }
 0x274   : > { %6258 = vmatpush1.bf16.msra.mxu1 %v8650_v11 }
 0x275   : > { %6259 = vmatprep.subr.bf16.mxu1 %v8655_v30 }
 0x278   : > { %6260 = vmatpush1.bf16.msra.mxu1 %v8653_v23 }
 0x299   : > { %v4477_v34 = vpop.f32.mrb[64].mxu1 }
 0x29a   : > { %v4479_v54 = vpop.f32.mrb[65].mxu1  ;;  %v4589_v57 = vrot.slane %v4477_v34, 3 }
 0x29b   : > { %v4481_v46 = vpop.f32.mrb[66].mxu1  ;;  %v4592_v2 = vrot.slane %v4479_v54, 3 }
 0x29c   : > { %v4590_v31 = vrot.slane %v4481_v46, 3  ;;  %v4483_v13 = vpop.f32.mrb[67].mxu1 }
 0x29d   : > { %v4593_v0 = vrot.slane %v4483_v13, 3 }
 0x29e   : > { %v4591_v59 = vsel %vm4588_vm2, %v4589_v57, %v4590_v31  ;;  %v11258_v44 = vadd.f32 %v4590_v31, %v11086_v45  ;;  %v8658_v45 = vld [vmem:[%s11630_s3 + $0x94] ss:$8 sps:$4 sm:$0xff]   ;;  %v8667_v31 = vld [vmem:[%s11630_s3 + $0xc4] ss:$8 sps:$4 sm:$0xff]  }
 0x29f   : > { %v11264_v63 = vadd.f32 %v4591_v59, %v11090_v14  ;;  %v4594_v61 = vsel %vm4588_vm2, %v4592_v2, %v4593_v0  ;;  %v11268_v51 = vadd.f32 %v4593_v0, %v11094_v60  ;;  %v8656_v14 = vld [vmem:[%s11630_s3 + $0x90] ss:$8 sps:$4 sm:$0xff]   ;;  %6261 = vmatprep.subr.bf16.mxu1 %v8658_v45  ;;  %v8665_v0 = vld [vmem:[%s11630_s3 + $0xc0] ss:$8 sps:$4 sm:$0xff]  }
 0x2a0   : > { %v11271_v48 = vadd.f32 %v4594_v61, %v11098_v10  ;;  %6262 = vmatpush1.bf16.msra.mxu1 %v8656_v14 }
 0x2a1   : > { %v4487_v25 = vpop.f32.mrb[68].mxu1  ;;  %6263 = vmatprep.subr.bf16.mxu1 %v8661_v12 }
 0x2a2   : > { %v4489_v38 = vpop.f32.mrb[69].mxu1  ;;  %v4595_v39 = vrot.slane %v4487_v25, 3 }
 0x2a3   : > { %v4491_v36 = vpop.f32.mrb[70].mxu1  ;;  %v4598_v4 = vrot.slane %v4489_v38, 3 }
 0x2a4   : > { %v4596_v60 = vrot.slane %v4491_v36, 3  ;;  %v4493_v50 = vpop.f32.mrb[71].mxu1  ;;  %6264 = vmatpush1.bf16.msra.mxu1 %v8659_v37 }
 0x2a5   : > { %v4599_v10 = vrot.slane %v4493_v50, 3 }
 0x2a6   : > { %v4597_v3 = vsel %vm4588_vm2, %v4595_v39, %v4596_v60  ;;  %v11284_v52 = vadd.f32 %v4596_v60, %v11102_v27  ;;  %v8664_v27 = vld [vmem:[%s11630_s3 + $0xb4] ss:$8 sps:$4 sm:$0xff]   ;;  %v8671_v39 = vld [vmem:[%s11630_s3 + $0xe0] ss:$8 sps:$4 sm:$0xff]  }
 0x2a7   : > { %v11290_v21 = vadd.f32 %v4597_v3, %v11106_v40  ;;  %v4600_v28 = vsel %vm4588_vm2, %v4598_v4, %v4599_v10  ;;  %v11294_v18 = vadd.f32 %v4599_v10, %v11110_v20  ;;  %v8662_v40 = vld [vmem:[%s11630_s3 + $0xb0] ss:$8 sps:$4 sm:$0xff]   ;;  %6265 = vmatprep.subr.bf16.mxu1 %v8664_v27  ;;  %v8676_v4 = vld [vmem:[%s11630_s3 + $0xf4] ss:$8 sps:$4 sm:$0xff]  }
 0x2a8   : > { %v11297_v16 = vadd.f32 %v4600_v28, %v11114_v41  ;;  %6266 = vmatpush1.bf16.msra.mxu1 %v8662_v40  ;;  %v8674_v27 = vld [vmem:[%s11630_s3 + $0xf0] ss:$8 sps:$4 sm:$0xff]  }
 0x2a9   : > { %v4497_v1 = vpop.f32.mrb[72].mxu1  ;;  %6267 = vmatprep.subr.bf16.mxu1 %v8667_v31 }
 0x2aa   : > { %v4499_v11 = vpop.f32.mrb[73].mxu1  ;;  %v4601_v54 = vrot.slane %v4497_v1, 3 }
 0x2ab   : > { %v4501_v34 = vpop.f32.mrb[74].mxu1  ;;  %v4604_v57 = vrot.slane %v4499_v11, 3 }
 0x2ac   : > { %v4602_v20 = vrot.slane %v4501_v34, 3  ;;  %v4503_v46 = vpop.f32.mrb[75].mxu1  ;;  %6268 = vmatpush1.bf16.msra.mxu1 %v8665_v0 }
 0x2ad   : > { %v4605_v41 = vrot.slane %v4503_v46, 3 }
 0x2ae   : > { %v4603_v13 = vsel %vm4588_vm2, %v4601_v54, %v4602_v20  ;;  %v11310_v2 = vadd.f32 %v4602_v20, %v11118_v53  ;;  %v8670_v53 = vld [vmem:[%s11630_s3 + $0xd4] ss:$8 sps:$4 sm:$0xff]  }
 0x2af   : > { %v11316_v30 = vadd.f32 %v4603_v13, %v11122_v35  ;;  %v4606_v59 = vsel %vm4588_vm2, %v4604_v57, %v4605_v41  ;;  %v11320_v23 = vadd.f32 %v4605_v41, %v11126_v58  ;;  %v8668_v35 = vld [vmem:[%s11630_s3 + $0xd0] ss:$8 sps:$4 sm:$0xff]   ;;  %6269 = vmatprep.subr.bf16.mxu1 %v8670_v53  ;;  %v8673_v58 = vld [vmem:[%s11630_s3 + $0xe4] ss:$8 sps:$4 sm:$0xff]  }
 0x2b0   : > { %v11323_v61 = vadd.f32 %v4606_v59, %v11130_v26  ;;  %6270 = vmatpush1.bf16.msra.mxu1 %v8668_v35  ;;  %v8677_v13 = vld [vmem:[%s11632_s5 + $0x40] sm:$0xff]  }
 0x2b1   : > { %v4507_v25 = vpop.f32.mrb[76].mxu1  ;;  %6271 = vmatprep.subr.bf16.mxu1 %v8673_v58 }
 0x2b2   : > { %v4509_v45 = vpop.f32.mrb[77].mxu1  ;;  %v4607_v14 = vrot.slane %v4507_v25, 3 }
 0x2b3   : > { %v4511_v38 = vpop.f32.mrb[78].mxu1  ;;  %v4610_v60 = vrot.slane %v4509_v45, 3 }
 0x2b4   : > { %v4608_v26 = vrot.slane %v4511_v38, 3  ;;  %v4513_v36 = vpop.f32.mrb[79].mxu1  ;;  %6272 = vmatpush1.bf16.msra.mxu1 %v8671_v39 }
 0x2b5   : > { %v4611_v50 = vrot.slane %v4513_v36, 3  ;;  %6273 = vmatprep.subr.bf16.mxu1 %v8676_v4 }
 0x2b6   : > { %v4609_v10 = vsel %vm4588_vm2, %v4607_v14, %v4608_v26  ;;  %v11342_v12 = vadd.f32 %v4608_v26, %v11134_v9 }
 0x2b7   : > { %v11345_v3 = vadd.f32 %v4609_v10, %v11138_v5  ;;  %v4612_v37 = vsel %vm4588_vm2, %v4610_v60, %v4611_v50  ;;  %v11349_v28 = vadd.f32 %v4611_v50, %v11142_v15 }
 0x2b8   : > { %v11352_v1 = vadd.f32 %v4612_v37, %v11146_v8  ;;  %6274 = vmatpush1.bf16.msra.mxu1 %v8674_v27 }
 0x2b9   : > { %v4517_v11 = vpop.f32.mrb[80].mxu1  ;;  %7486 = vmatprep.subr.bf16.mxu1 %v8677_v13 }
 0x2ba   : > { %v4519_v9 = vpop.f32.mrb[81].mxu1  ;;  %v4613_v34 = vrot.slane %v4517_v11, 3 }
 0x2bb   : > { %v4521_v40 = vpop.f32.mrb[82].mxu1  ;;  %v4616_v20 = vrot.slane %v4519_v9, 3 }
 0x2bc   : > { %v4614_v5 = vrot.slane %v4521_v40, 3  ;;  %v4523_v54 = vpop.f32.mrb[83].mxu1 }
 0x2bd   : > { %v4617_v46 = vrot.slane %v4523_v54, 3 }
 0x2be   : > { %v4615_v15 = vsel %vm4588_vm2, %v4613_v34, %v4614_v5  ;;  %v11359_v8 = vadd.f32 %v4614_v5, %v11150_v33  ;;  %v5764_v34 = vlaneseq }
 0x2bf   : > { %v11362_v57 = vadd.f32 %v4615_v15, %v11154_v7  ;;  %v4618_v41 = vsel %vm4588_vm2, %v4616_v20, %v4617_v46  ;;  %v11366_v31 = vadd.f32 %v4617_v46, %v11158_v49 }
 0x2c0   : > { %v11372_v0 = vadd.f32 %v4618_v41, %v11161_v24 }
 0x2c1   : > { %v4527_v59 = vpop.f32.mrb[84].mxu1 }
 0x2c2   : > { %v4529_v25 = vpop.f32.mrb[85].mxu1  ;;  %v4619_v53 = vrot.slane %v4527_v59, 3 }
 0x2c3   : > { %v4531_v33 = vpop.f32.mrb[86].mxu1  ;;  %v4622_v35 = vrot.slane %v4529_v25, 3 }
 0x2c4   : > { %v4620_v45 = vrot.slane %v4531_v33, 3  ;;  %v4533_v7 = vpop.f32.mrb[87].mxu1 }
 0x2c5   : > { %v4623_v38 = vrot.slane %v4533_v7, 3 }
 0x2c6   : > { %v4621_v58 = vsel %vm4588_vm2, %v4619_v53, %v4620_v45  ;;  %v11376_v49 = vadd.f32 %v4620_v45, %v11165_v19 }
 0x2c7   : > { %v11379_v14 = vadd.f32 %v4621_v58, %v11168_v56  ;;  %v4624_v24 = vsel %vm4588_vm2, %v4622_v35, %v4623_v38  ;;  %v11383_v26 = vadd.f32 %v4623_v38, %v11172_v17  ;;  %v5762_v35 = vld [vmem:[%s11629_s2] sm:$0x3] }
 0x2c8   : > { %v11386_v36 = vadd.f32 %v4624_v24, %v11175_v43 }
 0x2c9   : > { %v4537_v39 = vpop.f32.mrb[88].mxu1 }
 0x2ca   : > { %v4539_v60 = vpop.f32.mrb[89].mxu1  ;;  %v4625_v4 = vrot.slane %v4537_v39, 3 }
 0x2cb   : > { %v4541_v50 = vpop.f32.mrb[90].mxu1  ;;  %v4628_v27 = vrot.slane %v4539_v60, 3 }
 0x2cc   : > { %v4626_v10 = vrot.slane %v4541_v50, 3  ;;  %v4543_v37 = vpop.f32.mrb[91].mxu1 }
 0x2cd   : > { %v4629_v19 = vrot.slane %v4543_v37, 3 }
 0x2ce   : > { %v4627_v11 = vsel %vm4588_vm2, %v4625_v4, %v4626_v10  ;;  %v11390_v56 = vadd.f32 %v4626_v10, %v11179_v29  ;;  %v11402_v29 = vshrl.u32 %v5764_v34, 7 }
 0x2cf   : > { %v11393_v9 = vadd.f32 %v4627_v11, %v11182_v55  ;;  %v4630_v17 = vsel %vm4588_vm2, %v4628_v27, %v4629_v19  ;;  %v11397_v43 = vadd.f32 %v4629_v19, %v11186_v47 }
 0x2d0   : > { %v11400_v40 = vadd.f32 %v4630_v17, %v11189_v42  ;;  %v5766_v45 = vsub.s32 0, %v11402_v29 }
 0x2d1   : > { %v4547_v5 = vpop.f32.mrb[92].mxu1 }
 0x2d2   : > { %v4549_v54 = vpop.f32.mrb[93].mxu1  ;;  %v4631_v46 = vrot.slane %v4547_v5, 3 }
 0x2d3   : > { %v4551_v20 = vpop.f32.mrb[94].mxu1  ;;  %v4634_v13 = vrot.slane %v4549_v54, 3 }
 0x2d4   : > { %v4632_v15 = vrot.slane %v4551_v20, 3  ;;  %v4553_v41 = vpop.f32.mrb[95].mxu1 }
 0x2d5   : > { %v4635_v55 = vrot.slane %v4553_v41, 3 }
 0x2d6   : > { %v4633_v59 = vsel %vm4588_vm2, %v4631_v46, %v4632_v15  ;;  %v11406_v25 = vadd.f32 %v4632_v15, %v11193_v22  ;;  %v5770_v22 = vsub.s32 1, %v11402_v29 }
 0x2d7   : > { %v11409_v47 = vadd.f32 %v4633_v59, %v11196_v62  ;;  %v4636_v42 = vsel %vm4588_vm2, %v4634_v13, %v4635_v55  ;;  %v11413_v33 = vadd.f32 %v4635_v55, %v11200_v6  ;;  %v11425_v6 = vrot.slane %v5762_v35, %v5766_v45 }
 0x2d8   : > { %v11416_v53 = vadd.f32 %v4636_v42, %v11203_v32  ;;  %v11429_v50 = vrot.slane %v5762_v35, %v5770_v22 }
 0x2da   : > { %v5538_v7 = vpop.f32.mrb[64].mxu0 }
 0x2db   : > { %v5540_v38 = vpop.f32.mrb[65].mxu0  ;;  %v5650_v58 = vrot.slane %v5538_v7, 4 }
 0x2dc   : > { %v5542_v62 = vpop.f32.mrb[66].mxu0  ;;  %v5653_v39 = vrot.slane %v5540_v38, 4 }
 0x2dd   : > { %v5651_v24 = vrot.slane %v5542_v62, 4  ;;  %v5544_v32 = vpop.f32.mrb[67].mxu0 }
 0x2de   : > { %v5654_v60 = vrot.slane %v5544_v32, 4 }
 0x2df   : > { %v5652_v4 = vsel %vm5649_vm3, %v5650_v58, %v5651_v24  ;;  %v5732_v10 = vadd.f32 %v5651_v24, %v11258_v44 }
 0x2e0   : > { %v5730_v37 = vadd.f32 %v5652_v4, %v11264_v63  ;;  %v5655_v27 = vsel %vm5649_vm3, %v5653_v39, %v5654_v60  ;;  %v5733_v19 = vadd.f32 %v5654_v60, %v11268_v51 }
 0x2e1   : > { %v5776_v11 = vadd.f32 %v11425_v6, %v5732_v10  ;;  %v5731_v17 = vadd.f32 %v5655_v27, %v11271_v48 }
 0x2e2   : > { %v5774_v34 = vadd.f32 %v11425_v6, %v5730_v37  ;;  %v5777_v5 = vadd.f32 %v11429_v50, %v5733_v19  ;;  %v5548_v54 = vpop.f32.mrb[68].mxu0 }
 0x2e3   : > { %v5808_v20 = vmax.f32 %v5776_v11, 0.0  ;;  %v5775_v46 = vadd.f32 %v11429_v50, %v5731_v17  ;;  %v5550_v15 = vpop.f32.mrb[69].mxu0  ;;  %v5656_v51 = vrot.slane %v5548_v54, 4 }
 0x2e4   : > { %v5806_v44 = vmax.f32 %v5774_v34, 0.0  ;;  %v5809_v41 = vmax.f32 %v5777_v5, 0.0  ;;  %v5552_v63 = vpop.f32.mrb[70].mxu0  ;;  %v5659_v35 = vrot.slane %v5550_v15, 4 }
 0x2e5   : > { %v5838_v13 = vsel %vm5649_vm3, %v5808_v20, -inf  ;;  %v5807_v55 = vmax.f32 %v5775_v46, 0.0  ;;  %v5657_v59 = vrot.slane %v5552_v63, 4  ;;  %v5554_v42 = vpop.f32.mrb[71].mxu0 }
 0x2e6   : > { %v5839_v7 = vmax.f32 %v5806_v44, %v5838_v13  ;;  %v5846_v48 = vsel %vm5649_vm3, %v5809_v41, -inf  ;;  %v5660_v38 = vrot.slane %v5554_v42, 4 }
 0x2e7   : > { %v5847_v62 = vmax.f32 %v5807_v55, %v5846_v48  ;;  %v5658_v58 = vsel %vm5649_vm3, %v5656_v51, %v5657_v59  ;;  %v5736_v24 = vadd.f32 %v5657_v59, %v11284_v52 }
 0x2e8   : > { %v5840_v32 = vrot.slane %v5839_v7, 4  ;;  %v5734_v39 = vadd.f32 %v5658_v58, %v11290_v21  ;;  %v5661_v60 = vsel %vm5649_vm3, %v5659_v35, %v5660_v38  ;;  %v5737_v4 = vadd.f32 %v5660_v38, %v11294_v18 }
 0x2e9   : > { %v5848_v10 = vrot.slane %v5847_v62, 4  ;;  %v5780_v37 = vadd.f32 %v11425_v6, %v5736_v24  ;;  %v5735_v27 = vadd.f32 %v5661_v60, %v11297_v16 }
 0x2ea   : > { %v5841_v19 = vmax.f32 %v5839_v7, %v5840_v32  ;;  %v5778_v11 = vadd.f32 %v11425_v6, %v5734_v39  ;;  %v5781_v17 = vadd.f32 %v11429_v50, %v5737_v4  ;;  %v5558_v34 = vpop.f32.mrb[72].mxu0 }
 0x2eb   : > { %v5849_v5 = vmax.f32 %v5847_v62, %v5848_v10  ;;  %v5812_v52 = vmax.f32 %v5780_v37, 0.0  ;;  %v5779_v54 = vadd.f32 %v11429_v50, %v5735_v27  ;;  %v5662_v21 = vrot.slane %v5558_v34, 4  ;;  %v5560_v20 = vpop.f32.mrb[73].mxu0 }
 0x2ec   : > { %v5842_v46 = vrot.slane %v5841_v19, 2  ;;  %v5810_v15 = vmax.f32 %v5778_v11, 0.0  ;;  %v5813_v18 = vmax.f32 %v5781_v17, 0.0  ;;  %v5665_v44 = vrot.slane %v5560_v20, 4  ;;  %v5562_v41 = vpop.f32.mrb[74].mxu0 }
 0x2ed   : > { %v5850_v63 = vrot.slane %v5849_v5, 2  ;;  %v5854_v16 = vsel %vm5649_vm3, %v5812_v52, -inf  ;;  %v5811_v13 = vmax.f32 %v5779_v54, 0.0  ;;  %v5663_v55 = vrot.slane %v5562_v41, 4  ;;  %v5564_v51 = vpop.f32.mrb[75].mxu0 }
 0x2ee   : > { %v5843_v59 = vmax.f32 %v5841_v19, %v5842_v46  ;;  %v5855_v42 = vmax.f32 %v5810_v15, %v5854_v16  ;;  %v5862_v7 = vsel %vm5649_vm3, %v5813_v18, -inf  ;;  %v5666_v48 = vrot.slane %v5564_v51, 4 }
 0x2ef   : > { %v5851_v35 = vmax.f32 %v5849_v5, %v5850_v63  ;;  %v5863_v38 = vmax.f32 %v5811_v13, %v5862_v7  ;;  %v5664_v62 = vsel %vm5649_vm3, %v5662_v21, %v5663_v55  ;;  %v5740_v58 = vadd.f32 %v5663_v55, %v11310_v2 }
 0x2f0   : > { %v5844_v24 = vrot.slane %v5843_v59, 1  ;;  %v5856_v32 = vrot.slane %v5855_v42, 4  ;;  %v5738_v39 = vadd.f32 %v5664_v62, %v11316_v30  ;;  %v5667_v60 = vsel %vm5649_vm3, %v5665_v44, %v5666_v48 }
 0x2f1   : > { %v5852_v4 = vrot.slane %v5851_v35, 1  ;;  %v5864_v10 = vrot.slane %v5863_v38, 4  ;;  %v5784_v37 = vadd.f32 %v11425_v6, %v5740_v58  ;;  %v5739_v27 = vadd.f32 %v5667_v60, %v11323_v61 }
 0x2f2   : > { %v5845_v19 = vmax.f32 %v5843_v59, %v5844_v24  ;;  %v5857_v11 = vmax.f32 %v5855_v42, %v5856_v32  ;;  %v5782_v17 = vadd.f32 %v11425_v6, %v5738_v39  ;;  %v5741_v34 = vadd.f32 %v5666_v48, %v11320_v23  ;;  %v5568_v5 = vpop.f32.mrb[76].mxu0 }
 0x2f3   : > { %v5853_v2 = vmax.f32 %v5851_v35, %v5852_v4  ;;  %v5865_v52 = vmax.f32 %v5863_v38, %v5864_v10  ;;  %v5816_v54 = vmax.f32 %v5784_v37, 0.0  ;;  %v5783_v30 = vadd.f32 %v11429_v50, %v5739_v27  ;;  %v5570_v21 = vpop.f32.mrb[77].mxu0 }
 0x2f4   : > { %v5966_v20 = vpack.c.bf16 %v5845_v19, %v5845_v19  ;;  %v5858_v46 = vrot.slane %v5857_v11, 2  ;;  %v5814_v15 = vmax.f32 %v5782_v17, 0.0  ;;  %v5785_v18 = vadd.f32 %v11429_v50, %v5741_v34  ;;  %v5572_v44 = vpop.f32.mrb[78].mxu0 }
 0x2f5   : > { %v5866_v61 = vrot.slane %v5865_v52, 2  ;;  %v5870_v41 = vsel %vm5649_vm3, %v5816_v54, -inf  ;;  %v5815_v63 = vmax.f32 %v5783_v30, 0.0  ;;  %v5574_v16 = vpop.f32.mrb[79].mxu0  ;;  %v5967_v59 = vpack.c.bf16 %v5853_v2, %v5853_v2 }
 0x2f6   : > { %v5859_v13 = vmax.f32 %v5857_v11, %v5858_v46  ;;  %v5871_v23 = vmax.f32 %v5814_v15, %v5870_v41  ;;  %v5817_v55 = vmax.f32 %v5785_v18, 0.0  ;;  %v6042_v51 = vunpack.c.l.b16 %v5966_v20 }
 0x2f7   : > { %v5867_v42 = vmax.f32 %v5865_v52, %v5866_v61  ;;  %v5668_v7 = vrot.slane %v5568_v5, 4  ;;  %v5669_v62 = vrot.slane %v5572_v44, 4  ;;  %v5671_v32 = vrot.slane %v5570_v21, 4 }
 0x2f8   : > { %v5860_v48 = vrot.slane %v5859_v13, 1  ;;  %v5872_v35 = vrot.slane %v5871_v23, 4  ;;  %v5878_v38 = vsel %vm5649_vm3, %v5817_v55, -inf  ;;  %v5672_v39 = vrot.slane %v5574_v16, 4 }
 0x2f9   : > { %v5868_v58 = vrot.slane %v5867_v42, 1  ;;  %v5879_v24 = vmax.f32 %v5815_v63, %v5878_v38  ;;  %v5670_v10 = vsel %vm5649_vm3, %v5668_v7, %v5669_v62  ;;  %v5744_v37 = vadd.f32 %v5669_v62, %v11342_v12 }
 0x2fa   : > { %v5861_v60 = vmax.f32 %v5859_v13, %v5860_v48  ;;  %v5873_v4 = vmax.f32 %v5871_v23, %v5872_v35  ;;  %v5578_v27 = vpop.f32.mrb[80].mxu0  ;;  %v5742_v17 = vadd.f32 %v5670_v10, %v11345_v3  ;;  %v5673_v34 = vsel %vm5649_vm3, %v5671_v32, %v5672_v39 }
 0x2fb   : > { %v5869_v19 = vmax.f32 %v5867_v42, %v5868_v58  ;;  %v5880_v11 = vrot.slane %v5879_v24, 4  ;;  %v5580_v5 = vpop.f32.mrb[81].mxu0  ;;  %v5788_v54 = vadd.f32 %v11425_v6, %v5744_v37  ;;  %v5743_v30 = vadd.f32 %v5673_v34, %v11352_v1 }
 0x2fc   : > { %v5968_v2 = vpack.c.bf16 %v5861_v60, %v5861_v60  ;;  %v5874_v52 = vrot.slane %v5873_v4, 2  ;;  %v5582_v21 = vpop.f32.mrb[82].mxu0  ;;  %v5786_v15 = vadd.f32 %v11425_v6, %v5742_v17  ;;  %v5745_v12 = vadd.f32 %v5672_v39, %v11349_v28 }
 0x2fd   : > { %v5969_v20 = vpack.c.bf16 %v5869_v19, %v5869_v19  ;;  %v5881_v46 = vmax.f32 %v5879_v24, %v5880_v11  ;;  %v5584_v18 = vpop.f32.mrb[83].mxu0  ;;  %v5820_v3 = vmax.f32 %v5788_v54, 0.0  ;;  %v5787_v41 = vadd.f32 %v11429_v50, %v5743_v30 }
 0x2fe   : > { %v6044_v44 = vunpack.c.l.b16 %v5968_v2  ;;  %v5875_v61 = vmax.f32 %v5873_v4, %v5874_v52  ;;  %v11476_v63 = vunpack.c.l.b16 %v5967_v59  ;;  %v5818_v13 = vmax.f32 %v5786_v15, 0.0 }
 0x2ff   : > { %v5882_v16 = vrot.slane %v5881_v46, 2  ;;  %v5789_v23 = vadd.f32 %v11429_v50, %v5745_v12  ;;  %v5886_v42 = vsel %vm5649_vm3, %v5820_v3, -inf  ;;  %v5819_v7 = vmax.f32 %v5787_v41, 0.0 }
 0x300   : > { %v11480_v1 = vsel %vm6058_vm4, %v6044_v44, %v6042_v51  ;;  %v5876_v55 = vrot.slane %v5875_v61, 1  ;;  %v11483_v28 = vunpack.c.l.b16 %v5969_v20  ;;  %v5887_v35 = vmax.f32 %v5818_v13, %v5886_v42 }
 0x301   : > { %v5883_v48 = vmax.f32 %v5881_v46, %v5882_v16  ;;  %v5821_v38 = vmax.f32 %v5789_v23, 0.0  ;;  %v5674_v58 = vrot.slane %v5578_v27, 4  ;;  %v5675_v59 = vrot.slane %v5582_v21, 4 }
 0x302   : > { %v5877_v62 = vmax.f32 %v5875_v61, %v5876_v55  ;;  %v5678_v24 = vrot.slane %v5584_v18, 4  ;;  %v5588_v32 = vpop.f32.mrb[84].mxu0  ;;  %v5888_v60 = vrot.slane %v5887_v35, 4  ;;  %v5677_v51 = vrot.slane %v5580_v5, 4 }
 0x303   : > { %v5884_v39 = vrot.slane %v5883_v48, 1  ;;  %v5894_v4 = vsel %vm5649_vm3, %v5821_v38, -inf  ;;  %v5590_v10 = vpop.f32.mrb[85].mxu0  ;;  %v5676_v11 = vsel %vm5649_vm3, %v5674_v58, %v5675_v59  ;;  %v5748_v17 = vadd.f32 %v5675_v59, %v11359_v8 }
 0x304   : > { %v5970_v37 = vpack.c.bf16 %v5877_v62, %v5877_v62  ;;  %v5895_v19 = vmax.f32 %v5819_v7, %v5894_v4  ;;  %v5592_v34 = vpop.f32.mrb[86].mxu0  ;;  %v5889_v52 = vmax.f32 %v5887_v35, %v5888_v60  ;;  %v5746_v27 = vadd.f32 %v5676_v11, %v11362_v57 }
 0x305   : > { %v5885_v2 = vmax.f32 %v5883_v48, %v5884_v39  ;;  %v5679_v54 = vsel %vm5649_vm3, %v5677_v51, %v5678_v24  ;;  %v5594_v30 = vpop.f32.mrb[87].mxu0  ;;  %v5792_v20 = vadd.f32 %v11425_v6, %v5748_v17  ;;  %v5680_v46 = vrot.slane %v5588_v32, 4 }
 0x306   : > { %v5896_v21 = vrot.slane %v5895_v19, 4  ;;  %v5747_v5 = vadd.f32 %v5679_v54, %v11372_v0  ;;  %v11492_v15 = vunpack.c.l.b16 %v5970_v37  ;;  %v5890_v12 = vrot.slane %v5889_v52, 2 }
 0x307   : > { %v5790_v18 = vadd.f32 %v11425_v6, %v5746_v27  ;;  %v5749_v8 = vadd.f32 %v5678_v24, %v11366_v31  ;;  %v5971_v44 = vpack.c.bf16 %v5885_v2, %v5885_v2  ;;  %v5824_v3 = vmax.f32 %v5792_v20, 0.0 }
 0x308   : > { %v5897_v61 = vmax.f32 %v5895_v19, %v5896_v21  ;;  %v5791_v57 = vadd.f32 %v11429_v50, %v5747_v5  ;;  %v5891_v41 = vmax.f32 %v5889_v52, %v5890_v12  ;;  %v5683_v23 = vrot.slane %v5590_v10, 4 }
 0x309   : > { %v5822_v16 = vmax.f32 %v5790_v18, 0.0  ;;  %v5793_v13 = vadd.f32 %v11429_v50, %v5749_v8  ;;  %v5902_v0 = vsel %vm5649_vm3, %v5824_v3, -inf  ;;  %v5681_v7 = vrot.slane %v5592_v34, 4 }
 0x30a   : > { %v5898_v55 = vrot.slane %v5897_v61, 2  ;;  %v5823_v42 = vmax.f32 %v5791_v57, 0.0  ;;  %v5598_v48 = vpop.f32.mrb[88].mxu0  ;;  %v5892_v35 = vrot.slane %v5891_v41, 1  ;;  %v5684_v31 = vrot.slane %v5594_v30, 4 }
 0x30b   : > { %v5903_v38 = vmax.f32 %v5822_v16, %v5902_v0  ;;  %v5825_v62 = vmax.f32 %v5793_v13, 0.0  ;;  %v5600_v58 = vpop.f32.mrb[89].mxu0  ;;  %v11499_v59 = vunpack.c.l.b16 %v5971_v44  ;;  %v5682_v32 = vsel %vm5649_vm3, %v5680_v46, %v5681_v7 }
 0x30c   : > { %v5899_v24 = vmax.f32 %v5897_v61, %v5898_v55  ;;  %v5752_v39 = vadd.f32 %v5681_v7, %v11376_v49  ;;  %v5602_v60 = vpop.f32.mrb[90].mxu0  ;;  %v5893_v4 = vmax.f32 %v5891_v41, %v5892_v35  ;;  %v5750_v37 = vadd.f32 %v5682_v32, %v11379_v14 }
 0x30d   : > { %v5904_v51 = vrot.slane %v5903_v38, 4  ;;  %v5910_v10 = vsel %vm5649_vm3, %v5825_v62, -inf  ;;  %v5604_v19 = vpop.f32.mrb[91].mxu0  ;;  %v5685_v2 = vsel %vm5649_vm3, %v5683_v23, %v5684_v31  ;;  %v5753_v5 = vadd.f32 %v5684_v31, %v11383_v26 }
 0x30e   : > { %v5900_v11 = vrot.slane %v5899_v24, 1  ;;  %v5911_v17 = vmax.f32 %v5823_v42, %v5910_v10  ;;  %v5796_v34 = vadd.f32 %v11425_v6, %v5752_v39  ;;  %v5972_v52 = vpack.c.bf16 %v5893_v4, %v5893_v4 }
 0x30f   : > { %v5905_v27 = vmax.f32 %v5903_v38, %v5904_v51  ;;  %v5794_v54 = vadd.f32 %v11425_v6, %v5750_v37  ;;  %v5751_v49 = vadd.f32 %v5685_v2, %v11386_v36  ;;  %v5686_v18 = vrot.slane %v5598_v48, 4 }
 0x310   : > { %v5901_v30 = vmax.f32 %v5899_v24, %v5900_v11  ;;  %v5912_v21 = vrot.slane %v5911_v17, 4  ;;  %v5828_v20 = vmax.f32 %v5796_v34, 0.0  ;;  %v5797_v3 = vadd.f32 %v11429_v50, %v5753_v5 }
 0x311   : > { %v5906_v46 = vrot.slane %v5905_v27, 2  ;;  %v5826_v14 = vmax.f32 %v5794_v54, 0.0  ;;  %v5795_v12 = vadd.f32 %v11429_v50, %v5751_v49  ;;  %v11515_v41 = vunpack.c.l.b16 %v5972_v52 }
 0x312   : > { %v5973_v8 = vpack.c.bf16 %v5901_v30, %v5901_v30  ;;  %v5913_v44 = vmax.f32 %v5911_v17, %v5912_v21  ;;  %v5918_v61 = vsel %vm5649_vm3, %v5828_v20, -inf  ;;  %v11513_v57 = vpop.f32.mrb[92].mxu0  ;;  %v5829_v55 = vmax.f32 %v5797_v3, 0.0 }
 0x313   : > { %v5907_v36 = vmax.f32 %v5905_v27, %v5906_v46  ;;  %v5919_v16 = vmax.f32 %v5826_v14, %v5918_v61  ;;  %v5827_v13 = vmax.f32 %v5795_v12, 0.0  ;;  %v11517_v23 = vpop.f32.mrb[93].mxu0  ;;  %v5689_v0 = vrot.slane %v5600_v58, 4 }
 0x314   : > { %v5914_v26 = vrot.slane %v5913_v44, 2  ;;  %v5687_v42 = vrot.slane %v5602_v60, 4  ;;  %v5612_v7 = vpop.f32.mrb[94].mxu0  ;;  %v11519_v48 = vunpack.c.l.b16 %v5973_v8  ;;  %v5690_v62 = vrot.slane %v5604_v19, 4 }
 0x315   : > { %v5908_v35 = vrot.slane %v5907_v36, 1  ;;  %v5920_v38 = vrot.slane %v5919_v16, 4  ;;  %v5614_v31 = vpop.f32.mrb[95].mxu0  ;;  %v5926_v32 = vsel %vm5649_vm3, %v5829_v55, -inf  ;;  %v5692_v5 = vrot.slane %v11513_v57, 4 }
 0x316   : > { %v5915_v24 = vmax.f32 %v5913_v44, %v5914_v26  ;;  %v5688_v39 = vsel %vm5649_vm3, %v5686_v18, %v5687_v42  ;;  %v5756_v4 = vadd.f32 %v5687_v42, %v11390_v56  ;;  %v5927_v37 = vmax.f32 %v5827_v13, %v5926_v32 }
 0x317   : > { %v5909_v51 = vmax.f32 %v5907_v36, %v5908_v35  ;;  %v5921_v10 = vmax.f32 %v5919_v16, %v5920_v38  ;;  %v5754_v58 = vadd.f32 %v5688_v39, %v11393_v9  ;;  %v5691_v17 = vsel %vm5649_vm3, %v5689_v0, %v5690_v62 }
 0x318   : > { %v5916_v60 = vrot.slane %v5915_v24, 1  ;;  %v5800_v11 = vadd.f32 %v11425_v6, %v5756_v4  ;;  %v5757_v19 = vadd.f32 %v5690_v62, %v11397_v43  ;;  %v5928_v52 = vrot.slane %v5927_v37, 4 }
 0x319   : > { %v5974_v34 = vpack.c.bf16 %v5909_v51, %v5909_v51  ;;  %v5922_v2 = vrot.slane %v5921_v10, 2  ;;  %v5798_v27 = vadd.f32 %v11425_v6, %v5754_v58  ;;  %v5755_v56 = vadd.f32 %v5691_v17, %v11400_v40 }
 0x31a   : > { %v5917_v54 = vmax.f32 %v5915_v24, %v5916_v60  ;;  %v5832_v49 = vmax.f32 %v5800_v11, 0.0  ;;  %v5801_v30 = vadd.f32 %v11429_v50, %v5757_v19  ;;  %v5929_v21 = vmax.f32 %v5927_v37, %v5928_v52 }
 0x31b   : > { %v5923_v9 = vmax.f32 %v5921_v10, %v5922_v2  ;;  %v5830_v20 = vmax.f32 %v5798_v27, 0.0  ;;  %v6050_v46 = vunpack.c.l.b16 %v5974_v34  ;;  %v5799_v14 = vadd.f32 %v11429_v50, %v5755_v56 }
 0x31c   : > { %v5934_v43 = vsel %vm5649_vm3, %v5832_v49, -inf  ;;  %v5833_v12 = vmax.f32 %v5801_v30, 0.0  ;;  %v5975_v18 = vpack.c.bf16 %v5917_v54, %v5917_v54  ;;  %v5930_v44 = vrot.slane %v5929_v21, 2 }
 0x31d   : > { %v5924_v8 = vrot.slane %v5923_v9, 1  ;;  %v5935_v61 = vmax.f32 %v5830_v20, %v5934_v43  ;;  %v5831_v40 = vmax.f32 %v5799_v14, 0.0  ;;  %v5695_v36 = vrot.slane %v11517_v23, 4 }
 0x31e   : > { %v5942_v3 = vsel %vm5649_vm3, %v5833_v12, -inf  ;;  %v5693_v16 = vrot.slane %v5612_v7, 4  ;;  %v5931_v57 = vmax.f32 %v5929_v21, %v5930_v44  ;;  %v5696_v55 = vrot.slane %v5614_v31, 4 }
 0x31f   : > { %v5925_v13 = vmax.f32 %v5923_v9, %v5924_v8  ;;  %v5936_v26 = vrot.slane %v5935_v61, 4  ;;  %v5943_v0 = vmax.f32 %v5831_v40, %v5942_v3  ;;  %v6061_v38 = vsel %vm6060_vm5, %v11492_v15, %v11480_v1 }
 0x320   : > { %v5694_v42 = vsel %vm5649_vm3, %v5692_v5, %v5693_v16  ;;  %v5760_v35 = vadd.f32 %v5693_v16, %v11406_v25  ;;  %v5932_v24 = vrot.slane %v5931_v57, 1  ;;  %v5697_v4 = vsel %vm5649_vm3, %v5695_v36, %v5696_v55 }
 0x321   : > { %v5976_v62 = vpack.c.bf16 %v5925_v13, %v5925_v13  ;;  %v5937_v32 = vmax.f32 %v5935_v61, %v5936_v26  ;;  %v5758_v39 = vadd.f32 %v5694_v42, %v11409_v47  ;;  %v5944_v23 = vrot.slane %v5943_v0, 4 }
 0x322   : > { %v5804_v7 = vadd.f32 %v11425_v6, %v5760_v35  ;;  %v5761_v31 = vadd.f32 %v5696_v55, %v11413_v33  ;;  %v5933_v10 = vmax.f32 %v5931_v57, %v5932_v24  ;;  %v5759_v1 = vadd.f32 %v5697_v4, %v11416_v53  ;;  %v8678_v4 = vld [vmem:[%s11632_s5] sm:$0xff]  }
 0x323   : > { %v6052_v51 = vunpack.c.l.b16 %v5976_v62  ;;  %v5938_v37 = vrot.slane %v5937_v32, 2  ;;  %v5802_v25 = vadd.f32 %v11425_v6, %v5758_v39  ;;  %v5945_v58 = vmax.f32 %v5943_v0, %v5944_v23 }
 0x324   : > { %v5836_v60 = vmax.f32 %v5804_v7, 0.0  ;;  %v5805_v15 = vadd.f32 %v11429_v50, %v5761_v31  ;;  %v5977_v17 = vpack.c.bf16 %v5933_v10, %v5933_v10  ;;  %v6063_v19 = vsel %vm6062_vm6, %v11515_v41, %v6061_v38  ;;  %v8680_v10 = vld [vmem:[%s11632_s5 + $0x8] sm:$0xff]  }
 0x325   : > { %v5939_v11 = vmax.f32 %v5937_v32, %v5938_v37  ;;  %v5834_v47 = vmax.f32 %v5802_v25, 0.0  ;;  %v5946_v34 = vrot.slane %v5945_v58, 2  ;;  %v5803_v2 = vadd.f32 %v11429_v50, %v5759_v1  ;;  %v8681_v37 = vld [vmem:[%s11632_s5 + $0x50] sm:$0xff]   ;;  %v8685_v1 = vld [vmem:[%s11632_s5 + $0x60] sm:$0xff]  }
 0x326   : > { %v5950_v33 = vsel %vm5649_vm3, %v5836_v60, -inf  ;;  %v5837_v52 = vmax.f32 %v5805_v15, 0.0  ;;  %v6051_v27 = vunpack.c.l.b16 %v5975_v18  ;;  %v6065_v49 = vsel %vm6064_vm7, %v6050_v46, %v6063_v19  ;;  %v8682_v25 = vld [vmem:[%s11632_s5 + $0x10] sm:$0xff]   ;;  %v8684_v60 = vld [vmem:[%s11632_s5 + $0x18] sm:$0xff]   ;;  %v8686_v15 = vld [vmem:[%s11632_s5 + $0x20] sm:$0xff]  }
 0x327   : > { %v5940_v6 = vrot.slane %v5939_v11, 1  ;;  %v5951_v54 = vmax.f32 %v5834_v47, %v5950_v33  ;;  %v5947_v53 = vmax.f32 %v5945_v58, %v5946_v34  ;;  %v5835_v56 = vmax.f32 %v5803_v2, 0.0  ;;  %v8683_v58 = vld [vmem:[%s11632_s5 + $0x58] sm:$0xff]   ;;  %v8688_v47 = vld [vmem:[%s11632_s5 + $0x28] sm:$0xff]   ;;  %v8690_v19 = vld [vmem:[%s11632_s5 + $0x30] sm:$0xff]  }
 0x328   : > { %v5958_v30 = vsel %vm5649_vm3, %v5837_v52, -inf  ;;  %v6067_v9 = vsel %vm6066_vm8, %v6052_v51, %v6065_v49  ;;  %v6053_v41 = vunpack.c.l.b16 %v5977_v17  ;;  %v6072_v5 = vsel %vm6058_vm4, %v11483_v28, %v11476_v63  ;;  %v8679_v51 = vld [vmem:[%s11632_s5 + $0x48] sm:$0xff]   ;;  %v8689_v17 = vld [vmem:[%s11632_s5 + $0x70] sm:$0xff]   ;;  %v8691_v34 = vld [vmem:[%s11632_s5 + $0x78] sm:$0xff]  }
 0x329   : > { %v5941_v21 = vmax.f32 %v5939_v11, %v5940_v6  ;;  %v5952_v20 = vrot.slane %v5951_v54, 4  ;;  %v5959_v50 = vmax.f32 %v5835_v56, %v5958_v30  ;;  %v5948_v43 = vrot.slane %v5947_v53, 1  ;;  %v8687_v11 = vld [vmem:[%s11632_s5 + $0x68] sm:$0xff]   ;;  %v8692_v33 = vld [vmem:[%s11632_s5 + $0x38] sm:$0xff]   ;;  %v6014_v2 = vld [vmem:[%s11631_s4] sm:$0x3] }
 0x32a   : > { %v6073_v14 = vsel %vm6060_vm5, %v11499_v59, %v6072_v5  ;;  %v6019_v52 = vrot.slane %v6014_v2, %v5766_v45  ;;  %v7467_v45 = vld [vmem:[%s11633_s6] ss:$0 sm:$0xff] }
 0x32b   : > { %v5978_v12 = vpack.c.bf16 %v5941_v21, %v5941_v21  ;;  %v5953_v46 = vmax.f32 %v5951_v54, %v5952_v20  ;;  %v6074_v18 = vsel %vm6062_vm6, %v11519_v48, %v6073_v14  ;;  %v5960_v8 = vrot.slane %v5959_v50, 4 }
 0x32c   : > { %v5949_v44 = vmax.f32 %v5947_v53, %v5948_v43  ;;  %v6075_v61 = vsel %vm6064_vm7, %v6051_v27, %v6074_v18  ;;  %v6023_v27 = vrot.slane %v6014_v2, %v5770_v22 }
 0x32d   : > { %v6054_v40 = vunpack.c.l.b16 %v5978_v12  ;;  %v5954_v3 = vrot.slane %v5953_v46, 2  ;;  %v6076_v36 = vsel %vm6066_vm8, %v6053_v41, %v6075_v61  ;;  %v5961_v63 = vmax.f32 %v5959_v50, %v5960_v8 }
 0x32e   : > { %v5979_v28 = vpack.c.bf16 %v5949_v44, %v5949_v44 }
 0x32f   : > { %v5955_v16 = vmax.f32 %v5953_v46, %v5954_v3  ;;  %v6069_v13 = vsel %vm6068_vm9, %v6054_v40, %v6067_v9  ;;  %v5962_v57 = vrot.slane %v5961_v63, 2 }
 0x330   : > { %v6055_v59 = vunpack.c.l.b16 %v5979_v28 }
 0x331   : > { %v5956_v26 = vrot.slane %v5955_v16, 1  ;;  %v5963_v55 = vmax.f32 %v5961_v63, %v5962_v57 }
 0x332   : > { %v6077_v0 = vsel %vm6068_vm9, %v6055_v59, %v6076_v36 }
 0x333   : > { %v5957_v42 = vmax.f32 %v5955_v16, %v5956_v26  ;;  %v5964_v48 = vrot.slane %v5963_v55, 1 }
 0x335   : > { %v5980_v35 = vpack.c.bf16 %v5957_v42, %v5957_v42  ;;  %v5965_v38 = vmax.f32 %v5963_v55, %v5964_v48 }
 0x337   : > { %v6056_v62 = vunpack.c.l.b16 %v5980_v35  ;;  %v5981_v24 = vpack.c.bf16 %v5965_v38, %v5965_v38 }
 0x339   : > { %v6071_v32 = vsel %vm6070_vm10, %v6056_v62, %v6069_v13  ;;  %v6057_v39 = vunpack.c.l.b16 %v5981_v24 }
 0x33a   : > { %v6079_v31 = vpack.c.b16 %v6071_v32, %v6071_v32 }
 0x33b   : > { %v6078_v23 = vsel %vm6070_vm10, %v6057_v39, %v6077_v0 }
 0x33c   : > { %v6080_v7 = vpack.c.b16 %v6078_v23, %v6078_v23 }
 0x33e   : > { %6275 = vmatprep.mubr.bf16.mxu1 %v6080_v7 }
 0x33f   : > { %6276 = vmatmul.mubr.bf16.vlgmr.msra.gmra.mrb[96].mxu1 %v6079_v31 }
 0x340   : > { %7487 = vmatpush3.bf16.msra.mxu1 %v8678_v4 }
 0x341   : > { %7488 = vmatprep.subr.bf16.mxu1 %v8679_v51 }
 0x344   : > { %7489 = vmatpush3.bf16.msra.mxu1 %v8680_v10 }
 0x345   : > { %7490 = vmatprep.subr.bf16.mxu1 %v8681_v37 }
 0x348   : > { %7491 = vmatpush3.bf16.msra.mxu1 %v8682_v25 }
 0x349   : > { %7492 = vmatprep.subr.bf16.mxu1 %v8683_v58 }
 0x34c   : > { %7493 = vmatpush3.bf16.msra.mxu1 %v8684_v60 }
 0x34d   : > { %7494 = vmatprep.subr.bf16.mxu1 %v8685_v1 }
 0x350   : > { %7495 = vmatpush3.bf16.msra.mxu1 %v8686_v15 }
 0x351   : > { %7496 = vmatprep.subr.bf16.mxu1 %v8687_v11 }
 0x354   : > { %7497 = vmatpush3.bf16.msra.mxu1 %v8688_v47 }
 0x355   : > { %7498 = vmatprep.subr.bf16.mxu1 %v8689_v17 }
 0x358   : > { %7499 = vmatpush3.bf16.msra.mxu1 %v8690_v19 }
 0x359   : > { %7500 = vmatprep.subr.bf16.mxu1 %v8691_v34 }
 0x35c   : > { %7501 = vmatpush3.bf16.msra.mxu1 %v8692_v33 }
 0x412   : > { %v6277_v6 = vpop.f32.mrb[96].mxu1 }
 0x413   : > { %v6278_v54 = vadd.f32 %v6277_v6, %v6019_v52  ;;  %v6279_v49 = vpop.f32.mrb[97].mxu1 }
 0x414   : > { %v6280_v53 = vadd.f32 %v6279_v49, %v6023_v27  ;;  %v6281_v56 = vpop.f32.mrb[98].mxu1 }
 0x415   : > { %v6282_v30 = vpop.f32.mrb[99].mxu1  ;;  %v6284_v21 = vpack.c.bf16 %v6278_v54, %v6278_v54 }
 0x416   : > { %v6285_v9 = vpack.c.bf16 %v6280_v53, %v6280_v53 }
 0x418   : > { %6453 = vmatprep.mubr.bf16.mxu1 %v6285_v9 }
 0x419   : > { %6454 = vmatmul.mubr.bf16.vlgmr.msra.gmra.mrb[100].mxu1 %v6284_v21 }
 0x4ec   : > { %v7502_v20 = vpop.f32.mrb[100].mxu1 }
 0x4ed   : > { %v7503_v29 = vpop.f32.mrb[101].mxu1 }
 0x4ee   : > { %v7504_v22 = vadd.f32 %v7503_v29, %v7502_v20  ;;  %v7505_v41 = vpop.f32.mrb[102].mxu1 }
 0x4ef   : > { %v7506_v5 = vpop.f32.mrb[103].mxu1 }
 0x4f0   : > { %v6456_v50 = vadd.f32 %v7504_v22, %v7467_v45 }
 0x4f2   : > { %6461 = vst [vmem:[%s281_s13] sm:$0xff] %v6456_v50 }
 0x4f3 PF: > { %s17_s24 = sadd.s32 1, %s8795_s24  }
 0x4f4   : > { %p14_p5 = scmp.ge.s32.totalorder %s17_s24, 4  }
 0x4f6   :  { %16 = sbr.rel (!%p14_p5) target bundleno = 1 (0x1), region = 82 }

</bundles_post_ra>
